<compile_context>
chip_gen: v7x
topology: tpu7x:2x2x1
jax: 0.10.0
libtpu: 0.0.40
codegen_flags: <defaults>
</compile_context>

<pallas_src>
import functools

import jax
import jax.numpy as jnp
from jax import lax
from jax.experimental import pallas as pl
from jax.experimental.pallas import tpu as pltpu

_SUBLANE = 8
_LANE = 128


def _round_up(x, m):
    return ((x + m - 1) // m) * m


# ----------------------------------------------------------------------------
# Pallas kernel: 2-layer GRU recurrence + output Linear, all in VMEM, no grid.
# x_ref is the time-major, tile-padded, flattened input (seq*bp, ip).
# All lane dims (ip, hp, 3*hp, op) are multiples of 128; bp is a multiple of 8.
# ----------------------------------------------------------------------------
def _gru_kernel(x_ref, h0_ref,
                wih0_ref, whh0_ref, bgi0_ref, bhhn0_ref,
                wih1_ref, whh1_ref, bgi1_ref, bhhn1_ref,
                wflux_ref, bflux_ref,
                out1_ref, hn_ref,
                gi0_ref, gi1_ref, l0_ref, l1_ref,
                *, seq, bp, hp):
    h2 = 2 * hp

    def run_layer(gi_ref, whh_ref, bhhn_ref, h_init, lout_ref):
        whh = whh_ref[...]                                       # (hp, 3*hp)
        bhhn = jnp.broadcast_to(bhhn_ref[...], (bp, hp))         # hoisted broadcast

        def step(t, h):
            row = pl.multiple_of(t * bp, bp)                     # sublane-aligned
            gi_t = gi_ref[pl.ds(row, bp), :]                     # whole (8,128) tiles
            gh = jnp.dot(h, whh, preferred_element_type=jnp.float32)
            # gate slices land on 128-lane block boundaries -> whole-vreg ops
            rz = jax.nn.sigmoid(gi_t[:, :h2] + gh[:, :h2])       # fused r|z sigmoid
            r = rz[:, :hp]
            z = rz[:, hp:]
            n = jnp.tanh(gi_t[:, h2:] + r * (gh[:, h2:] + bhhn))
            h_new = (1.0 - z) * n + z * h
            lout_ref[pl.ds(row, bp), :] = h_new                  # dense tile store
            return h_new

        return lax.fori_loop(0, seq, step, h_init, unroll=True)

    # ---- layer 0: input projection for ALL timesteps in one matmul ----------
    gi0_ref[...] = (jnp.dot(x_ref[...], wih0_ref[...],
                            preferred_element_type=jnp.float32) + bgi0_ref[...])
    hn_ref[0] = run_layer(gi0_ref, whh0_ref, bhhn0_ref, h0_ref[0], l0_ref)

    # ---- layer 1: input projection from the completed layer-0 slab ----------
    gi1_ref[...] = (jnp.dot(l0_ref[...], wih1_ref[...],
                            preferred_element_type=jnp.float32) + bgi1_ref[...])
    hn_ref[1] = run_layer(gi1_ref, whh1_ref, bhhn1_ref, h0_ref[1], l1_ref)

    # ---- output Linear (densor_flux): one lane-dense matmul over all steps --
    out1_ref[...] = (jnp.dot(l1_ref[...], wflux_ref[...],
                             preferred_element_type=jnp.float32) + bflux_ref[...])


# ----------------------------------------------------------------------------
# Wrapper: layout conversion / tile padding + one pallas_call.
# ----------------------------------------------------------------------------
@functools.partial(jax.jit, static_argnames=("nout1",))
def pure_ml_gru_forward(inputs, hidden, prep, nout1):
    """inputs: (batch, seq, ninp) batch_first; hidden: (nlayers, batch, nhid)."""
    batch, seq, ninp = inputs.shape
    nlayers, _, nhid = hidden.shape
    assert nlayers == 2, "kernel is specialized for the module's nlayers=2"

    bp = _round_up(batch, _SUBLANE)
    ip = prep["wih0_t"].shape[0]          # padded ninp  (multiple of 128)
    hp = prep["bhhn0"].shape[1]           # padded nhid  (multiple of 128)
    op = prep["wflux_t"].shape[1]         # padded nout1 (multiple of 128)

    # time-major, zero-padded to (8,128) tiles, flattened so the kernel never
    # reshapes in VMEM
    x_tm = jnp.transpose(inputs, (1, 0, 2)).astype(jnp.float32)     # (seq,b,ninp)
    x_pad = jnp.zeros((seq, bp, ip), jnp.float32).at[:, :batch, :ninp].set(x_tm)
    x2d = x_pad.reshape(seq * bp, ip)

    h0_pad = jnp.zeros((nlayers, bp, hp), jnp.float32).at[:, :batch, :nhid].set(
        hidden.astype(jnp.float32))

    vmem = pl.BlockSpec(memory_space=pltpu.MemorySpace.VMEM)

    out1_2d, hn_pad = pl.pallas_call(
        functools.partial(_gru_kernel, seq=seq, bp=bp, hp=hp),
        out_shape=(
            jax.ShapeDtypeStruct((seq * bp, op), jnp.float32),
            jax.ShapeDtypeStruct((nlayers, bp, hp), jnp.float32),
        ),
        in_specs=[vmem] * 12,
        out_specs=(vmem, vmem),
        scratch_shapes=[
            pltpu.VMEM((seq * bp, 3 * hp), jnp.float32),  # gi layer 0
            pltpu.VMEM((seq * bp, 3 * hp), jnp.float32),  # gi layer 1
            pltpu.VMEM((seq * bp, hp), jnp.float32),      # layer-0 outputs
            pltpu.VMEM((seq * bp, hp), jnp.float32),      # layer-1 outputs
        ],
        compiler_params=pltpu.CompilerParams(
            vmem_limit_bytes=32 * 1024 * 1024),
    )(x2d, h0_pad,
      prep["wih0_t"], prep["whh0_t"], prep["bgi0"], prep["bhhn0"],
      prep["wih1_t"], prep["whh1_t"], prep["bgi1"], prep["bhhn1"],
      prep["wflux_t"], prep["bflux"])

    # slice real rows/lanes back out, return to batch_first
    out1 = out1_2d.reshape(seq, bp, op)[:, :batch, :nout1].transpose(1, 0, 2)
    h_n = hn_pad[:, :batch, :nhid]
    return out1, h_n


# ----------------------------------------------------------------------------
# One-time parameter prep: pre-transpose, fold biases, and pad every gate
# segment to its own 128-lane block (lane-dense, no sub-vreg gate slicing).
#   bgi_l  = b_ih_l + [b_hh_r, b_hh_z, 0]   (folded into the precomputed gi)
#   bhhn_l = b_hh_l[2H:3H]                  (must stay attached to gh_n)
# Padded regions are zero so padded hidden lanes stay exactly zero.
# ----------------------------------------------------------------------------
def prepare_params(params, ninp, nhid, nout1):
    hp = _round_up(nhid, _LANE)
    ip = _round_up(ninp, _LANE)
    op = _round_up(nout1, _LANE)

    def pad_gates_t(w, in_pad):
        # w: (3*nhid, in_dim) PyTorch layout -> transposed, per-gate 128-lane blocks
        w_t = w.T.astype(jnp.float32)
        out = jnp.zeros((in_pad, 3 * hp), jnp.float32)
        for g in range(3):
            out = out.at[:w_t.shape[0], g * hp:g * hp + nhid].set(
                w_t[:, g * nhid:(g + 1) * nhid])
        return out

    def pad_gate_bias(b):
        out = jnp.zeros((1, 3 * hp), jnp.float32)
        for g in range(3):
            out = out.at[0, g * hp:g * hp + nhid].set(b[g * nhid:(g + 1) * nhid])
        return out

    def fold(bih, bhh):
        bgi = bih + jnp.concatenate(
            [bhh[:2 * nhid], jnp.zeros((nhid,), bhh.dtype)])
        bgi_p = pad_gate_bias(bgi)
        bhhn_p = jnp.zeros((1, hp), jnp.float32).at[0, :nhid].set(bhh[2 * nhid:])
        return bgi_p, bhhn_p

    bgi0, bhhn0 = fold(params["b_ih_l0"], params["b_hh_l0"])
    bgi1, bhhn1 = fold(params["b_ih_l1"], params["b_hh_l1"])

    wflux_t = jnp.zeros((hp, op), jnp.float32).at[:nhid, :nout1].set(
        params["w_flux"].T.astype(jnp.float32))
    bflux = jnp.zeros((1, op), jnp.float32).at[0, :nout1].set(
        params["b_flux"].astype(jnp.float32))

    return {
        "wih0_t": pad_gates_t(params["w_ih_l0"], ip),   # (ip, 3*hp)
        "whh0_t": pad_gates_t(params["w_hh_l0"], hp),   # (hp, 3*hp)
        "bgi0": bgi0, "bhhn0": bhhn0,
        "wih1_t": pad_gates_t(params["w_ih_l1"], hp),   # (hp, 3*hp)
        "whh1_t": pad_gates_t(params["w_hh_l1"], hp),   # (hp, 3*hp)
        "bgi1": bgi1, "bhhn1": bhhn1,
        "wflux_t": wflux_t,                             # (hp, op)
        "bflux": bflux,                                 # (1, op)
    }


# ----------------------------------------------------------------------------
# Pure-JAX reference (mirrors torch.nn.GRU + Linear semantics exactly).
# ----------------------------------------------------------------------------
def reference_forward(inputs, hidden, params, nhid, nlayers):
    def cell(x_t, h_prev, wih, whh, bih, bhh):
        gi = x_t @ wih.T + bih
        gh = h_prev @ whh.T + bhh
        r = jax.nn.sigmoid(gi[:, :nhid] + gh[:, :nhid])
        z = jax.nn.sigmoid(gi[:, nhid:2 * nhid] + gh[:, nhid:2 * nhid])
        n = jnp.tanh(gi[:, 2 * nhid:] + r * gh[:, 2 * nhid:])
        return (1.0 - z) * n + z * h_prev

    seq = inputs.shape[1]
    layer_in = inputs
    h_n = []
    for l in range(nlayers):
        wih = params[f"w_ih_l{l}"]
        whh = params[f"w_hh_l{l}"]
        bih = params[f"b_ih_l{l}"]
        bhh = params[f"b_hh_l{l}"]
        h = hidden[l]
        outs = []
        for t in range(seq):
            h = cell(layer_in[:, t, :], h, wih, whh, bih, bhh)
            outs.append(h)
        layer_in = jnp.stack(outs, axis=1)
        h_n.append(h)
    out1 = layer_in @ params["w_flux"].T + params["b_flux"]
    return out1, jnp.stack(h_n, axis=0)


# ----------------------------------------------------------------------------
# Deterministic parameter init (shapes per nn.GRU / nn.Linear __init__).
# ----------------------------------------------------------------------------
def init_params(key, ninp, nhid, nlayers, nout1):
    k = 1.0 / jnp.sqrt(jnp.float32(nhid))
    params = {}
    keys = jax.random.split(key, 4 * nlayers + 1)
    for l in range(nlayers):
        in_feat = ninp if l == 0 else nhid
        k0, k1, k2, k3 = keys[4 * l: 4 * l + 4]
        params[f"w_ih_l{l}"] = jax.random.uniform(
            k0, (3 * nhid, in_feat), jnp.float32, -k, k)
        params[f"w_hh_l{l}"] = jax.random.uniform(
            k1, (3 * nhid, nhid), jnp.float32, -k, k)
        params[f"b_ih_l{l}"] = jax.random.uniform(
            k2, (3 * nhid,), jnp.float32, -k, k)
        params[f"b_hh_l{l}"] = jax.random.uniform(
            k3, (3 * nhid,), jnp.float32, -k, k)
    # densor_flux: weight ~ U(-0.1, 0.1), bias = 0  (per init_weights())
    params["w_flux"] = jax.random.uniform(
        keys[-1], (nout1, nhid), jnp.float32, -0.1, 0.1)
    params["b_flux"] = jnp.zeros((nout1,), jnp.float32)
    return params


if __name__ == "__main__":
    ninp, nhid, nlayers, nout1 = 4, 8, 2, 1
    batch, seq = 2, 8

    root = jax.random.PRNGKey(0)
    k_param, k_x = jax.random.split(root)

    params = init_params(k_param, ninp, nhid, nlayers, nout1)
    prep = prepare_params(params, ninp, nhid, nout1)   # one-time weight prep
    inputs = jax.random.normal(k_x, (batch, seq, ninp), jnp.float32)
    hidden = jnp.zeros((nlayers, batch, nhid), jnp.float32)  # init_hidden(bsz)

    out1, h_n = pure_ml_gru_forward(inputs, hidden, prep, nout1)
    out1 = jax.block_until_ready(out1)
    h_n = jax.block_until_ready(h_n)

    ref_out1, ref_hn = reference_forward(inputs, hidden, params, nhid, nlayers)

    assert out1.shape == (batch, seq, nout1), out1.shape
    assert h_n.shape == (nlayers, batch, nhid), h_n.shape
    assert jnp.allclose(out1, ref_out1, rtol=1e-5, atol=1e-5)
    assert jnp.allclose(h_n, ref_hn, rtol=1e-5, atol=1e-5)

    print("KERNEL_OK")
</pallas_src>

<mosaic_0001>
module attributes {stable_mosaic.version = 11 : i64} {
  func.func @_gru_kernel(%arg0: memref<64x128xf32, #tpu.memory_space<vmem>>, %arg1: memref<2x8x128xf32, #tpu.memory_space<vmem>>, %arg2: memref<128x384xf32, #tpu.memory_space<vmem>>, %arg3: memref<128x384xf32, #tpu.memory_space<vmem>>, %arg4: memref<1x384xf32, #tpu.memory_space<vmem>>, %arg5: memref<1x128xf32, #tpu.memory_space<vmem>>, %arg6: memref<128x384xf32, #tpu.memory_space<vmem>>, %arg7: memref<128x384xf32, #tpu.memory_space<vmem>>, %arg8: memref<1x384xf32, #tpu.memory_space<vmem>>, %arg9: memref<1x128xf32, #tpu.memory_space<vmem>>, %arg10: memref<128x128xf32, #tpu.memory_space<vmem>>, %arg11: memref<1x128xf32, #tpu.memory_space<vmem>>, %arg12: memref<64x128xf32, #tpu.memory_space<vmem>>, %arg13: memref<2x8x128xf32, #tpu.memory_space<vmem>>, %arg14: memref<64x384xf32, #tpu.memory_space<vmem>>, %arg15: memref<64x384xf32, #tpu.memory_space<vmem>>, %arg16: memref<64x128xf32, #tpu.memory_space<vmem>>, %arg17: memref<64x128xf32, #tpu.memory_space<vmem>>) attributes {dimension_semantics = [], scalar_prefetch = 0 : i64, scratch_operands = 4 : i64, tpu.core_type = #tpu.core_type<tc>} {
    %c0 = arith.constant 0 : index
    %c0_0 = arith.constant 0 : index
    %0 = vector.load %arg0[%c0, %c0_0] : memref<64x128xf32, #tpu.memory_space<vmem>>, vector<64x128xf32>
    %c0_1 = arith.constant 0 : index
    %c0_2 = arith.constant 0 : index
    %1 = vector.load %arg2[%c0_1, %c0_2] : memref<128x384xf32, #tpu.memory_space<vmem>>, vector<128x384xf32>
    %cst = arith.constant dense<0.000000e+00> : vector<64x384xf32>
    %2 = tpu.matmul %0, %1, %cst {dimension_numbers = #tpu.dot_dimension_numbers<[1], [0], [0], [1], [0, 0, 1, 1], [], []>} : vector<64x128xf32>, vector<128x384xf32>, vector<64x384xf32> -> vector<64x384xf32>
    %c0_3 = arith.constant 0 : index
    %c0_4 = arith.constant 0 : index
    %3 = vector.load %arg4[%c0_3, %c0_4] : memref<1x384xf32, #tpu.memory_space<vmem>>, vector<1x384xf32>
    %4 = vector.broadcast %3 : vector<1x384xf32> to vector<64x384xf32>
    %5 = arith.addf %2, %4 : vector<64x384xf32>
    %c0_5 = arith.constant 0 : index
    %c0_6 = arith.constant 0 : index
    %6 = vector.load %arg14[%c0_5, %c0_6] : memref<64x384xf32, #tpu.memory_space<vmem>>, vector<64x384xf32>
    tpu.vector_store %arg14[%c0_5, %c0_6], %5 {strides = array<i32>} : memref<64x384xf32, #tpu.memory_space<vmem>>, vector<64x384xf32>,
    %c0_7 = arith.constant 0 : index
    %c0_8 = arith.constant 0 : index
    %c0_9 = arith.constant 0 : index
    %7 = vector.load %arg1[%c0_7, %c0_8, %c0_9] : memref<2x8x128xf32, #tpu.memory_space<vmem>>, vector<1x8x128xf32>
    %8 = vector.shape_cast %7 : vector<1x8x128xf32> to vector<8x128xf32>
    %c0_10 = arith.constant 0 : index
    %c0_11 = arith.constant 0 : index
    %9 = vector.load %arg3[%c0_10, %c0_11] : memref<128x384xf32, #tpu.memory_space<vmem>>, vector<128x384xf32>
    %c0_12 = arith.constant 0 : index
    %c0_13 = arith.constant 0 : index
    %10 = vector.load %arg5[%c0_12, %c0_13] : memref<1x128xf32, #tpu.memory_space<vmem>>, vector<1x128xf32>
    %11 = vector.shape_cast %10 : vector<1x128xf32> to vector<1x128xf32>
    %12 = vector.broadcast %11 : vector<1x128xf32> to vector<8x128xf32>
    %c0_i32 = arith.constant 0 : i32
    %c8_i32 = arith.constant 8 : i32
    %13 = arith.muli %c0_i32, %c8_i32 : i32
    %14 = tpu.assume_multiple %13, 8 : i32
    %15 = arith.index_cast %14 : i32 to index
    %c0_14 = arith.constant 0 : index
    %16 = vector.load %arg14[%15, %c0_14] : memref<64x384xf32, #tpu.memory_space<vmem>>, vector<8x384xf32>
    %cst_15 = arith.constant dense<0.000000e+00> : vector<8x384xf32>
    %17 = tpu.matmul %8, %9, %cst_15 {dimension_numbers = #tpu.dot_dimension_numbers<[1], [0], [0], [1], [0, 0, 1, 1], [], []>} : vector<8x128xf32>, vector<128x384xf32>, vector<8x384xf32> -> vector<8x384xf32>
    %18 = vector.extract_strided_slice %16 {offsets = [0, 0], sizes = [8, 256], strides = [1, 1]} : vector<8x384xf32> to vector<8x256xf32>
    %19 = vector.extract_strided_slice %17 {offsets = [0, 0], sizes = [8, 256], strides = [1, 1]} : vector<8x384xf32> to vector<8x256xf32>
    %20 = arith.addf %18, %19 : vector<8x256xf32>
    %21 = arith.negf %20 : vector<8x256xf32>
    %22 = math.exp %21 : vector<8x256xf32>
    %cst_16 = arith.constant 1.000000e+00 : f32
    %23 = vector.broadcast %cst_16 : f32 to vector<8x256xf32>
    %24 = arith.addf %23, %22 : vector<8x256xf32>
    %25 = arith.divf %23, %24 : vector<8x256xf32>
    %26 = vector.extract_strided_slice %25 {offsets = [0, 0], sizes = [8, 128], strides = [1, 1]} : vector<8x256xf32> to vector<8x128xf32>
    %27 = vector.extract_strided_slice %25 {offsets = [0, 128], sizes = [8, 128], strides = [1, 1]} : vector<8x256xf32> to vector<8x128xf32>
    %28 = vector.extract_strided_slice %16 {offsets = [0, 256], sizes = [8, 128], strides = [1, 1]} : vector<8x384xf32> to vector<8x128xf32>
    %29 = vector.extract_strided_slice %17 {offsets = [0, 256], sizes = [8, 128], strides = [1, 1]} : vector<8x384xf32> to vector<8x128xf32>
    %30 = arith.addf %29, %12 : vector<8x128xf32>
    %31 = arith.mulf %26, %30 : vector<8x128xf32>
    %32 = arith.addf %28, %31 : vector<8x128xf32>
    %33 = math.tanh %32 : vector<8x128xf32>
    %cst_17 = arith.constant 1.000000e+00 : f32
    %34 = vector.broadcast %cst_17 : f32 to vector<8x128xf32>
    %35 = arith.subf %34, %27 : vector<8x128xf32>
    %36 = arith.mulf %35, %33 : vector<8x128xf32>
    %37 = arith.mulf %27, %8 : vector<8x128xf32>
    %38 = arith.addf %36, %37 : vector<8x128xf32>
    %39 = arith.index_cast %14 : i32 to index
    %c0_18 = arith.constant 0 : index
    %40 = vector.load %arg16[%39, %c0_18] : memref<64x128xf32, #tpu.memory_space<vmem>>, vector<8x128xf32>
    tpu.vector_store %arg16[%39, %c0_18], %38 {strides = array<i32>} : memref<64x128xf32, #tpu.memory_space<vmem>>, vector<8x128xf32>,
    %c1_i32 = arith.constant 1 : i32
    %c8_i32_19 = arith.constant 8 : i32
    %41 = arith.muli %c1_i32, %c8_i32_19 : i32
    %42 = tpu.assume_multiple %41, 8 : i32
    %43 = arith.index_cast %42 : i32 to index
    %c0_20 = arith.constant 0 : index
    %44 = vector.load %arg14[%43, %c0_20] : memref<64x384xf32, #tpu.memory_space<vmem>>, vector<8x384xf32>
    %cst_21 = arith.constant dense<0.000000e+00> : vector<8x384xf32>
    %45 = tpu.matmul %38, %9, %cst_21 {dimension_numbers = #tpu.dot_dimension_numbers<[1], [0], [0], [1], [0, 0, 1, 1], [], []>} : vector<8x128xf32>, vector<128x384xf32>, vector<8x384xf32> -> vector<8x384xf32>
    %46 = vector.extract_strided_slice %44 {offsets = [0, 0], sizes = [8, 256], strides = [1, 1]} : vector<8x384xf32> to vector<8x256xf32>
    %47 = vector.extract_strided_slice %45 {offsets = [0, 0], sizes = [8, 256], strides = [1, 1]} : vector<8x384xf32> to vector<8x256xf32>
    %48 = arith.addf %46, %47 : vector<8x256xf32>
    %49 = arith.negf %48 : vector<8x256xf32>
    %50 = math.exp %49 : vector<8x256xf32>
    %cst_22 = arith.constant 1.000000e+00 : f32
    %51 = vector.broadcast %cst_22 : f32 to vector<8x256xf32>
    %52 = arith.addf %51, %50 : vector<8x256xf32>
    %53 = arith.divf %51, %52 : vector<8x256xf32>
    %54 = vector.extract_strided_slice %53 {offsets = [0, 0], sizes = [8, 128], strides = [1, 1]} : vector<8x256xf32> to vector<8x128xf32>
    %55 = vector.extract_strided_slice %53 {offsets = [0, 128], sizes = [8, 128], strides = [1, 1]} : vector<8x256xf32> to vector<8x128xf32>
    %56 = vector.extract_strided_slice %44 {offsets = [0, 256], sizes = [8, 128], strides = [1, 1]} : vector<8x384xf32> to vector<8x128xf32>
    %57 = vector.extract_strided_slice %45 {offsets = [0, 256], sizes = [8, 128], strides = [1, 1]} : vector<8x384xf32> to vector<8x128xf32>
    %58 = arith.addf %57, %12 : vector<8x128xf32>
    %59 = arith.mulf %54, %58 : vector<8x128xf32>
    %60 = arith.addf %56, %59 : vector<8x128xf32>
    %61 = math.tanh %60 : vector<8x128xf32>
    %cst_23 = arith.constant 1.000000e+00 : f32
    %62 = vector.broadcast %cst_23 : f32 to vector<8x128xf32>
    %63 = arith.subf %62, %55 : vector<8x128xf32>
    %64 = arith.mulf %63, %61 : vector<8x128xf32>
    %65 = arith.mulf %55, %38 : vector<8x128xf32>
    %66 = arith.addf %64, %65 : vector<8x128xf32>
    %67 = arith.index_cast %42 : i32 to index
    %c0_24 = arith.constant 0 : index
    %68 = vector.load %arg16[%67, %c0_24] : memref<64x128xf32, #tpu.memory_space<vmem>>, vector<8x128xf32>
    tpu.vector_store %arg16[%67, %c0_24], %66 {strides = array<i32>} : memref<64x128xf32, #tpu.memory_space<vmem>>, vector<8x128xf32>,
    %c2_i32 = arith.constant 2 : i32
    %c8_i32_25 = arith.constant 8 : i32
    %69 = arith.muli %c2_i32, %c8_i32_25 : i32
    %70 = tpu.assume_multiple %69, 8 : i32
    %71 = arith.index_cast %70 : i32 to index
    %c0_26 = arith.constant 0 : index
    %72 = vector.load %arg14[%71, %c0_26] : memref<64x384xf32, #tpu.memory_space<vmem>>, vector<8x384xf32>
    %cst_27 = arith.constant dense<0.000000e+00> : vector<8x384xf32>
    %73 = tpu.matmul %66, %9, %cst_27 {dimension_numbers = #tpu.dot_dimension_numbers<[1], [0], [0], [1], [0, 0, 1, 1], [], []>} : vector<8x128xf32>, vector<128x384xf32>, vector<8x384xf32> -> vector<8x384xf32>
    %74 = vector.extract_strided_slice %72 {offsets = [0, 0], sizes = [8, 256], strides = [1, 1]} : vector<8x384xf32> to vector<8x256xf32>
    %75 = vector.extract_strided_slice %73 {offsets = [0, 0], sizes = [8, 256], strides = [1, 1]} : vector<8x384xf32> to vector<8x256xf32>
    %76 = arith.addf %74, %75 : vector<8x256xf32>
    %77 = arith.negf %76 : vector<8x256xf32>
    %78 = math.exp %77 : vector<8x256xf32>
    %cst_28 = arith.constant 1.000000e+00 : f32
    %79 = vector.broadcast %cst_28 : f32 to vector<8x256xf32>
    %80 = arith.addf %79, %78 : vector<8x256xf32>
    %81 = arith.divf %79, %80 : vector<8x256xf32>
    %82 = vector.extract_strided_slice %81 {offsets = [0, 0], sizes = [8, 128], strides = [1, 1]} : vector<8x256xf32> to vector<8x128xf32>
    %83 = vector.extract_strided_slice %81 {offsets = [0, 128], sizes = [8, 128], strides = [1, 1]} : vector<8x256xf32> to vector<8x128xf32>
    %84 = vector.extract_strided_slice %72 {offsets = [0, 256], sizes = [8, 128], strides = [1, 1]} : vector<8x384xf32> to vector<8x128xf32>
    %85 = vector.extract_strided_slice %73 {offsets = [0, 256], sizes = [8, 128], strides = [1, 1]} : vector<8x384xf32> to vector<8x128xf32>
    %86 = arith.addf %85, %12 : vector<8x128xf32>
    %87 = arith.mulf %82, %86 : vector<8x128xf32>
    %88 = arith.addf %84, %87 : vector<8x128xf32>
    %89 = math.tanh %88 : vector<8x128xf32>
    %cst_29 = arith.constant 1.000000e+00 : f32
    %90 = vector.broadcast %cst_29 : f32 to vector<8x128xf32>
    %91 = arith.subf %90, %83 : vector<8x128xf32>
    %92 = arith.mulf %91, %89 : vector<8x128xf32>
    %93 = arith.mulf %83, %66 : vector<8x128xf32>
    %94 = arith.addf %92, %93 : vector<8x128xf32>
    %95 = arith.index_cast %70 : i32 to index
    %c0_30 = arith.constant 0 : index
    %96 = vector.load %arg16[%95, %c0_30] : memref<64x128xf32, #tpu.memory_space<vmem>>, vector<8x128xf32>
    tpu.vector_store %arg16[%95, %c0_30], %94 {strides = array<i32>} : memref<64x128xf32, #tpu.memory_space<vmem>>, vector<8x128xf32>,
    %c3_i32 = arith.constant 3 : i32
    %c8_i32_31 = arith.constant 8 : i32
    %97 = arith.muli %c3_i32, %c8_i32_31 : i32
    %98 = tpu.assume_multiple %97, 8 : i32
    %99 = arith.index_cast %98 : i32 to index
    %c0_32 = arith.constant 0 : index
    %100 = vector.load %arg14[%99, %c0_32] : memref<64x384xf32, #tpu.memory_space<vmem>>, vector<8x384xf32>
    %cst_33 = arith.constant dense<0.000000e+00> : vector<8x384xf32>
    %101 = tpu.matmul %94, %9, %cst_33 {dimension_numbers = #tpu.dot_dimension_numbers<[1], [0], [0], [1], [0, 0, 1, 1], [], []>} : vector<8x128xf32>, vector<128x384xf32>, vector<8x384xf32> -> vector<8x384xf32>
    %102 = vector.extract_strided_slice %100 {offsets = [0, 0], sizes = [8, 256], strides = [1, 1]} : vector<8x384xf32> to vector<8x256xf32>
    %103 = vector.extract_strided_slice %101 {offsets = [0, 0], sizes = [8, 256], strides = [1, 1]} : vector<8x384xf32> to vector<8x256xf32>
    %104 = arith.addf %102, %103 : vector<8x256xf32>
    %105 = arith.negf %104 : vector<8x256xf32>
    %106 = math.exp %105 : vector<8x256xf32>
    %cst_34 = arith.constant 1.000000e+00 : f32
    %107 = vector.broadcast %cst_34 : f32 to vector<8x256xf32>
    %108 = arith.addf %107, %106 : vector<8x256xf32>
    %109 = arith.divf %107, %108 : vector<8x256xf32>
    %110 = vector.extract_strided_slice %109 {offsets = [0, 0], sizes = [8, 128], strides = [1, 1]} : vector<8x256xf32> to vector<8x128xf32>
    %111 = vector.extract_strided_slice %109 {offsets = [0, 128], sizes = [8, 128], strides = [1, 1]} : vector<8x256xf32> to vector<8x128xf32>
    %112 = vector.extract_strided_slice %100 {offsets = [0, 256], sizes = [8, 128], strides = [1, 1]} : vector<8x384xf32> to vector<8x128xf32>
    %113 = vector.extract_strided_slice %101 {offsets = [0, 256], sizes = [8, 128], strides = [1, 1]} : vector<8x384xf32> to vector<8x128xf32>
    %114 = arith.addf %113, %12 : vector<8x128xf32>
    %115 = arith.mulf %110, %114 : vector<8x128xf32>
    %116 = arith.addf %112, %115 : vector<8x128xf32>
    %117 = math.tanh %116 : vector<8x128xf32>
    %cst_35 = arith.constant 1.000000e+00 : f32
    %118 = vector.broadcast %cst_35 : f32 to vector<8x128xf32>
    %119 = arith.subf %118, %111 : vector<8x128xf32>
    %120 = arith.mulf %119, %117 : vector<8x128xf32>
    %121 = arith.mulf %111, %94 : vector<8x128xf32>
    %122 = arith.addf %120, %121 : vector<8x128xf32>
    %123 = arith.index_cast %98 : i32 to index
    %c0_36 = arith.constant 0 : index
    %124 = vector.load %arg16[%123, %c0_36] : memref<64x128xf32, #tpu.memory_space<vmem>>, vector<8x128xf32>
    tpu.vector_store %arg16[%123, %c0_36], %122 {strides = array<i32>} : memref<64x128xf32, #tpu.memory_space<vmem>>, vector<8x128xf32>,
    %c4_i32 = arith.constant 4 : i32
    %c8_i32_37 = arith.constant 8 : i32
    %125 = arith.muli %c4_i32, %c8_i32_37 : i32
    %126 = tpu.assume_multiple %125, 8 : i32
    %127 = arith.index_cast %126 : i32 to index
    %c0_38 = arith.constant 0 : index
    %128 = vector.load %arg14[%127, %c0_38] : memref<64x384xf32, #tpu.memory_space<vmem>>, vector<8x384xf32>
    %cst_39 = arith.constant dense<0.000000e+00> : vector<8x384xf32>
    %129 = tpu.matmul %122, %9, %cst_39 {dimension_numbers = #tpu.dot_dimension_numbers<[1], [0], [0], [1], [0, 0, 1, 1], [], []>} : vector<8x128xf32>, vector<128x384xf32>, vector<8x384xf32> -> vector<8x384xf32>
    %130 = vector.extract_strided_slice %128 {offsets = [0, 0], sizes = [8, 256], strides = [1, 1]} : vector<8x384xf32> to vector<8x256xf32>
    %131 = vector.extract_strided_slice %129 {offsets = [0, 0], sizes = [8, 256], strides = [1, 1]} : vector<8x384xf32> to vector<8x256xf32>
    %132 = arith.addf %130, %131 : vector<8x256xf32>
    %133 = arith.negf %132 : vector<8x256xf32>
    %134 = math.exp %133 : vector<8x256xf32>
    %cst_40 = arith.constant 1.000000e+00 : f32
    %135 = vector.broadcast %cst_40 : f32 to vector<8x256xf32>
    %136 = arith.addf %135, %134 : vector<8x256xf32>
    %137 = arith.divf %135, %136 : vector<8x256xf32>
    %138 = vector.extract_strided_slice %137 {offsets = [0, 0], sizes = [8, 128], strides = [1, 1]} : vector<8x256xf32> to vector<8x128xf32>
    %139 = vector.extract_strided_slice %137 {offsets = [0, 128], sizes = [8, 128], strides = [1, 1]} : vector<8x256xf32> to vector<8x128xf32>
    %140 = vector.extract_strided_slice %128 {offsets = [0, 256], sizes = [8, 128], strides = [1, 1]} : vector<8x384xf32> to vector<8x128xf32>
    %141 = vector.extract_strided_slice %129 {offsets = [0, 256], sizes = [8, 128], strides = [1, 1]} : vector<8x384xf32> to vector<8x128xf32>
    %142 = arith.addf %141, %12 : vector<8x128xf32>
    %143 = arith.mulf %138, %142 : vector<8x128xf32>
    %144 = arith.addf %140, %143 : vector<8x128xf32>
    %145 = math.tanh %144 : vector<8x128xf32>
    %cst_41 = arith.constant 1.000000e+00 : f32
    %146 = vector.broadcast %cst_41 : f32 to vector<8x128xf32>
    %147 = arith.subf %146, %139 : vector<8x128xf32>
    %148 = arith.mulf %147, %145 : vector<8x128xf32>
    %149 = arith.mulf %139, %122 : vector<8x128xf32>
    %150 = arith.addf %148, %149 : vector<8x128xf32>
    %151 = arith.index_cast %126 : i32 to index
    %c0_42 = arith.constant 0 : index
    %152 = vector.load %arg16[%151, %c0_42] : memref<64x128xf32, #tpu.memory_space<vmem>>, vector<8x128xf32>
    tpu.vector_store %arg16[%151, %c0_42], %150 {strides = array<i32>} : memref<64x128xf32, #tpu.memory_space<vmem>>, vector<8x128xf32>,
    %c5_i32 = arith.constant 5 : i32
    %c8_i32_43 = arith.constant 8 : i32
    %153 = arith.muli %c5_i32, %c8_i32_43 : i32
    %154 = tpu.assume_multiple %153, 8 : i32
    %155 = arith.index_cast %154 : i32 to index
    %c0_44 = arith.constant 0 : index
    %156 = vector.load %arg14[%155, %c0_44] : memref<64x384xf32, #tpu.memory_space<vmem>>, vector<8x384xf32>
    %cst_45 = arith.constant dense<0.000000e+00> : vector<8x384xf32>
    %157 = tpu.matmul %150, %9, %cst_45 {dimension_numbers = #tpu.dot_dimension_numbers<[1], [0], [0], [1], [0, 0, 1, 1], [], []>} : vector<8x128xf32>, vector<128x384xf32>, vector<8x384xf32> -> vector<8x384xf32>
    %158 = vector.extract_strided_slice %156 {offsets = [0, 0], sizes = [8, 256], strides = [1, 1]} : vector<8x384xf32> to vector<8x256xf32>
    %159 = vector.extract_strided_slice %157 {offsets = [0, 0], sizes = [8, 256], strides = [1, 1]} : vector<8x384xf32> to vector<8x256xf32>
    %160 = arith.addf %158, %159 : vector<8x256xf32>
    %161 = arith.negf %160 : vector<8x256xf32>
    %162 = math.exp %161 : vector<8x256xf32>
    %cst_46 = arith.constant 1.000000e+00 : f32
    %163 = vector.broadcast %cst_46 : f32 to vector<8x256xf32>
    %164 = arith.addf %163, %162 : vector<8x256xf32>
    %165 = arith.divf %163, %164 : vector<8x256xf32>
    %166 = vector.extract_strided_slice %165 {offsets = [0, 0], sizes = [8, 128], strides = [1, 1]} : vector<8x256xf32> to vector<8x128xf32>
    %167 = vector.extract_strided_slice %165 {offsets = [0, 128], sizes = [8, 128], strides = [1, 1]} : vector<8x256xf32> to vector<8x128xf32>
    %168 = vector.extract_strided_slice %156 {offsets = [0, 256], sizes = [8, 128], strides = [1, 1]} : vector<8x384xf32> to vector<8x128xf32>
    %169 = vector.extract_strided_slice %157 {offsets = [0, 256], sizes = [8, 128], strides = [1, 1]} : vector<8x384xf32> to vector<8x128xf32>
    %170 = arith.addf %169, %12 : vector<8x128xf32>
    %171 = arith.mulf %166, %170 : vector<8x128xf32>
    %172 = arith.addf %168, %171 : vector<8x128xf32>
    %173 = math.tanh %172 : vector<8x128xf32>
    %cst_47 = arith.constant 1.000000e+00 : f32
    %174 = vector.broadcast %cst_47 : f32 to vector<8x128xf32>
    %175 = arith.subf %174, %167 : vector<8x128xf32>
    %176 = arith.mulf %175, %173 : vector<8x128xf32>
    %177 = arith.mulf %167, %150 : vector<8x128xf32>
    %178 = arith.addf %176, %177 : vector<8x128xf32>
    %179 = arith.index_cast %154 : i32 to index
    %c0_48 = arith.constant 0 : index
    %180 = vector.load %arg16[%179, %c0_48] : memref<64x128xf32, #tpu.memory_space<vmem>>, vector<8x128xf32>
    tpu.vector_store %arg16[%179, %c0_48], %178 {strides = array<i32>} : memref<64x128xf32, #tpu.memory_space<vmem>>, vector<8x128xf32>,
    %c6_i32 = arith.constant 6 : i32
    %c8_i32_49 = arith.constant 8 : i32
    %181 = arith.muli %c6_i32, %c8_i32_49 : i32
    %182 = tpu.assume_multiple %181, 8 : i32
    %183 = arith.index_cast %182 : i32 to index
    %c0_50 = arith.constant 0 : index
    %184 = vector.load %arg14[%183, %c0_50] : memref<64x384xf32, #tpu.memory_space<vmem>>, vector<8x384xf32>
    %cst_51 = arith.constant dense<0.000000e+00> : vector<8x384xf32>
    %185 = tpu.matmul %178, %9, %cst_51 {dimension_numbers = #tpu.dot_dimension_numbers<[1], [0], [0], [1], [0, 0, 1, 1], [], []>} : vector<8x128xf32>, vector<128x384xf32>, vector<8x384xf32> -> vector<8x384xf32>
    %186 = vector.extract_strided_slice %184 {offsets = [0, 0], sizes = [8, 256], strides = [1, 1]} : vector<8x384xf32> to vector<8x256xf32>
    %187 = vector.extract_strided_slice %185 {offsets = [0, 0], sizes = [8, 256], strides = [1, 1]} : vector<8x384xf32> to vector<8x256xf32>
    %188 = arith.addf %186, %187 : vector<8x256xf32>
    %189 = arith.negf %188 : vector<8x256xf32>
    %190 = math.exp %189 : vector<8x256xf32>
    %cst_52 = arith.constant 1.000000e+00 : f32
    %191 = vector.broadcast %cst_52 : f32 to vector<8x256xf32>
    %192 = arith.addf %191, %190 : vector<8x256xf32>
    %193 = arith.divf %191, %192 : vector<8x256xf32>
    %194 = vector.extract_strided_slice %193 {offsets = [0, 0], sizes = [8, 128], strides = [1, 1]} : vector<8x256xf32> to vector<8x128xf32>
    %195 = vector.extract_strided_slice %193 {offsets = [0, 128], sizes = [8, 128], strides = [1, 1]} : vector<8x256xf32> to vector<8x128xf32>
    %196 = vector.extract_strided_slice %184 {offsets = [0, 256], sizes = [8, 128], strides = [1, 1]} : vector<8x384xf32> to vector<8x128xf32>
    %197 = vector.extract_strided_slice %185 {offsets = [0, 256], sizes = [8, 128], strides = [1, 1]} : vector<8x384xf32> to vector<8x128xf32>
    %198 = arith.addf %197, %12 : vector<8x128xf32>
    %199 = arith.mulf %194, %198 : vector<8x128xf32>
    %200 = arith.addf %196, %199 : vector<8x128xf32>
    %201 = math.tanh %200 : vector<8x128xf32>
    %cst_53 = arith.constant 1.000000e+00 : f32
    %202 = vector.broadcast %cst_53 : f32 to vector<8x128xf32>
    %203 = arith.subf %202, %195 : vector<8x128xf32>
    %204 = arith.mulf %203, %201 : vector<8x128xf32>
    %205 = arith.mulf %195, %178 : vector<8x128xf32>
    %206 = arith.addf %204, %205 : vector<8x128xf32>
    %207 = arith.index_cast %182 : i32 to index
    %c0_54 = arith.constant 0 : index
    %208 = vector.load %arg16[%207, %c0_54] : memref<64x128xf32, #tpu.memory_space<vmem>>, vector<8x128xf32>
    tpu.vector_store %arg16[%207, %c0_54], %206 {strides = array<i32>} : memref<64x128xf32, #tpu.memory_space<vmem>>, vector<8x128xf32>,
    %c7_i32 = arith.constant 7 : i32
    %c8_i32_55 = arith.constant 8 : i32
    %209 = arith.muli %c7_i32, %c8_i32_55 : i32
    %210 = tpu.assume_multiple %209, 8 : i32
    %211 = arith.index_cast %210 : i32 to index
    %c0_56 = arith.constant 0 : index
    %212 = vector.load %arg14[%211, %c0_56] : memref<64x384xf32, #tpu.memory_space<vmem>>, vector<8x384xf32>
    %cst_57 = arith.constant dense<0.000000e+00> : vector<8x384xf32>
    %213 = tpu.matmul %206, %9, %cst_57 {dimension_numbers = #tpu.dot_dimension_numbers<[1], [0], [0], [1], [0, 0, 1, 1], [], []>} : vector<8x128xf32>, vector<128x384xf32>, vector<8x384xf32> -> vector<8x384xf32>
    %214 = vector.extract_strided_slice %212 {offsets = [0, 0], sizes = [8, 256], strides = [1, 1]} : vector<8x384xf32> to vector<8x256xf32>
    %215 = vector.extract_strided_slice %213 {offsets = [0, 0], sizes = [8, 256], strides = [1, 1]} : vector<8x384xf32> to vector<8x256xf32>
    %216 = arith.addf %214, %215 : vector<8x256xf32>
    %217 = arith.negf %216 : vector<8x256xf32>
    %218 = math.exp %217 : vector<8x256xf32>
    %cst_58 = arith.constant 1.000000e+00 : f32
    %219 = vector.broadcast %cst_58 : f32 to vector<8x256xf32>
    %220 = arith.addf %219, %218 : vector<8x256xf32>
    %221 = arith.divf %219, %220 : vector<8x256xf32>
    %222 = vector.extract_strided_slice %221 {offsets = [0, 0], sizes = [8, 128], strides = [1, 1]} : vector<8x256xf32> to vector<8x128xf32>
    %223 = vector.extract_strided_slice %221 {offsets = [0, 128], sizes = [8, 128], strides = [1, 1]} : vector<8x256xf32> to vector<8x128xf32>
    %224 = vector.extract_strided_slice %212 {offsets = [0, 256], sizes = [8, 128], strides = [1, 1]} : vector<8x384xf32> to vector<8x128xf32>
    %225 = vector.extract_strided_slice %213 {offsets = [0, 256], sizes = [8, 128], strides = [1, 1]} : vector<8x384xf32> to vector<8x128xf32>
    %226 = arith.addf %225, %12 : vector<8x128xf32>
    %227 = arith.mulf %222, %226 : vector<8x128xf32>
    %228 = arith.addf %224, %227 : vector<8x128xf32>
    %229 = math.tanh %228 : vector<8x128xf32>
    %cst_59 = arith.constant 1.000000e+00 : f32
    %230 = vector.broadcast %cst_59 : f32 to vector<8x128xf32>
    %231 = arith.subf %230, %223 : vector<8x128xf32>
    %232 = arith.mulf %231, %229 : vector<8x128xf32>
    %233 = arith.mulf %223, %206 : vector<8x128xf32>
    %234 = arith.addf %232, %233 : vector<8x128xf32>
    %235 = arith.index_cast %210 : i32 to index
    %c0_60 = arith.constant 0 : index
    %236 = vector.load %arg16[%235, %c0_60] : memref<64x128xf32, #tpu.memory_space<vmem>>, vector<8x128xf32>
    tpu.vector_store %arg16[%235, %c0_60], %234 {strides = array<i32>} : memref<64x128xf32, #tpu.memory_space<vmem>>, vector<8x128xf32>,
    %c8_i32_61 = arith.constant 8 : i32
    %c0_62 = arith.constant 0 : index
    %c0_63 = arith.constant 0 : index
    %c0_64 = arith.constant 0 : index
    %237 = vector.load %arg13[%c0_62, %c0_63, %c0_64] : memref<2x8x128xf32, #tpu.memory_space<vmem>>, vector<1x8x128xf32>
    %238 = vector.shape_cast %237 : vector<1x8x128xf32> to vector<8x128xf32>
    %239 = vector.shape_cast %234 : vector<8x128xf32> to vector<1x8x128xf32>
    tpu.vector_store %arg13[%c0_62, %c0_63, %c0_64], %239 {strides = array<i32>} : memref<2x8x128xf32, #tpu.memory_space<vmem>>, vector<1x8x128xf32>,
    %c0_65 = arith.constant 0 : index
    %c0_66 = arith.constant 0 : index
    %240 = vector.load %arg16[%c0_65, %c0_66] : memref<64x128xf32, #tpu.memory_space<vmem>>, vector<64x128xf32>
    %c0_67 = arith.constant 0 : index
    %c0_68 = arith.constant 0 : index
    %241 = vector.load %arg6[%c0_67, %c0_68] : memref<128x384xf32, #tpu.memory_space<vmem>>, vector<128x384xf32>
    %cst_69 = arith.constant dense<0.000000e+00> : vector<64x384xf32>
    %242 = tpu.matmul %240, %241, %cst_69 {dimension_numbers = #tpu.dot_dimension_numbers<[1], [0], [0], [1], [0, 0, 1, 1], [], []>} : vector<64x128xf32>, vector<128x384xf32>, vector<64x384xf32> -> vector<64x384xf32>
    %c0_70 = arith.constant 0 : index
    %c0_71 = arith.constant 0 : index
    %243 = vector.load %arg8[%c0_70, %c0_71] : memref<1x384xf32, #tpu.memory_space<vmem>>, vector<1x384xf32>
    %244 = vector.broadcast %243 : vector<1x384xf32> to vector<64x384xf32>
    %245 = arith.addf %242, %244 : vector<64x384xf32>
    %c0_72 = arith.constant 0 : index
    %c0_73 = arith.constant 0 : index
    %246 = vector.load %arg15[%c0_72, %c0_73] : memref<64x384xf32, #tpu.memory_space<vmem>>, vector<64x384xf32>
    tpu.vector_store %arg15[%c0_72, %c0_73], %245 {strides = array<i32>} : memref<64x384xf32, #tpu.memory_space<vmem>>, vector<64x384xf32>,
    %c1 = arith.constant 1 : index
    %c0_74 = arith.constant 0 : index
    %c0_75 = arith.constant 0 : index
    %247 = vector.load %arg1[%c1, %c0_74, %c0_75] : memref<2x8x128xf32, #tpu.memory_space<vmem>>, vector<1x8x128xf32>
    %248 = vector.shape_cast %247 : vector<1x8x128xf32> to vector<8x128xf32>
    %c0_76 = arith.constant 0 : index
    %c0_77 = arith.constant 0 : index
    %249 = vector.load %arg7[%c0_76, %c0_77] : memref<128x384xf32, #tpu.memory_space<vmem>>, vector<128x384xf32>
    %c0_78 = arith.constant 0 : index
    %c0_79 = arith.constant 0 : index
    %250 = vector.load %arg9[%c0_78, %c0_79] : memref<1x128xf32, #tpu.memory_space<vmem>>, vector<1x128xf32>
    %251 = vector.shape_cast %250 : vector<1x128xf32> to vector<1x128xf32>
    %252 = vector.broadcast %251 : vector<1x128xf32> to vector<8x128xf32>
    %c0_i32_80 = arith.constant 0 : i32
    %c8_i32_81 = arith.constant 8 : i32
    %253 = arith.muli %c0_i32_80, %c8_i32_81 : i32
    %254 = tpu.assume_multiple %253, 8 : i32
    %255 = arith.index_cast %254 : i32 to index
    %c0_82 = arith.constant 0 : index
    %256 = vector.load %arg15[%255, %c0_82] : memref<64x384xf32, #tpu.memory_space<vmem>>, vector<8x384xf32>
    %cst_83 = arith.constant dense<0.000000e+00> : vector<8x384xf32>
    %257 = tpu.matmul %248, %249, %cst_83 {dimension_numbers = #tpu.dot_dimension_numbers<[1], [0], [0], [1], [0, 0, 1, 1], [], []>} : vector<8x128xf32>, vector<128x384xf32>, vector<8x384xf32> -> vector<8x384xf32>
    %258 = vector.extract_strided_slice %256 {offsets = [0, 0], sizes = [8, 256], strides = [1, 1]} : vector<8x384xf32> to vector<8x256xf32>
    %259 = vector.extract_strided_slice %257 {offsets = [0, 0], sizes = [8, 256], strides = [1, 1]} : vector<8x384xf32> to vector<8x256xf32>
    %260 = arith.addf %258, %259 : vector<8x256xf32>
    %261 = arith.negf %260 : vector<8x256xf32>
    %262 = math.exp %261 : vector<8x256xf32>
    %cst_84 = arith.constant 1.000000e+00 : f32
    %263 = vector.broadcast %cst_84 : f32 to vector<8x256xf32>
    %264 = arith.addf %263, %262 : vector<8x256xf32>
    %265 = arith.divf %263, %264 : vector<8x256xf32>
    %266 = vector.extract_strided_slice %265 {offsets = [0, 0], sizes = [8, 128], strides = [1, 1]} : vector<8x256xf32> to vector<8x128xf32>
    %267 = vector.extract_strided_slice %265 {offsets = [0, 128], sizes = [8, 128], strides = [1, 1]} : vector<8x256xf32> to vector<8x128xf32>
    %268 = vector.extract_strided_slice %256 {offsets = [0, 256], sizes = [8, 128], strides = [1, 1]} : vector<8x384xf32> to vector<8x128xf32>
    %269 = vector.extract_strided_slice %257 {offsets = [0, 256], sizes = [8, 128], strides = [1, 1]} : vector<8x384xf32> to vector<8x128xf32>
    %270 = arith.addf %269, %252 : vector<8x128xf32>
    %271 = arith.mulf %266, %270 : vector<8x128xf32>
    %272 = arith.addf %268, %271 : vector<8x128xf32>
    %273 = math.tanh %272 : vector<8x128xf32>
    %cst_85 = arith.constant 1.000000e+00 : f32
    %274 = vector.broadcast %cst_85 : f32 to vector<8x128xf32>
    %275 = arith.subf %274, %267 : vector<8x128xf32>
    %276 = arith.mulf %275, %273 : vector<8x128xf32>
    %277 = arith.mulf %267, %248 : vector<8x128xf32>
    %278 = arith.addf %276, %277 : vector<8x128xf32>
    %279 = arith.index_cast %254 : i32 to index
    %c0_86 = arith.constant 0 : index
    %280 = vector.load %arg17[%279, %c0_86] : memref<64x128xf32, #tpu.memory_space<vmem>>, vector<8x128xf32>
    tpu.vector_store %arg17[%279, %c0_86], %278 {strides = array<i32>} : memref<64x128xf32, #tpu.memory_space<vmem>>, vector<8x128xf32>,
    %c1_i32_87 = arith.constant 1 : i32
    %c8_i32_88 = arith.constant 8 : i32
    %281 = arith.muli %c1_i32_87, %c8_i32_88 : i32
    %282 = tpu.assume_multiple %281, 8 : i32
    %283 = arith.index_cast %282 : i32 to index
    %c0_89 = arith.constant 0 : index
    %284 = vector.load %arg15[%283, %c0_89] : memref<64x384xf32, #tpu.memory_space<vmem>>, vector<8x384xf32>
    %cst_90 = arith.constant dense<0.000000e+00> : vector<8x384xf32>
    %285 = tpu.matmul %278, %249, %cst_90 {dimension_numbers = #tpu.dot_dimension_numbers<[1], [0], [0], [1], [0, 0, 1, 1], [], []>} : vector<8x128xf32>, vector<128x384xf32>, vector<8x384xf32> -> vector<8x384xf32>
    %286 = vector.extract_strided_slice %284 {offsets = [0, 0], sizes = [8, 256], strides = [1, 1]} : vector<8x384xf32> to vector<8x256xf32>
    %287 = vector.extract_strided_slice %285 {offsets = [0, 0], sizes = [8, 256], strides = [1, 1]} : vector<8x384xf32> to vector<8x256xf32>
    %288 = arith.addf %286, %287 : vector<8x256xf32>
    %289 = arith.negf %288 : vector<8x256xf32>
    %290 = math.exp %289 : vector<8x256xf32>
    %cst_91 = arith.constant 1.000000e+00 : f32
    %291 = vector.broadcast %cst_91 : f32 to vector<8x256xf32>
    %292 = arith.addf %291, %290 : vector<8x256xf32>
    %293 = arith.divf %291, %292 : vector<8x256xf32>
    %294 = vector.extract_strided_slice %293 {offsets = [0, 0], sizes = [8, 128], strides = [1, 1]} : vector<8x256xf32> to vector<8x128xf32>
    %295 = vector.extract_strided_slice %293 {offsets = [0, 128], sizes = [8, 128], strides = [1, 1]} : vector<8x256xf32> to vector<8x128xf32>
    %296 = vector.extract_strided_slice %284 {offsets = [0, 256], sizes = [8, 128], strides = [1, 1]} : vector<8x384xf32> to vector<8x128xf32>
    %297 = vector.extract_strided_slice %285 {offsets = [0, 256], sizes = [8, 128], strides = [1, 1]} : vector<8x384xf32> to vector<8x128xf32>
    %298 = arith.addf %297, %252 : vector<8x128xf32>
    %299 = arith.mulf %294, %298 : vector<8x128xf32>
    %300 = arith.addf %296, %299 : vector<8x128xf32>
    %301 = math.tanh %300 : vector<8x128xf32>
    %cst_92 = arith.constant 1.000000e+00 : f32
    %302 = vector.broadcast %cst_92 : f32 to vector<8x128xf32>
    %303 = arith.subf %302, %295 : vector<8x128xf32>
    %304 = arith.mulf %303, %301 : vector<8x128xf32>
    %305 = arith.mulf %295, %278 : vector<8x128xf32>
    %306 = arith.addf %304, %305 : vector<8x128xf32>
    %307 = arith.index_cast %282 : i32 to index
    %c0_93 = arith.constant 0 : index
    %308 = vector.load %arg17[%307, %c0_93] : memref<64x128xf32, #tpu.memory_space<vmem>>, vector<8x128xf32>
    tpu.vector_store %arg17[%307, %c0_93], %306 {strides = array<i32>} : memref<64x128xf32, #tpu.memory_space<vmem>>, vector<8x128xf32>,
    %c2_i32_94 = arith.constant 2 : i32
    %c8_i32_95 = arith.constant 8 : i32
    %309 = arith.muli %c2_i32_94, %c8_i32_95 : i32
    %310 = tpu.assume_multiple %309, 8 : i32
    %311 = arith.index_cast %310 : i32 to index
    %c0_96 = arith.constant 0 : index
    %312 = vector.load %arg15[%311, %c0_96] : memref<64x384xf32, #tpu.memory_space<vmem>>, vector<8x384xf32>
    %cst_97 = arith.constant dense<0.000000e+00> : vector<8x384xf32>
    %313 = tpu.matmul %306, %249, %cst_97 {dimension_numbers = #tpu.dot_dimension_numbers<[1], [0], [0], [1], [0, 0, 1, 1], [], []>} : vector<8x128xf32>, vector<128x384xf32>, vector<8x384xf32> -> vector<8x384xf32>
    %314 = vector.extract_strided_slice %312 {offsets = [0, 0], sizes = [8, 256], strides = [1, 1]} : vector<8x384xf32> to vector<8x256xf32>
    %315 = vector.extract_strided_slice %313 {offsets = [0, 0], sizes = [8, 256], strides = [1, 1]} : vector<8x384xf32> to vector<8x256xf32>
    %316 = arith.addf %314, %315 : vector<8x256xf32>
    %317 = arith.negf %316 : vector<8x256xf32>
    %318 = math.exp %317 : vector<8x256xf32>
    %cst_98 = arith.constant 1.000000e+00 : f32
    %319 = vector.broadcast %cst_98 : f32 to vector<8x256xf32>
    %320 = arith.addf %319, %318 : vector<8x256xf32>
    %321 = arith.divf %319, %320 : vector<8x256xf32>
    %322 = vector.extract_strided_slice %321 {offsets = [0, 0], sizes = [8, 128], strides = [1, 1]} : vector<8x256xf32> to vector<8x128xf32>
    %323 = vector.extract_strided_slice %321 {offsets = [0, 128], sizes = [8, 128], strides = [1, 1]} : vector<8x256xf32> to vector<8x128xf32>
    %324 = vector.extract_strided_slice %312 {offsets = [0, 256], sizes = [8, 128], strides = [1, 1]} : vector<8x384xf32> to vector<8x128xf32>
    %325 = vector.extract_strided_slice %313 {offsets = [0, 256], sizes = [8, 128], strides = [1, 1]} : vector<8x384xf32> to vector<8x128xf32>
    %326 = arith.addf %325, %252 : vector<8x128xf32>
    %327 = arith.mulf %322, %326 : vector<8x128xf32>
    %328 = arith.addf %324, %327 : vector<8x128xf32>
    %329 = math.tanh %328 : vector<8x128xf32>
    %cst_99 = arith.constant 1.000000e+00 : f32
    %330 = vector.broadcast %cst_99 : f32 to vector<8x128xf32>
    %331 = arith.subf %330, %323 : vector<8x128xf32>
    %332 = arith.mulf %331, %329 : vector<8x128xf32>
    %333 = arith.mulf %323, %306 : vector<8x128xf32>
    %334 = arith.addf %332, %333 : vector<8x128xf32>
    %335 = arith.index_cast %310 : i32 to index
    %c0_100 = arith.constant 0 : index
    %336 = vector.load %arg17[%335, %c0_100] : memref<64x128xf32, #tpu.memory_space<vmem>>, vector<8x128xf32>
    tpu.vector_store %arg17[%335, %c0_100], %334 {strides = array<i32>} : memref<64x128xf32, #tpu.memory_space<vmem>>, vector<8x128xf32>,
    %c3_i32_101 = arith.constant 3 : i32
    %c8_i32_102 = arith.constant 8 : i32
    %337 = arith.muli %c3_i32_101, %c8_i32_102 : i32
    %338 = tpu.assume_multiple %337, 8 : i32
    %339 = arith.index_cast %338 : i32 to index
    %c0_103 = arith.constant 0 : index
    %340 = vector.load %arg15[%339, %c0_103] : memref<64x384xf32, #tpu.memory_space<vmem>>, vector<8x384xf32>
    %cst_104 = arith.constant dense<0.000000e+00> : vector<8x384xf32>
    %341 = tpu.matmul %334, %249, %cst_104 {dimension_numbers = #tpu.dot_dimension_numbers<[1], [0], [0], [1], [0, 0, 1, 1], [], []>} : vector<8x128xf32>, vector<128x384xf32>, vector<8x384xf32> -> vector<8x384xf32>
    %342 = vector.extract_strided_slice %340 {offsets = [0, 0], sizes = [8, 256], strides = [1, 1]} : vector<8x384xf32> to vector<8x256xf32>
    %343 = vector.extract_strided_slice %341 {offsets = [0, 0], sizes = [8, 256], strides = [1, 1]} : vector<8x384xf32> to vector<8x256xf32>
    %344 = arith.addf %342, %343 : vector<8x256xf32>
    %345 = arith.negf %344 : vector<8x256xf32>
    %346 = math.exp %345 : vector<8x256xf32>
    %cst_105 = arith.constant 1.000000e+00 : f32
    %347 = vector.broadcast %cst_105 : f32 to vector<8x256xf32>
    %348 = arith.addf %347, %346 : vector<8x256xf32>
    %349 = arith.divf %347, %348 : vector<8x256xf32>
    %350 = vector.extract_strided_slice %349 {offsets = [0, 0], sizes = [8, 128], strides = [1, 1]} : vector<8x256xf32> to vector<8x128xf32>
    %351 = vector.extract_strided_slice %349 {offsets = [0, 128], sizes = [8, 128], strides = [1, 1]} : vector<8x256xf32> to vector<8x128xf32>
    %352 = vector.extract_strided_slice %340 {offsets = [0, 256], sizes = [8, 128], strides = [1, 1]} : vector<8x384xf32> to vector<8x128xf32>
    %353 = vector.extract_strided_slice %341 {offsets = [0, 256], sizes = [8, 128], strides = [1, 1]} : vector<8x384xf32> to vector<8x128xf32>
    %354 = arith.addf %353, %252 : vector<8x128xf32>
    %355 = arith.mulf %350, %354 : vector<8x128xf32>
    %356 = arith.addf %352, %355 : vector<8x128xf32>
    %357 = math.tanh %356 : vector<8x128xf32>
    %cst_106 = arith.constant 1.000000e+00 : f32
    %358 = vector.broadcast %cst_106 : f32 to vector<8x128xf32>
    %359 = arith.subf %358, %351 : vector<8x128xf32>
    %360 = arith.mulf %359, %357 : vector<8x128xf32>
    %361 = arith.mulf %351, %334 : vector<8x128xf32>
    %362 = arith.addf %360, %361 : vector<8x128xf32>
    %363 = arith.index_cast %338 : i32 to index
    %c0_107 = arith.constant 0 : index
    %364 = vector.load %arg17[%363, %c0_107] : memref<64x128xf32, #tpu.memory_space<vmem>>, vector<8x128xf32>
    tpu.vector_store %arg17[%363, %c0_107], %362 {strides = array<i32>} : memref<64x128xf32, #tpu.memory_space<vmem>>, vector<8x128xf32>,
    %c4_i32_108 = arith.constant 4 : i32
    %c8_i32_109 = arith.constant 8 : i32
    %365 = arith.muli %c4_i32_108, %c8_i32_109 : i32
    %366 = tpu.assume_multiple %365, 8 : i32
    %367 = arith.index_cast %366 : i32 to index
    %c0_110 = arith.constant 0 : index
    %368 = vector.load %arg15[%367, %c0_110] : memref<64x384xf32, #tpu.memory_space<vmem>>, vector<8x384xf32>
    %cst_111 = arith.constant dense<0.000000e+00> : vector<8x384xf32>
    %369 = tpu.matmul %362, %249, %cst_111 {dimension_numbers = #tpu.dot_dimension_numbers<[1], [0], [0], [1], [0, 0, 1, 1], [], []>} : vector<8x128xf32>, vector<128x384xf32>, vector<8x384xf32> -> vector<8x384xf32>
    %370 = vector.extract_strided_slice %368 {offsets = [0, 0], sizes = [8, 256], strides = [1, 1]} : vector<8x384xf32> to vector<8x256xf32>
    %371 = vector.extract_strided_slice %369 {offsets = [0, 0], sizes = [8, 256], strides = [1, 1]} : vector<8x384xf32> to vector<8x256xf32>
    %372 = arith.addf %370, %371 : vector<8x256xf32>
    %373 = arith.negf %372 : vector<8x256xf32>
    %374 = math.exp %373 : vector<8x256xf32>
    %cst_112 = arith.constant 1.000000e+00 : f32
    %375 = vector.broadcast %cst_112 : f32 to vector<8x256xf32>
    %376 = arith.addf %375, %374 : vector<8x256xf32>
    %377 = arith.divf %375, %376 : vector<8x256xf32>
    %378 = vector.extract_strided_slice %377 {offsets = [0, 0], sizes = [8, 128], strides = [1, 1]} : vector<8x256xf32> to vector<8x128xf32>
    %379 = vector.extract_strided_slice %377 {offsets = [0, 128], sizes = [8, 128], strides = [1, 1]} : vector<8x256xf32> to vector<8x128xf32>
    %380 = vector.extract_strided_slice %368 {offsets = [0, 256], sizes = [8, 128], strides = [1, 1]} : vector<8x384xf32> to vector<8x128xf32>
    %381 = vector.extract_strided_slice %369 {offsets = [0, 256], sizes = [8, 128], strides = [1, 1]} : vector<8x384xf32> to vector<8x128xf32>
    %382 = arith.addf %381, %252 : vector<8x128xf32>
    %383 = arith.mulf %378, %382 : vector<8x128xf32>
    %384 = arith.addf %380, %383 : vector<8x128xf32>
    %385 = math.tanh %384 : vector<8x128xf32>
    %cst_113 = arith.constant 1.000000e+00 : f32
    %386 = vector.broadcast %cst_113 : f32 to vector<8x128xf32>
    %387 = arith.subf %386, %379 : vector<8x128xf32>
    %388 = arith.mulf %387, %385 : vector<8x128xf32>
    %389 = arith.mulf %379, %362 : vector<8x128xf32>
    %390 = arith.addf %388, %389 : vector<8x128xf32>
    %391 = arith.index_cast %366 : i32 to index
    %c0_114 = arith.constant 0 : index
    %392 = vector.load %arg17[%391, %c0_114] : memref<64x128xf32, #tpu.memory_space<vmem>>, vector<8x128xf32>
    tpu.vector_store %arg17[%391, %c0_114], %390 {strides = array<i32>} : memref<64x128xf32, #tpu.memory_space<vmem>>, vector<8x128xf32>,
    %c5_i32_115 = arith.constant 5 : i32
    %c8_i32_116 = arith.constant 8 : i32
    %393 = arith.muli %c5_i32_115, %c8_i32_116 : i32
    %394 = tpu.assume_multiple %393, 8 : i32
    %395 = arith.index_cast %394 : i32 to index
    %c0_117 = arith.constant 0 : index
    %396 = vector.load %arg15[%395, %c0_117] : memref<64x384xf32, #tpu.memory_space<vmem>>, vector<8x384xf32>
    %cst_118 = arith.constant dense<0.000000e+00> : vector<8x384xf32>
    %397 = tpu.matmul %390, %249, %cst_118 {dimension_numbers = #tpu.dot_dimension_numbers<[1], [0], [0], [1], [0, 0, 1, 1], [], []>} : vector<8x128xf32>, vector<128x384xf32>, vector<8x384xf32> -> vector<8x384xf32>
    %398 = vector.extract_strided_slice %396 {offsets = [0, 0], sizes = [8, 256], strides = [1, 1]} : vector<8x384xf32> to vector<8x256xf32>
    %399 = vector.extract_strided_slice %397 {offsets = [0, 0], sizes = [8, 256], strides = [1, 1]} : vector<8x384xf32> to vector<8x256xf32>
    %400 = arith.addf %398, %399 : vector<8x256xf32>
    %401 = arith.negf %400 : vector<8x256xf32>
    %402 = math.exp %401 : vector<8x256xf32>
    %cst_119 = arith.constant 1.000000e+00 : f32
    %403 = vector.broadcast %cst_119 : f32 to vector<8x256xf32>
    %404 = arith.addf %403, %402 : vector<8x256xf32>
    %405 = arith.divf %403, %404 : vector<8x256xf32>
    %406 = vector.extract_strided_slice %405 {offsets = [0, 0], sizes = [8, 128], strides = [1, 1]} : vector<8x256xf32> to vector<8x128xf32>
    %407 = vector.extract_strided_slice %405 {offsets = [0, 128], sizes = [8, 128], strides = [1, 1]} : vector<8x256xf32> to vector<8x128xf32>
    %408 = vector.extract_strided_slice %396 {offsets = [0, 256], sizes = [8, 128], strides = [1, 1]} : vector<8x384xf32> to vector<8x128xf32>
    %409 = vector.extract_strided_slice %397 {offsets = [0, 256], sizes = [8, 128], strides = [1, 1]} : vector<8x384xf32> to vector<8x128xf32>
    %410 = arith.addf %409, %252 : vector<8x128xf32>
    %411 = arith.mulf %406, %410 : vector<8x128xf32>
    %412 = arith.addf %408, %411 : vector<8x128xf32>
    %413 = math.tanh %412 : vector<8x128xf32>
    %cst_120 = arith.constant 1.000000e+00 : f32
    %414 = vector.broadcast %cst_120 : f32 to vector<8x128xf32>
    %415 = arith.subf %414, %407 : vector<8x128xf32>
    %416 = arith.mulf %415, %413 : vector<8x128xf32>
    %417 = arith.mulf %407, %390 : vector<8x128xf32>
    %418 = arith.addf %416, %417 : vector<8x128xf32>
    %419 = arith.index_cast %394 : i32 to index
    %c0_121 = arith.constant 0 : index
    %420 = vector.load %arg17[%419, %c0_121] : memref<64x128xf32, #tpu.memory_space<vmem>>, vector<8x128xf32>
    tpu.vector_store %arg17[%419, %c0_121], %418 {strides = array<i32>} : memref<64x128xf32, #tpu.memory_space<vmem>>, vector<8x128xf32>,
    %c6_i32_122 = arith.constant 6 : i32
    %c8_i32_123 = arith.constant 8 : i32
    %421 = arith.muli %c6_i32_122, %c8_i32_123 : i32
    %422 = tpu.assume_multiple %421, 8 : i32
    %423 = arith.index_cast %422 : i32 to index
    %c0_124 = arith.constant 0 : index
    %424 = vector.load %arg15[%423, %c0_124] : memref<64x384xf32, #tpu.memory_space<vmem>>, vector<8x384xf32>
    %cst_125 = arith.constant dense<0.000000e+00> : vector<8x384xf32>
    %425 = tpu.matmul %418, %249, %cst_125 {dimension_numbers = #tpu.dot_dimension_numbers<[1], [0], [0], [1], [0, 0, 1, 1], [], []>} : vector<8x128xf32>, vector<128x384xf32>, vector<8x384xf32> -> vector<8x384xf32>
    %426 = vector.extract_strided_slice %424 {offsets = [0, 0], sizes = [8, 256], strides = [1, 1]} : vector<8x384xf32> to vector<8x256xf32>
    %427 = vector.extract_strided_slice %425 {offsets = [0, 0], sizes = [8, 256], strides = [1, 1]} : vector<8x384xf32> to vector<8x256xf32>
    %428 = arith.addf %426, %427 : vector<8x256xf32>
    %429 = arith.negf %428 : vector<8x256xf32>
    %430 = math.exp %429 : vector<8x256xf32>
    %cst_126 = arith.constant 1.000000e+00 : f32
    %431 = vector.broadcast %cst_126 : f32 to vector<8x256xf32>
    %432 = arith.addf %431, %430 : vector<8x256xf32>
    %433 = arith.divf %431, %432 : vector<8x256xf32>
    %434 = vector.extract_strided_slice %433 {offsets = [0, 0], sizes = [8, 128], strides = [1, 1]} : vector<8x256xf32> to vector<8x128xf32>
    %435 = vector.extract_strided_slice %433 {offsets = [0, 128], sizes = [8, 128], strides = [1, 1]} : vector<8x256xf32> to vector<8x128xf32>
    %436 = vector.extract_strided_slice %424 {offsets = [0, 256], sizes = [8, 128], strides = [1, 1]} : vector<8x384xf32> to vector<8x128xf32>
    %437 = vector.extract_strided_slice %425 {offsets = [0, 256], sizes = [8, 128], strides = [1, 1]} : vector<8x384xf32> to vector<8x128xf32>
    %438 = arith.addf %437, %252 : vector<8x128xf32>
    %439 = arith.mulf %434, %438 : vector<8x128xf32>
    %440 = arith.addf %436, %439 : vector<8x128xf32>
    %441 = math.tanh %440 : vector<8x128xf32>
    %cst_127 = arith.constant 1.000000e+00 : f32
    %442 = vector.broadcast %cst_127 : f32 to vector<8x128xf32>
    %443 = arith.subf %442, %435 : vector<8x128xf32>
    %444 = arith.mulf %443, %441 : vector<8x128xf32>
    %445 = arith.mulf %435, %418 : vector<8x128xf32>
    %446 = arith.addf %444, %445 : vector<8x128xf32>
    %447 = arith.index_cast %422 : i32 to index
    %c0_128 = arith.constant 0 : index
    %448 = vector.load %arg17[%447, %c0_128] : memref<64x128xf32, #tpu.memory_space<vmem>>, vector<8x128xf32>
    tpu.vector_store %arg17[%447, %c0_128], %446 {strides = array<i32>} : memref<64x128xf32, #tpu.memory_space<vmem>>, vector<8x128xf32>,
    %c7_i32_129 = arith.constant 7 : i32
    %c8_i32_130 = arith.constant 8 : i32
    %449 = arith.muli %c7_i32_129, %c8_i32_130 : i32
    %450 = tpu.assume_multiple %449, 8 : i32
    %451 = arith.index_cast %450 : i32 to index
    %c0_131 = arith.constant 0 : index
    %452 = vector.load %arg15[%451, %c0_131] : memref<64x384xf32, #tpu.memory_space<vmem>>, vector<8x384xf32>
    %cst_132 = arith.constant dense<0.000000e+00> : vector<8x384xf32>
    %453 = tpu.matmul %446, %249, %cst_132 {dimension_numbers = #tpu.dot_dimension_numbers<[1], [0], [0], [1], [0, 0, 1, 1], [], []>} : vector<8x128xf32>, vector<128x384xf32>, vector<8x384xf32> -> vector<8x384xf32>
    %454 = vector.extract_strided_slice %452 {offsets = [0, 0], sizes = [8, 256], strides = [1, 1]} : vector<8x384xf32> to vector<8x256xf32>
    %455 = vector.extract_strided_slice %453 {offsets = [0, 0], sizes = [8, 256], strides = [1, 1]} : vector<8x384xf32> to vector<8x256xf32>
    %456 = arith.addf %454, %455 : vector<8x256xf32>
    %457 = arith.negf %456 : vector<8x256xf32>
    %458 = math.exp %457 : vector<8x256xf32>
    %cst_133 = arith.constant 1.000000e+00 : f32
    %459 = vector.broadcast %cst_133 : f32 to vector<8x256xf32>
    %460 = arith.addf %459, %458 : vector<8x256xf32>
    %461 = arith.divf %459, %460 : vector<8x256xf32>
    %462 = vector.extract_strided_slice %461 {offsets = [0, 0], sizes = [8, 128], strides = [1, 1]} : vector<8x256xf32> to vector<8x128xf32>
    %463 = vector.extract_strided_slice %461 {offsets = [0, 128], sizes = [8, 128], strides = [1, 1]} : vector<8x256xf32> to vector<8x128xf32>
    %464 = vector.extract_strided_slice %452 {offsets = [0, 256], sizes = [8, 128], strides = [1, 1]} : vector<8x384xf32> to vector<8x128xf32>
    %465 = vector.extract_strided_slice %453 {offsets = [0, 256], sizes = [8, 128], strides = [1, 1]} : vector<8x384xf32> to vector<8x128xf32>
    %466 = arith.addf %465, %252 : vector<8x128xf32>
    %467 = arith.mulf %462, %466 : vector<8x128xf32>
    %468 = arith.addf %464, %467 : vector<8x128xf32>
    %469 = math.tanh %468 : vector<8x128xf32>
    %cst_134 = arith.constant 1.000000e+00 : f32
    %470 = vector.broadcast %cst_134 : f32 to vector<8x128xf32>
    %471 = arith.subf %470, %463 : vector<8x128xf32>
    %472 = arith.mulf %471, %469 : vector<8x128xf32>
    %473 = arith.mulf %463, %446 : vector<8x128xf32>
    %474 = arith.addf %472, %473 : vector<8x128xf32>
    %475 = arith.index_cast %450 : i32 to index
    %c0_135 = arith.constant 0 : index
    %476 = vector.load %arg17[%475, %c0_135] : memref<64x128xf32, #tpu.memory_space<vmem>>, vector<8x128xf32>
    tpu.vector_store %arg17[%475, %c0_135], %474 {strides = array<i32>} : memref<64x128xf32, #tpu.memory_space<vmem>>, vector<8x128xf32>,
    %c8_i32_136 = arith.constant 8 : i32
    %c1_137 = arith.constant 1 : index
    %c0_138 = arith.constant 0 : index
    %c0_139 = arith.constant 0 : index
    %477 = vector.load %arg13[%c1_137, %c0_138, %c0_139] : memref<2x8x128xf32, #tpu.memory_space<vmem>>, vector<1x8x128xf32>
    %478 = vector.shape_cast %477 : vector<1x8x128xf32> to vector<8x128xf32>
    %479 = vector.shape_cast %474 : vector<8x128xf32> to vector<1x8x128xf32>
    tpu.vector_store %arg13[%c1_137, %c0_138, %c0_139], %479 {strides = array<i32>} : memref<2x8x128xf32, #tpu.memory_space<vmem>>, vector<1x8x128xf32>,
    %c0_140 = arith.constant 0 : index
    %c0_141 = arith.constant 0 : index
    %480 = vector.load %arg17[%c0_140, %c0_141] : memref<64x128xf32, #tpu.memory_space<vmem>>, vector<64x128xf32>
    %c0_142 = arith.constant 0 : index
    %c0_143 = arith.constant 0 : index
    %481 = vector.load %arg10[%c0_142, %c0_143] : memref<128x128xf32, #tpu.memory_space<vmem>>, vector<128x128xf32>
    %cst_144 = arith.constant dense<0.000000e+00> : vector<64x128xf32>
    %482 = tpu.matmul %480, %481, %cst_144 {dimension_numbers = #tpu.dot_dimension_numbers<[1], [0], [0], [1], [0, 0, 1, 1], [], []>} : vector<64x128xf32>, vector<128x128xf32>, vector<64x128xf32> -> vector<64x128xf32>
    %c0_145 = arith.constant 0 : index
    %c0_146 = arith.constant 0 : index
    %483 = vector.load %arg11[%c0_145, %c0_146] : memref<1x128xf32, #tpu.memory_space<vmem>>, vector<1x128xf32>
    %484 = vector.broadcast %483 : vector<1x128xf32> to vector<64x128xf32>
    %485 = arith.addf %482, %484 : vector<64x128xf32>
    %c0_147 = arith.constant 0 : index
    %c0_148 = arith.constant 0 : index
    %486 = vector.load %arg12[%c0_147, %c0_148] : memref<64x128xf32, #tpu.memory_space<vmem>>, vector<64x128xf32>
    tpu.vector_store %arg12[%c0_147, %c0_148], %485 {strides = array<i32>} : memref<64x128xf32, #tpu.memory_space<vmem>>, vector<64x128xf32>,
    return
  }
}

</mosaic_0001>

<bundles_post_ra>
// kernel: pure_ml_gru_forward.1
= control target key start
LH: loop header
LB: loop body
LE: loop exit
PB: predicated region body
PF: predicated region fallthrough
CT: control target
= control target key end

     0   :  { %19 = vsyncpa [#allocation7], 0  ;;  %s7413_s0 = inlined_call_operand.vmem [shape: f32[64,128], index: 0, kind: input, shape index: {}]   ;;  %s7414_s1 = inlined_call_operand.vmem [shape: f32[2,8,128], index: 1, kind: input, shape index: {}]   ;;  %s7415_s2 = inlined_call_operand.hbm [shape: f32[128,384], index: 2, kind: input, shape index: {}]   ;;  %s7416_s3 = inlined_call_operand.hbm [shape: f32[128,384], index: 3, kind: input, shape index: {}]   ;;  %s7417_s4 = inlined_call_operand.vmem [shape: f32[1,384], index: 4, kind: input, shape index: {}]   ;;  %s7418_s5 = inlined_call_operand.vmem [shape: f32[1,128], index: 5, kind: input, shape index: {}]   ;;  %s7419_s6 = inlined_call_operand.hbm [shape: f32[128,384], index: 6, kind: input, shape index: {}]   ;;  %s7420_s7 = inlined_call_operand.hbm [shape: f32[128,384], index: 7, kind: input, shape index: {}]   ;;  %s7421_s8 = inlined_call_operand.vmem [shape: f32[1,384], index: 8, kind: input, shape index: {}]   ;;  %s7422_s9 = inlined_call_operand.vmem [shape: f32[1,128], index: 9, kind: input, shape index: {}]   ;;  %s7423_s10 = inlined_call_operand.vmem [shape: f32[128,128], index: 10, kind: input, shape index: {}]   ;;  %s7424_s11 = inlined_call_operand.vmem [shape: f32[1,128], index: 11, kind: input, shape index: {}]   ;;  %s7425_s12 = inlined_call_operand.vmem [shape: f32[64,128], index: 12, kind: output, shape index: {0}]   ;;  %s7426_s13 = inlined_call_operand.vmem [shape: f32[2,8,128], index: 13, kind: output, shape index: {1}]  }
   0x1   :  { %20 = vsyncpa [#allocation9], 0 }
   0x2   :  { %21 = vsyncpa [#allocation12], 0  ;;  %s6196_s25 = smov [#allocation8]   ;;  %s6197_s27 = smov [#allocation6]  }
   0x3   :  { %s43_s26 = sshll.u32 %s6196_s25, 4  ;;  %s31_s28 = sshll.u32 %s6197_s27, 4  ;;  %s44_s26 = int_to_ptr.vmem [resolvable:$true] %s43_s26  ;;  %s6275_s28 = int_to_ptr.vmem [resolvable:$true] %s31_s28 }
   0x4   :  { %s6102_s14 = scalar_lea.hbm %s7416_s3, 6144 }
   0x5   :  { %p6103_p0 = scmp.ne.s32.totalorder %s7416_s3, %s6102_s14  ;;  %p6106_p1 = scmp.lt.u32.totalorder %s6102_s14, %s7416_s3 }
   0x7   :  { %p6108_p2 = pnand %p6106_p1, %p6103_p0 }
   0x9   :  { %6111 = shalt.err (!%p6108_p2)
}
   0xa   :  { %s6112_s19 = scalar_lea.vmem %s44_s26, 6144  ;;  %p6117_p4 = scmp.lt.s32.totalorder %s44_s26, %s44_s26 }
   0xb   :  { %p6113_p3 = scmp.ne.s32.totalorder %s44_s26, %s6112_s19  ;;  %p6118_p5 = scmp.lt.s32.totalorder %s6112_s19, %s6112_s19 }
   0xd   :  { %p6119_p6 = por %p6118_p5, %p6117_p4 }
   0xf   :  { %p6120_p7 = pnand %p6119_p6, %p6113_p3 }
  0x11   :  { %6123 = shalt.err (!%p6120_p7)
}
  0x12   :  { %s6198_s20 = smov 384   ;;  %s6199_s21 = smov 24  }
  0x13   :  { %49 = dma.hbm_to_vmem [thread:$0]  %s7416_s3, 6144, %s44_s26, [#allocation9], %s6198_s20, %s6198_s20, %s6199_s21  }
  0x14   :  { %s6124_s27 = scalar_lea.hbm %s7415_s2, 6144 }
  0x15   :  { %p6125_p8 = scmp.ne.s32.totalorder %s7415_s2, %s6124_s27  ;;  %p6128_p9 = scmp.lt.u32.totalorder %s6124_s27, %s7415_s2 }
  0x17   :  { %p6130_p10 = pnand %p6128_p9, %p6125_p8 }
  0x19   :  { %6133 = shalt.err (!%p6130_p10)
}
  0x1a   :  { %s6134_s16 = scalar_lea.vmem %s6275_s28, 6144  ;;  %p6139_p12 = scmp.lt.s32.totalorder %s6275_s28, %s6275_s28 }
  0x1b   :  { %p6135_p11 = scmp.ne.s32.totalorder %s6275_s28, %s6134_s16  ;;  %p6140_p13 = scmp.lt.s32.totalorder %s6134_s16, %s6134_s16 }
  0x1d   :  { %p6141_p0 = por %p6140_p13, %p6139_p12 }
  0x1f   :  { %p6142_p1 = pnand %p6141_p0, %p6135_p11 }
  0x21   :  { %6145 = shalt.err (!%p6142_p1)
}
  0x22   :  { %37 = dma.hbm_to_vmem [thread:$0]  %s7415_s2, 6144, %s6275_s28, [#allocation7], %s6198_s20, %s6198_s20, %s6199_s21  }
  0x23   :  { %s6200_s17 = smov [#allocation10]   ;;  %s6201_s19 = smov [#allocation11]  }
  0x24   :  { %s59_s18 = sshll.u32 %s6200_s17, 4  ;;  %s71_s22 = sshll.u32 %s6201_s19, 4  ;;  %s60_s18 = int_to_ptr.vmem [resolvable:$true] %s59_s18  ;;  %s6312_s22 = int_to_ptr.vmem [resolvable:$true] %s71_s22 }
  0x25   :  { %s6146_s25 = scalar_lea.hbm %s7419_s6, 6144 }
  0x26   :  { %p6147_p2 = scmp.ne.s32.totalorder %s7419_s6, %s6146_s25  ;;  %p6150_p3 = scmp.lt.u32.totalorder %s6146_s25, %s7419_s6 }
  0x28   :  { %p6152_p4 = pnand %p6150_p3, %p6147_p2 }
  0x2a   :  { %6155 = shalt.err (!%p6152_p4)
}
  0x2b   :  { %s6156_s2 = scalar_lea.vmem %s60_s18, 6144  ;;  %p6161_p6 = scmp.lt.s32.totalorder %s60_s18, %s60_s18 }
  0x2c   :  { %p6157_p5 = scmp.ne.s32.totalorder %s60_s18, %s6156_s2  ;;  %p6162_p7 = scmp.lt.s32.totalorder %s6156_s2, %s6156_s2 }
  0x2e   :  { %p6163_p8 = por %p6162_p7, %p6161_p6 }
  0x30   :  { %p6164_p9 = pnand %p6163_p8, %p6157_p5 }
  0x32   :  { %6167 = shalt.err (!%p6164_p9)
}
  0x33   :  { %65 = dma.hbm_to_vmem [thread:$0]  %s7419_s6, 6144, %s60_s18, [#allocation9], %s6198_s20, %s6198_s20, %s6199_s21  }
  0x34   :  { %s6168_s26 = scalar_lea.hbm %s7420_s7, 6144 }
  0x35   :  { %p6169_p10 = scmp.ne.s32.totalorder %s7420_s7, %s6168_s26  ;;  %p6172_p11 = scmp.lt.u32.totalorder %s6168_s26, %s7420_s7 }
  0x37   :  { %p6174_p12 = pnand %p6172_p11, %p6169_p10 }
  0x39   :  { %6177 = shalt.err (!%p6174_p12)
}
  0x3a   :  { %s6178_s25 = scalar_lea.vmem %s6312_s22, 6144  ;;  %p6183_p0 = scmp.lt.s32.totalorder %s6312_s22, %s6312_s22 }
  0x3b   :  { %p6179_p13 = scmp.ne.s32.totalorder %s6312_s22, %s6178_s25  ;;  %p6184_p1 = scmp.lt.s32.totalorder %s6178_s25, %s6178_s25 }
  0x3d   :  { %p6185_p2 = por %p6184_p1, %p6183_p0 }
  0x3f   :  { %p6186_p3 = pnand %p6185_p2, %p6179_p13 }
  0x41   :  { %6189 = shalt.err (!%p6186_p3)
}
  0x42   :  { %77 = dma.hbm_to_vmem [thread:$0]  %s7420_s7, 6144, %s6312_s22, [#allocation12], %s6198_s20, %s6198_s20, %s6199_s21  }
  0x43   :  { %6190 = dma.done.wait [#allocation7], 6144  }
  0x44   :  { %6191 = vsyncadd [#allocation7], 4294961152 }
  0x45   :  { %6192 = dma.done.wait [#allocation9], 12288  }
  0x46   :  { %6193 = vsyncadd [#allocation9], 4294955008 }
  0x47   :  { %6194 = dma.done.wait [#allocation12], 6144  }
  0x48   :  { %6195 = vsyncadd [#allocation12], 4294961152  ;;  %v7430_v0 = vmov 0.0   ;;  %v107_v1 = vld [vmem:[#allocation6 + $0x8] sm:$0xff]  ;;  %v110_v2 = vld [vmem:[#allocation6 + $0x20] sm:$0xff]  ;;  %vm6204_vm0 = vmmov 0  }
  0x49   :  { %235 = vmatprep.mubr.f32.mxu1 %v7430_v0  ;;  %539 = vmatprep.mubr.f32.mxu0 %v7430_v0  ;;  %v106_v3 = vld [vmem:[#allocation6] sm:$0xff]  ;;  %v4812_v4 = vpack.c.bf16 %v110_v2, %v107_v1  ;;  %v109_v5 = vld [vmem:[#allocation6 + $0x18] sm:$0xff]  ;;  %v415_v6 = vld [vmem:[#allocation8 + $0x8] sm:$0xff] }
  0x4a   :  { %v418_v7 = vld [vmem:[#allocation8 + $0x20] sm:$0xff]  ;;  %v4814_v8 = vpack.c.bf16 %v109_v5, %v106_v3  ;;  %v417_v11 = vld [vmem:[#allocation8 + $0x18] sm:$0xff]  ;;  %v116_v14 = vld [vmem:[#allocation6 + $0x50] sm:$0xff] }
  0x4b   :  { %v6351_v9 = vpack.c.bf16 %v418_v7, %v415_v6  ;;  %v414_v10 = vld [vmem:[#allocation8] sm:$0xff]  ;;  %v113_v12 = vld [vmem:[#allocation6 + $0x38] sm:$0xff]  ;;  %4813 = vmatprep.subr.bf16.mxu1 %v4812_v4  ;;  %v112_v15 = vld [vmem:[#allocation6 + $0x30] sm:$0xff] }
  0x4c   :  { %v6353_v13 = vpack.c.bf16 %v417_v11, %v414_v10  ;;  %v115_v16 = vld [vmem:[#allocation6 + $0x48] sm:$0xff]  ;;  %4815 = vmatpush1.bf16.msra.mxu1 %v4814_v8  ;;  %v4816_v17 = vpack.c.bf16 %v116_v14, %v113_v12  ;;  %v421_v19 = vld [vmem:[#allocation8 + $0x38] sm:$0xff]  ;;  %v424_v20 = vld [vmem:[#allocation8 + $0x50] sm:$0xff] }
  0x4d   :  { %4877 = vmatprep.subr.bf16.mxu0 %v6351_v9  ;;  %v4818_v18 = vpack.c.bf16 %v115_v16, %v112_v15  ;;  %v420_v21 = vld [vmem:[#allocation8 + $0x30] sm:$0xff]  ;;  %v6357_v22 = vpack.c.bf16 %v424_v20, %v421_v19  ;;  %v423_v23 = vld [vmem:[#allocation8 + $0x48] sm:$0xff]  ;;  %v122_v25 = vld [vmem:[#allocation6 + $0x80] sm:$0xff] }
  0x4e   :  { %4879 = vmatpush1.bf16.msra.mxu0 %v6353_v13  ;;  %v119_v24 = vld [vmem:[#allocation6 + $0x68] sm:$0xff]  ;;  %4817 = vmatprep.subr.bf16.mxu1 %v4816_v17  ;;  %v6359_v26 = vpack.c.bf16 %v423_v23, %v420_v21  ;;  %v118_v28 = vld [vmem:[#allocation6 + $0x60] sm:$0xff]  ;;  %v121_v29 = vld [vmem:[#allocation6 + $0x78] sm:$0xff] }
  0x4f   :  { %v4820_v27 = vpack.c.bf16 %v122_v25, %v119_v24  ;;  %v427_v30 = vld [vmem:[#allocation8 + $0x68] sm:$0xff]  ;;  %4881 = vmatprep.subr.bf16.mxu0 %v6357_v22  ;;  %v430_v31 = vld [vmem:[#allocation8 + $0x80] sm:$0xff]  ;;  %v429_v33 = vld [vmem:[#allocation8 + $0x78] sm:$0xff]  ;;  %v4822_v34 = vpack.c.bf16 %v121_v29, %v118_v28 }
  0x50   :  { %v426_v32 = vld [vmem:[#allocation8 + $0x60] sm:$0xff]  ;;  %4819 = vmatpush1.bf16.msra.mxu1 %v4818_v18  ;;  %v6362_v35 = vpack.c.bf16 %v430_v31, %v427_v30  ;;  %v125_v36 = vld [vmem:[#allocation6 + $0x98] sm:$0xff]  ;;  %v128_v37 = vld [vmem:[#allocation6 + $0xb0] sm:$0xff] }
  0x51   :  { %v124_v38 = vld [vmem:[#allocation6 + $0x90] sm:$0xff]  ;;  %4821 = vmatprep.subr.bf16.mxu1 %v4820_v27  ;;  %v6365_v39 = vpack.c.bf16 %v429_v33, %v426_v32  ;;  %v4824_v40 = vpack.c.bf16 %v128_v37, %v125_v36  ;;  %v127_v41 = vld [vmem:[#allocation6 + $0xa8] sm:$0xff]  ;;  %v433_v42 = vld [vmem:[#allocation8 + $0x98] sm:$0xff] }
  0x52   :  { %4883 = vmatpush1.bf16.msra.mxu0 %v6359_v26  ;;  %v436_v43 = vld [vmem:[#allocation8 + $0xb0] sm:$0xff]  ;;  %v435_v46 = vld [vmem:[#allocation8 + $0xa8] sm:$0xff]  ;;  %v134_v48 = vld [vmem:[#allocation6 + $0xe0] sm:$0xff]  ;;  %v4826_v49 = vpack.c.bf16 %v127_v41, %v124_v38 }
  0x53   :  { %4885 = vmatprep.subr.bf16.mxu0 %v6362_v35  ;;  %v6368_v44 = vpack.c.bf16 %v436_v43, %v433_v42  ;;  %v432_v45 = vld [vmem:[#allocation8 + $0x90] sm:$0xff]  ;;  %v131_v47 = vld [vmem:[#allocation6 + $0xc8] sm:$0xff]  ;;  %v442_v51 = vld [vmem:[#allocation8 + $0xe0] sm:$0xff] }
  0x54   :  { %4823 = vmatpush1.bf16.msra.mxu1 %v4822_v34  ;;  %v439_v50 = vld [vmem:[#allocation8 + $0xc8] sm:$0xff]  ;;  %v6371_v52 = vpack.c.bf16 %v435_v46, %v432_v45  ;;  %v4828_v53 = vpack.c.bf16 %v134_v48, %v131_v47  ;;  %v130_v54 = vld [vmem:[#allocation6 + $0xc0] sm:$0xff]  ;;  %v133_v55 = vld [vmem:[#allocation6 + $0xd8] sm:$0xff] }
  0x55   :  { %4825 = vmatprep.subr.bf16.mxu1 %v4824_v40  ;;  %v438_v56 = vld [vmem:[#allocation8 + $0xc0] sm:$0xff]  ;;  %v6374_v57 = vpack.c.bf16 %v442_v51, %v439_v50  ;;  %v441_v58 = vld [vmem:[#allocation8 + $0xd8] sm:$0xff]  ;;  %v140_v60 = vld [vmem:[#allocation6 + $0x110] sm:$0xff]  ;;  %v4830_v63 = vpack.c.bf16 %v133_v55, %v130_v54 }
  0x56   :  { %4887 = vmatpush1.bf16.msra.mxu0 %v6365_v39  ;;  %v137_v59 = vld [vmem:[#allocation6 + $0xf8] sm:$0xff]  ;;  %v448_v62 = vld [vmem:[#allocation8 + $0x110] sm:$0xff]  ;;  %v6377_v1 = vpack.c.bf16 %v441_v58, %v438_v56  ;;  %v139_v4 = vld [vmem:[#allocation6 + $0x108] sm:$0xff] }
  0x57   :  { %4889 = vmatprep.subr.bf16.mxu0 %v6368_v44  ;;  %v445_v61 = vld [vmem:[#allocation8 + $0xf8] sm:$0xff]  ;;  %v4832_v2 = vpack.c.bf16 %v140_v60, %v137_v59  ;;  %v136_v3 = vld [vmem:[#allocation6 + $0xf0] sm:$0xff]  ;;  %v447_v7 = vld [vmem:[#allocation8 + $0x108] sm:$0xff] }
  0x58   :  { %4827 = vmatpush1.bf16.msra.mxu1 %v4826_v49  ;;  %v444_v5 = vld [vmem:[#allocation8 + $0xf0] sm:$0xff]  ;;  %v6380_v6 = vpack.c.bf16 %v448_v62, %v445_v61  ;;  %v143_v8 = vld [vmem:[#allocation6 + $0x128] sm:$0xff]  ;;  %v146_v10 = vld [vmem:[#allocation6 + $0x140] sm:$0xff]  ;;  %v4834_v14 = vpack.c.bf16 %v139_v4, %v136_v3 }
  0x59   :  { %4829 = vmatprep.subr.bf16.mxu1 %v4828_v53  ;;  %v451_v11 = vld [vmem:[#allocation8 + $0x128] sm:$0xff]  ;;  %v454_v12 = vld [vmem:[#allocation8 + $0x140] sm:$0xff]  ;;  %v6383_v15 = vpack.c.bf16 %v447_v7, %v444_v5  ;;  %v4836_v16 = vpack.c.bf16 %v146_v10, %v143_v8  ;;  %v145_v18 = vld [vmem:[#allocation6 + $0x138] sm:$0xff] }
  0x5a   :  { %4891 = vmatpush1.bf16.msra.mxu0 %v6371_v52  ;;  %v142_v17 = vld [vmem:[#allocation6 + $0x120] sm:$0xff]  ;;  %v6386_v20 = vpack.c.bf16 %v454_v12, %v451_v11  ;;  %v453_v21 = vld [vmem:[#allocation8 + $0x138] sm:$0xff]  ;;  %v152_v24 = vld [vmem:[#allocation6 + $0x170] sm:$0xff] }
  0x5b   :  { %4893 = vmatprep.subr.bf16.mxu0 %v6374_v57  ;;  %v450_v19 = vld [vmem:[#allocation8 + $0x120] sm:$0xff]  ;;  %v149_v23 = vld [vmem:[#allocation6 + $0x158] sm:$0xff]  ;;  %v460_v27 = vld [vmem:[#allocation8 + $0x170] sm:$0xff]  ;;  %v4838_v28 = vpack.c.bf16 %v145_v18, %v142_v17 }
  0x5c   :  { %4831 = vmatpush1.bf16.msra.mxu1 %v4830_v63  ;;  %v457_v25 = vld [vmem:[#allocation8 + $0x158] sm:$0xff]  ;;  %v6389_v29 = vpack.c.bf16 %v453_v21, %v450_v19  ;;  %v4840_v30 = vpack.c.bf16 %v152_v24, %v149_v23  ;;  %v148_v31 = vld [vmem:[#allocation6 + $0x150] sm:$0xff]  ;;  %v151_v32 = vld [vmem:[#allocation6 + $0x168] sm:$0xff]  ;;  %v7432_v23 = vmov 0.0|0.0  }
  0x5d   :  { %4833 = vmatprep.subr.bf16.mxu1 %v4832_v2  ;;  %v456_v33 = vld [vmem:[#allocation8 + $0x150] sm:$0xff]  ;;  %v6392_v34 = vpack.c.bf16 %v460_v27, %v457_v25  ;;  %v459_v36 = vld [vmem:[#allocation8 + $0x168] sm:$0xff]  ;;  %v4842_v40 = vpack.c.bf16 %v151_v32, %v148_v31  ;;  %v114_v43 = vld [vmem:[#allocation6 + $0x40] sm:$0xff] }
  0x5e   :  { %4895 = vmatpush1.bf16.msra.mxu0 %v6377_v1  ;;  %v108_v37 = vld [vmem:[#allocation6 + $0x10] sm:$0xff]  ;;  %v111_v38 = vld [vmem:[#allocation6 + $0x28] sm:$0xff]  ;;  %v6395_v41 = vpack.c.bf16 %v459_v36, %v456_v33  ;;  %v117_v45 = vld [vmem:[#allocation6 + $0x58] sm:$0xff] }
  0x5f   :  { %4897 = vmatprep.subr.bf16.mxu0 %v6380_v6  ;;  %v4844_v42 = vpack.c.bf16 %v111_v38, %v108_v37  ;;  %v6401_v46 = vld [vmem:[%s7413_s0] sm:$0xff]  ;;  %v4848_v48 = vpack.c.bf16 %v117_v45, %v114_v43  ;;  %v120_v49 = vld [vmem:[#allocation6 + $0x70] sm:$0xff]  ;;  %v123_v50 = vld [vmem:[#allocation6 + $0x88] sm:$0xff] }
  0x60   :  { %4835 = vmatpush1.bf16.msra.mxu1 %v4834_v14  ;;  %v6407_v47 = vld [vmem:[%s7414_s1] sm:$0xff]  ;;  %v6415_v51 = vld [vmem:[%s7413_s0 + $0x8] sm:$0xff]  ;;  %v4852_v53 = vpack.c.bf16 %v123_v50, %v120_v49  ;;  %v129_v55 = vld [vmem:[#allocation6 + $0xb8] sm:$0xff] }
  0x61   :  { %4837 = vmatprep.subr.bf16.mxu1 %v4836_v16  ;;  %v126_v54 = vld [vmem:[#allocation6 + $0xa0] sm:$0xff]  ;;  %v6426_v56 = vld [vmem:[%s7413_s0 + $0x10] sm:$0xff]  ;;  %v135_v60 = vld [vmem:[#allocation6 + $0xe8] sm:$0xff] }
  0x62   :  { %4899 = vmatpush1.bf16.msra.mxu0 %v6383_v15  ;;  %v4856_v58 = vpack.c.bf16 %v129_v55, %v126_v54  ;;  %v132_v59 = vld [vmem:[#allocation6 + $0xd0] sm:$0xff]  ;;  %v101_v61 = vld [vmem:[%s7413_s0 + $0x18] sm:$0xff]  ;;  %v138_v63 = vld [vmem:[#allocation6 + $0x100] sm:$0xff]  ;;  %v156_v54 = vlaneseq }
  0x63   :  { %4901 = vmatprep.subr.bf16.mxu0 %v6386_v20  ;;  %v4860_v62 = vpack.c.bf16 %v135_v60, %v132_v59  ;;  %v141_v2 = vld [vmem:[#allocation6 + $0x118] sm:$0xff]  ;;  %v102_v3 = vld [vmem:[%s7413_s0 + $0x20] sm:$0xff]  ;;  %v144_v5 = vld [vmem:[#allocation6 + $0x130] sm:$0xff] }
  0x64   :  { %4839 = vmatpush1.bf16.msra.mxu1 %v4838_v28  ;;  %v4864_v4 = vpack.c.bf16 %v141_v2, %v138_v63  ;;  %v147_v7 = vld [vmem:[#allocation6 + $0x148] sm:$0xff]  ;;  %v150_v11 = vld [vmem:[#allocation6 + $0x160] sm:$0xff]  ;;  %v153_v12 = vld [vmem:[#allocation6 + $0x178] sm:$0xff]  ;;  %v6520_v55 = vshrl.u32 %v156_v54, 7 }
  0x65   :  { %4841 = vmatprep.subr.bf16.mxu1 %v4840_v30  ;;  %v103_v8 = vld [vmem:[%s7413_s0 + $0x28] sm:$0xff]  ;;  %v4868_v10 = vpack.c.bf16 %v147_v7, %v144_v5  ;;  %v104_v14 = vld [vmem:[%s7413_s0 + $0x30] sm:$0xff]  ;;  %v4872_v16 = vpack.c.bf16 %v153_v12, %v150_v11  ;;  %v105_v17 = vld [vmem:[%s7413_s0 + $0x38] sm:$0xff] }
  0x66   :  { %4903 = vmatpush1.bf16.msra.mxu0 %v6389_v29  ;;  %v416_v18 = vld [vmem:[#allocation8 + $0x10] sm:$0xff]  ;;  %v419_v19 = vld [vmem:[#allocation8 + $0x28] sm:$0xff]  ;;  %v422_v24 = vld [vmem:[#allocation8 + $0x40] sm:$0xff]  ;;  %7436 = vst [vmem:[#allocation16_spill] sm:$0xff] %v6520_v55  ;;  %v7428_v59 = vsub.s32 1, %v6520_v55 }
  0x67   :  { %4905 = vmatprep.subr.bf16.mxu0 %v6392_v34  ;;  %v6462_v21 = vpack.c.bf16 %v419_v19, %v416_v18  ;;  %v425_v25 = vld [vmem:[#allocation8 + $0x58] sm:$0xff]  ;;  %v428_v28 = vld [vmem:[#allocation8 + $0x70] sm:$0xff]  ;;  %v431_v30 = vld [vmem:[#allocation8 + $0x88] sm:$0xff] }
  0x68   :  { %4843 = vmatpush1.bf16.msra.mxu1 %v4842_v40  ;;  %v6469_v27 = vpack.c.bf16 %v425_v25, %v422_v24  ;;  %v6474_v31 = vpack.c.bf16 %v431_v30, %v428_v28  ;;  %v434_v32 = vld [vmem:[#allocation8 + $0xa0] sm:$0xff]  ;;  %v437_v33 = vld [vmem:[#allocation8 + $0xb8] sm:$0xff]  ;;  %v440_v37 = vld [vmem:[#allocation8 + $0xd0] sm:$0xff] }
  0x69   :  { %4845 = vmatprep.subr.bf16.mxu1 %v4844_v42  ;;  %v6478_v36 = vpack.c.bf16 %v437_v33, %v434_v32  ;;  %v443_v38 = vld [vmem:[#allocation8 + $0xe8] sm:$0xff]  ;;  %v449_v43 = vld [vmem:[#allocation8 + $0x118] sm:$0xff]  ;;  %v458_v50 = vld [vmem:[#allocation8 + $0x160] sm:$0xff] }
  0x6a   :  { %4907 = vmatpush1.bf16.msra.mxu0 %v6395_v41  ;;  %v6482_v40 = vpack.c.bf16 %v443_v38, %v440_v37 }
  0x6b   :  { %4933 = vmatprep.subr.bf16.mxu0 %v6351_v9  ;;  %236 = vmatmul.mubr.f32.vlgmr.msra.gmra.mrb[0].mxu1 %v6401_v46 }
  0x6c   :  { %4847 = vmatpush3.bf16.msra.mxu1 %v4844_v42  ;;  %241 = vmatprep.mubr.f32.mxu1 %v7430_v0  ;;  %v446_v42 = vld [vmem:[#allocation8 + $0x100] sm:$0xff] }
  0x6d   :  { %540 = vmatmul.mubr.f32.vlgmr.msra.gmra.mrb[0].mxu0 %v6407_v47  ;;  %4849 = vmatprep.subr.bf16.mxu1 %v4848_v48  ;;  %v6488_v45 = vpack.c.bf16 %v449_v43, %v446_v42 }
  0x6e   :  { %4935 = vmatpush1.bf16.msra.mxu0 %v6353_v13  ;;  %709 = vmatprep.mubr.f32.mxu0 %v7430_v0 }
  0x6f   :  { %242 = vmatmul.mubr.f32.gmra.mrb[2].mxu1 %v6415_v51  ;;  %4937 = vmatprep.subr.bf16.mxu0 %v6357_v22 }
  0x70   :  { %4851 = vmatpush3.bf16.msra.mxu1 %v4848_v48  ;;  %247 = vmatprep.mubr.f32.mxu1 %v7430_v0  ;;  %v455_v48 = vld [vmem:[#allocation8 + $0x148] sm:$0xff] }
  0x71   :  { %4853 = vmatprep.subr.bf16.mxu1 %v4852_v53 }
  0x72   :  { %4939 = vmatpush1.bf16.msra.mxu0 %v6359_v26 }
  0x73   :  { %248 = vmatmul.mubr.f32.gmra.mrb[4].mxu1 %v6426_v56  ;;  %4941 = vmatprep.subr.bf16.mxu0 %v6362_v35 }
  0x74   :  { %4855 = vmatpush3.bf16.msra.mxu1 %v4852_v53  ;;  %253 = vmatprep.mubr.f32.mxu1 %v7430_v0 }
  0x75   :  { %4857 = vmatprep.subr.bf16.mxu1 %v4856_v58 }
  0x76   :  { %4943 = vmatpush1.bf16.msra.mxu0 %v6365_v39 }
  0x77   :  { %254 = vmatmul.mubr.f32.gmra.mrb[6].mxu1 %v101_v61  ;;  %4945 = vmatprep.subr.bf16.mxu0 %v6368_v44 }
  0x78   :  { %4859 = vmatpush3.bf16.msra.mxu1 %v4856_v58  ;;  %259 = vmatprep.mubr.f32.mxu1 %v7430_v0  ;;  %v154_v58 = vld [vmem:[%s7417_s4] sm:$0x7] }
  0x79   :  { %4861 = vmatprep.subr.bf16.mxu1 %v4860_v62 }
  0x7a   :  { %4947 = vmatpush1.bf16.msra.mxu0 %v6371_v52 }
  0x7b   :  { %260 = vmatmul.mubr.f32.gmra.mrb[8].mxu1 %v102_v3  ;;  %4949 = vmatprep.subr.bf16.mxu0 %v6374_v57 }
  0x7c   :  { %4863 = vmatpush3.bf16.msra.mxu1 %v4860_v62  ;;  %265 = vmatprep.mubr.f32.mxu1 %v7430_v0 }
  0x7d   :  { %4865 = vmatprep.subr.bf16.mxu1 %v4864_v4 }
  0x7e   :  { %4951 = vmatpush1.bf16.msra.mxu0 %v6377_v1 }
  0x7f   :  { %266 = vmatmul.mubr.f32.gmra.mrb[10].mxu1 %v103_v8  ;;  %4953 = vmatprep.subr.bf16.mxu0 %v6380_v6 }
  0x80   :  { %4867 = vmatpush3.bf16.msra.mxu1 %v4864_v4  ;;  %271 = vmatprep.mubr.f32.mxu1 %v7430_v0 }
  0x81   :  { %4869 = vmatprep.subr.bf16.mxu1 %v4868_v10 }
  0x82   :  { %4955 = vmatpush1.bf16.msra.mxu0 %v6383_v15 }
  0x83   :  { %272 = vmatmul.mubr.f32.gmra.mrb[12].mxu1 %v104_v14  ;;  %4957 = vmatprep.subr.bf16.mxu0 %v6386_v20 }
  0x84   :  { %4871 = vmatpush3.bf16.msra.mxu1 %v4868_v10  ;;  %277 = vmatprep.mubr.f32.mxu1 %v7430_v0 }
  0x85   :  { %4873 = vmatprep.subr.bf16.mxu1 %v4872_v16 }
  0x86   :  { %4959 = vmatpush1.bf16.msra.mxu0 %v6389_v29 }
  0x87   :  { %278 = vmatmul.mubr.f32.gmra.mrb[14].mxu1 %v105_v17  ;;  %4961 = vmatprep.subr.bf16.mxu0 %v6392_v34 }
  0x88   :  { %4875 = vmatpush3.bf16.msra.mxu1 %v4872_v16  ;;  %4152 = vmatprep.mubr.f32.mxu1 %v6401_v46  ;;  %v452_v46 = vld [vmem:[#allocation8 + $0x130] sm:$0xff] }
  0x89   :  { %4908 = vmatprep.subr.bf16.mxu1 %v7432_v23  ;;  %v6492_v49 = vpack.c.bf16 %v455_v48, %v452_v46 }
  0x8a   :  { %4963 = vmatpush1.bf16.msra.mxu0 %v6395_v41 }
  0x8b   :  { %4153 = vmatmul.mubr.f32.vlgmr.msra.gmra.mrb[16].mxu1 %v6415_v51  ;;  %4989 = vmatprep.subr.bf16.mxu0 %v6351_v9  ;;  %v461_v51 = vld [vmem:[#allocation8 + $0x178] sm:$0xff] }
  0x8c   :  { %4910 = vmatpush3.bf16.msra.mxu1 %v6462_v21  ;;  %4155 = vmatprep.mubr.f32.mxu1 %v6426_v56  ;;  %v6496_v53 = vpack.c.bf16 %v461_v51, %v458_v50  ;;  %v7429_v56 = vsub.s32 0, %v6520_v55 }
  0x8d   :  { %4911 = vmatprep.subr.bf16.mxu1 %v7432_v23 }
  0x8e   :  { %v159_v60 = vrot.slane %v154_v58, %v7429_v56 }
  0x8f   :  { %4156 = vmatmul.mubr.f32.gmra.mrb[18].mxu1 %v101_v61  ;;  %v163_v61 = vrot.slane %v154_v58, %v7428_v59 }
  0x90   :  { %4913 = vmatpush3.bf16.msra.mxu1 %v6469_v27  ;;  %4158 = vmatprep.mubr.f32.mxu1 %v102_v3 }
  0x91   :  { %4914 = vmatprep.subr.bf16.mxu1 %v7432_v23 }
  0x93   :  { %4159 = vmatmul.mubr.f32.gmra.mrb[20].mxu1 %v103_v8 }
  0x94   :  { %4916 = vmatpush3.bf16.msra.mxu1 %v6474_v31  ;;  %4161 = vmatprep.mubr.f32.mxu1 %v104_v14 }
  0x95   :  { %4917 = vmatprep.subr.bf16.mxu1 %v7432_v23 }
  0x97   :  { %4162 = vmatmul.mubr.f32.gmra.mrb[22].mxu1 %v105_v17 }
  0x98   :  { %4919 = vmatpush3.bf16.msra.mxu1 %v6478_v36  ;;  %4196 = vmatprep.mubr.msk.f32.mxu1 %vm6204_vm0, %v7430_v0 }
  0x99   :  { %4920 = vmatprep.subr.bf16.mxu1 %v7432_v23 }
  0x9c   :  { %4922 = vmatpush3.bf16.msra.mxu1 %v6482_v40 }
  0x9d   :  { %4923 = vmatprep.subr.bf16.mxu1 %v7432_v23 }
  0xa0   :  { %4925 = vmatpush3.bf16.msra.mxu1 %v6488_v45 }
  0xa1   :  { %4926 = vmatprep.subr.bf16.mxu1 %v7432_v23 }
  0xa4   :  { %4928 = vmatpush3.bf16.msra.mxu1 %v6492_v49 }
  0xa5   :  { %4929 = vmatprep.subr.bf16.mxu1 %v7432_v23 }
  0xa8   :  { %4931 = vmatpush3.bf16.msra.mxu1 %v6496_v53 }
  0xa9   :  { %4964 = vmatprep.subr.bf16.mxu1 %v7432_v23 }
  0xab   :  { %4197 = vmatmul.mubr.f32.vlgmr.msra.gmra.mrb[24].mxu1 %v6407_v47 }
  0xac   :  { %4966 = vmatpush3.bf16.msra.mxu1 %v6462_v21  ;;  %4231 = vmatprep.mubr.msk.f32.mxu1 %vm6204_vm0, %v7430_v0 }
  0xad   :  { %4967 = vmatprep.subr.bf16.mxu1 %v7432_v23 }
  0xb0   :  { %4969 = vmatpush3.bf16.msra.mxu1 %v6469_v27 }
  0xb1   :  { %4970 = vmatprep.subr.bf16.mxu1 %v7432_v23 }
  0xb4   :  { %4972 = vmatpush3.bf16.msra.mxu1 %v6474_v31 }
  0xb5   :  { %4973 = vmatprep.subr.bf16.mxu1 %v7432_v23 }
  0xb8   :  { %4975 = vmatpush3.bf16.msra.mxu1 %v6478_v36 }
  0xb9   :  { %4976 = vmatprep.subr.bf16.mxu1 %v7432_v23 }
  0xbc   :  { %4978 = vmatpush3.bf16.msra.mxu1 %v6482_v40 }
  0xbd   :  { %4979 = vmatprep.subr.bf16.mxu1 %v7432_v23 }
  0xc0   :  { %4981 = vmatpush3.bf16.msra.mxu1 %v6488_v45 }
  0xc1   :  { %4982 = vmatprep.subr.bf16.mxu1 %v7432_v23 }
  0xc4   :  { %4984 = vmatpush3.bf16.msra.mxu1 %v6492_v49 }
  0xc5   :  { %4985 = vmatprep.subr.bf16.mxu1 %v7432_v23 }
  0xc8   :  { %4987 = vmatpush3.bf16.msra.mxu1 %v6496_v53 }
  0xc9   :  { %5020 = vmatprep.subr.bf16.mxu1 %v7432_v23 }
 0x13e   :  { %v237_v62 = vpop.f32.mrb[0].mxu1 }
 0x13f   :  { %v238_v63 = vadd.f32 %v237_v62, %v159_v60  ;;  %v239_v2 = vpop.f32.mrb[1].mxu1  ;;  %v7427_v62 = vsub.s32 2, %v6520_v55 }
 0x140   :  { %v541_v3 = vpop.f32.mrb[0].mxu0  ;;  %v240_v4 = vadd.f32 %v239_v2, %v163_v61 }
 0x141   :  { %v543_v5 = vpop.f32.mrb[1].mxu0  ;;  %v616_v7 = vadd.f32 %v541_v3, %v238_v63 }
 0x142   :  { %v617_v8 = vadd.f32 %v543_v5, %v240_v4  ;;  %v243_v10 = vpop.f32.mrb[2].mxu1  ;;  %v167_v5 = vrot.slane %v154_v58, %v7427_v62 }
 0x143   :  { %v6531_v11 = vadd.f32 %v243_v10, %v159_v60  ;;  %v245_v12 = vpop.f32.mrb[3].mxu1 }
 0x144   :  { %v6533_v14 = vadd.f32 %v245_v12, %v163_v61 }
 0x146   :  { %v249_v16 = vpop.f32.mrb[4].mxu1 }
 0x147   :  { %v6535_v17 = vadd.f32 %v249_v16, %v159_v60  ;;  %v251_v18 = vpop.f32.mrb[5].mxu1 }
 0x148   :  { %v6537_v19 = vadd.f32 %v251_v18, %v163_v61 }
 0x14a   :  { %v255_v24 = vpop.f32.mrb[6].mxu1 }
 0x14b   :  { %v6539_v25 = vadd.f32 %v255_v24, %v159_v60  ;;  %v257_v28 = vpop.f32.mrb[7].mxu1  ;;  %v3740_v24 = vmul.f32 -1.442695, %v616_v7 }
 0x14c   :  { %v6541_v30 = vadd.f32 %v257_v28, %v163_v61 }
 0x14d   :  { %5941 = vpow2.f32 %v3740_v24  ;;  %v6579_v24 = vld [vmem:[%s7418_s5] ss:$0 sm:$0xff] }
 0x14e   :  { %v261_v32 = vpop.f32.mrb[8].mxu1 }
 0x14f   :  { %v6543_v33 = vadd.f32 %v261_v32, %v159_v60  ;;  %v263_v37 = vpop.f32.mrb[9].mxu1 }
 0x150   :  { %v6545_v38 = vadd.f32 %v263_v37, %v163_v61 }
 0x152   :  { %v267_v42 = vpop.f32.mrb[10].mxu1 }
 0x153   :  { %v6547_v43 = vadd.f32 %v267_v42, %v159_v60  ;;  %v269_v46 = vpop.f32.mrb[11].mxu1 }
 0x154   :  { %v6549_v48 = vadd.f32 %v269_v46, %v163_v61 }
 0x156   :  { %v273_v50 = vpop.f32.mrb[12].mxu1 }
 0x157   :  { %v6551_v51 = vadd.f32 %v273_v50, %v159_v60  ;;  %v275_v54 = vpop.f32.mrb[13].mxu1  ;;  %v5942_v7 = vpop.eup %5941 }
 0x158   :  { %v6554_v63 = vadd.f32 %v275_v54, %v163_v61 }
 0x15a   :  { %v279_v2 = vpop.f32.mrb[14].mxu1 }
 0x15b   :  { %v6556_v3 = vadd.f32 %v279_v2, %v159_v60  ;;  %v281_v4 = vpop.f32.mrb[15].mxu1 }
 0x15c   :  { %v6560_v10 = vadd.f32 %v281_v4, %v163_v61  ;;  %v3741_v4 = vmul.f32 -1.442695, %v617_v8 }
 0x15e   :  { %v4154_v12 = vpop.f32.mrb[16].mxu1  ;;  %5943 = vpow2.f32 %v3741_v4 }
 0x15f   :  { %v6562_v16 = vadd.f32 %v4154_v12, %v167_v5  ;;  %v350_v18 = vpop.f32.mrb[17].mxu1 }
 0x160   :  { %v351_v8 = vadd.f32 %v350_v18, %v167_v5 }
 0x162   :  { %v4157_v28 = vpop.f32.mrb[18].mxu1 }
 0x163   :  { %v6564_v32 = vadd.f32 %v4157_v28, %v167_v5  ;;  %v360_v37 = vpop.f32.mrb[19].mxu1  ;;  %v624_v28 = vadd.f32 1.0, %v5942_v7 }
 0x164   :  { %v6566_v42 = vadd.f32 %v360_v37, %v167_v5 }
 0x165   :  { %5945 = vrcp.f32 %v624_v28 }
 0x166   :  { %v4160_v60 = vpop.f32.mrb[20].mxu1 }
 0x167   :  { %v6568_v46 = vadd.f32 %v4160_v60, %v167_v5  ;;  %v370_v50 = vpop.f32.mrb[21].mxu1 }
 0x168   :  { %v6570_v54 = vadd.f32 %v370_v50, %v167_v5  ;;  %v5944_v37 = vpop.eup %5943 }
 0x169   :  { %v625_v60 = vadd.f32 1.0, %v5944_v37 }
 0x16a   :  { %v4163_v58 = vpop.f32.mrb[22].mxu1 }
 0x16b   :  { %v6572_v61 = vadd.f32 %v4163_v58, %v167_v5  ;;  %v380_v2 = vpop.f32.mrb[23].mxu1  ;;  %5947 = vrcp.f32 %v625_v60 }
 0x16c   :  { %v6574_v12 = vadd.f32 %v380_v2, %v167_v5 }
 0x16f   :  { %v5946_v59 = vpop.eup %5945 }
 0x175   :  { %v5948_v4 = vpop.eup %5947 }
 0x176   :  { %v634_v7 = vsub.f32 1.0, %v5948_v4  ;;  %v636_v23 = vmul.f32 %v5948_v4, %v6407_v47 }
 0x17e   :  { %v612_v50 = vpop.f32.mrb[24].mxu1 }
 0x17f   :  { %v630_v62 = vadd.f32 %v6579_v24, %v612_v50  ;;  %v4198_v58 = vpop.f32.mrb[25].mxu1 }
 0x181   :  { %v631_v2 = vmul.f32 %v5946_v59, %v630_v62  ;;  %v7437_v59 = vmov 0.0|0.0  }
 0x183   :  { %v632_v56 = vadd.f32 %v631_v2, %v351_v8 }
 0x185   :  { %5949 = vtanh.f32 %v632_v56  ;;  %v7438_v56 = vmov 0.0  }
 0x18f   :  { %v5950_v28 = vpop.eup %5949 }
 0x190   :  { %v635_v0 = vmul.f32 %v5950_v28, %v634_v7 }
 0x192   :  { %v6583_v55 = vadd.f32 %v636_v23, %v635_v0 }
 0x194   :  { %710 = vmatmul.mubr.f32.vlgmr.msra.gmra.mrb[2].mxu0 %v6583_v55  ;;  %4232 = vmatmul.mubr.f32.vlgmr.msra.gmra.mrb[26].mxu1 %v6583_v55 }
 0x195   :  { %4991 = vmatpush1.bf16.msra.mxu0 %v6353_v13  ;;  %5022 = vmatpush3.bf16.msra.mxu1 %v6462_v21 }
 0x196   :  { %4993 = vmatprep.subr.bf16.mxu0 %v6357_v22  ;;  %5023 = vmatprep.subr.bf16.mxu1 %v7437_v59 }
 0x197   :  { %880 = vmatprep.mubr.f32.mxu0 %v7438_v56  ;;  %4266 = vmatprep.mubr.msk.f32.mxu1 %vm6204_vm0, %v7438_v56 }
 0x199   :  { %4995 = vmatpush1.bf16.msra.mxu0 %v6359_v26  ;;  %5025 = vmatpush3.bf16.msra.mxu1 %v6469_v27 }
 0x19a   :  { %4997 = vmatprep.subr.bf16.mxu0 %v6362_v35  ;;  %5026 = vmatprep.subr.bf16.mxu1 %v7437_v59 }
 0x19d   :  { %4999 = vmatpush1.bf16.msra.mxu0 %v6365_v39  ;;  %5028 = vmatpush3.bf16.msra.mxu1 %v6474_v31 }
 0x19e   :  { %5001 = vmatprep.subr.bf16.mxu0 %v6368_v44  ;;  %5029 = vmatprep.subr.bf16.mxu1 %v7437_v59 }
 0x1a1   :  { %5003 = vmatpush1.bf16.msra.mxu0 %v6371_v52  ;;  %5031 = vmatpush3.bf16.msra.mxu1 %v6478_v36 }
 0x1a2   :  { %5005 = vmatprep.subr.bf16.mxu0 %v6374_v57  ;;  %5032 = vmatprep.subr.bf16.mxu1 %v7437_v59 }
 0x1a5   :  { %5007 = vmatpush1.bf16.msra.mxu0 %v6377_v1  ;;  %5034 = vmatpush3.bf16.msra.mxu1 %v6482_v40 }
 0x1a6   :  { %5009 = vmatprep.subr.bf16.mxu0 %v6380_v6  ;;  %5035 = vmatprep.subr.bf16.mxu1 %v7437_v59 }
 0x1a9   :  { %5011 = vmatpush1.bf16.msra.mxu0 %v6383_v15  ;;  %5037 = vmatpush3.bf16.msra.mxu1 %v6488_v45 }
 0x1aa   :  { %5013 = vmatprep.subr.bf16.mxu0 %v6386_v20  ;;  %5038 = vmatprep.subr.bf16.mxu1 %v7437_v59 }
 0x1ad   :  { %5015 = vmatpush1.bf16.msra.mxu0 %v6389_v29  ;;  %5040 = vmatpush3.bf16.msra.mxu1 %v6492_v49 }
 0x1ae   :  { %5017 = vmatprep.subr.bf16.mxu0 %v6392_v34  ;;  %5041 = vmatprep.subr.bf16.mxu1 %v7437_v59 }
 0x1b1   :  { %5019 = vmatpush1.bf16.msra.mxu0 %v6395_v41  ;;  %5043 = vmatpush3.bf16.msra.mxu1 %v6496_v53 }
 0x1b2   :  { %5045 = vmatprep.subr.bf16.mxu0 %v6351_v9  ;;  %5076 = vmatprep.subr.bf16.mxu1 %v7437_v59 }
 0x267   :  { %v711_v0 = vpop.f32.mrb[2].mxu0  ;;  %v782_v47 = vpop.f32.mrb[26].mxu1 }
 0x268   :  { %v786_v23 = vadd.f32 %v711_v0, %v6531_v11  ;;  %v713_v62 = vpop.f32.mrb[3].mxu0  ;;  %v4233_v5 = vpop.f32.mrb[27].mxu1  ;;  %v800_v4 = vadd.f32 %v6579_v24, %v782_v47 }
 0x269   :  { %v787_v18 = vadd.f32 %v713_v62, %v6533_v14 }
 0x26a   :  { %v3742_v37 = vmul.f32 -1.442695, %v786_v23 }
 0x26b   :  { %v3743_v60 = vmul.f32 -1.442695, %v787_v18 }
 0x26c   :  { %5951 = vpow2.f32 %v3742_v37 }
 0x26d   :  { %5953 = vpow2.f32 %v3743_v60 }
 0x276   :  { %v5952_v50 = vpop.eup %5951 }
 0x277   :  { %v794_v58 = vadd.f32 1.0, %v5952_v50  ;;  %v5954_v8 = vpop.eup %5953 }
 0x278   :  { %v795_v2 = vadd.f32 1.0, %v5954_v8 }
 0x279   :  { %5955 = vrcp.f32 %v794_v58 }
 0x27a   :  { %5957 = vrcp.f32 %v795_v2 }
 0x283   :  { %v5956_v7 = vpop.eup %5955 }
 0x284   :  { %v801_v28 = vmul.f32 %v5956_v7, %v800_v4  ;;  %v5958_v0 = vpop.eup %5957 }
 0x285   :  { %v804_v5 = vsub.f32 1.0, %v5958_v0  ;;  %v806_v62 = vmul.f32 %v5958_v0, %v6583_v55 }
 0x286   :  { %v802_v11 = vadd.f32 %v801_v28, %v6562_v16 }
 0x288   :  { %5959 = vtanh.f32 %v802_v11 }
 0x292   :  { %v5960_v14 = vpop.eup %5959 }
 0x293   :  { %v805_v23 = vmul.f32 %v5960_v14, %v804_v5 }
 0x295   :  { %v6627_v18 = vadd.f32 %v806_v62, %v805_v23 }
 0x297   :  { %881 = vmatmul.mubr.f32.vlgmr.msra.gmra.mrb[4].mxu0 %v6627_v18  ;;  %4267 = vmatmul.mubr.f32.vlgmr.msra.gmra.mrb[28].mxu1 %v6627_v18 }
 0x298   :  { %5047 = vmatpush1.bf16.msra.mxu0 %v6353_v13  ;;  %5078 = vmatpush3.bf16.msra.mxu1 %v6462_v21 }
 0x299   :  { %5049 = vmatprep.subr.bf16.mxu0 %v6357_v22  ;;  %5079 = vmatprep.subr.bf16.mxu1 %v7437_v59 }
 0x29a   :  { %1051 = vmatprep.mubr.f32.mxu0 %v7438_v56  ;;  %4301 = vmatprep.mubr.msk.f32.mxu1 %vm6204_vm0, %v7438_v56 }
 0x29c   :  { %5051 = vmatpush1.bf16.msra.mxu0 %v6359_v26  ;;  %5081 = vmatpush3.bf16.msra.mxu1 %v6469_v27 }
 0x29d   :  { %5053 = vmatprep.subr.bf16.mxu0 %v6362_v35  ;;  %5082 = vmatprep.subr.bf16.mxu1 %v7437_v59 }
 0x2a0   :  { %5055 = vmatpush1.bf16.msra.mxu0 %v6365_v39  ;;  %5084 = vmatpush3.bf16.msra.mxu1 %v6474_v31 }
 0x2a1   :  { %5057 = vmatprep.subr.bf16.mxu0 %v6368_v44  ;;  %5085 = vmatprep.subr.bf16.mxu1 %v7437_v59 }
 0x2a4   :  { %5059 = vmatpush1.bf16.msra.mxu0 %v6371_v52  ;;  %5087 = vmatpush3.bf16.msra.mxu1 %v6478_v36 }
 0x2a5   :  { %5061 = vmatprep.subr.bf16.mxu0 %v6374_v57  ;;  %5088 = vmatprep.subr.bf16.mxu1 %v7437_v59 }
 0x2a8   :  { %5063 = vmatpush1.bf16.msra.mxu0 %v6377_v1  ;;  %5090 = vmatpush3.bf16.msra.mxu1 %v6482_v40 }
 0x2a9   :  { %5065 = vmatprep.subr.bf16.mxu0 %v6380_v6  ;;  %5091 = vmatprep.subr.bf16.mxu1 %v7437_v59 }
 0x2ac   :  { %5067 = vmatpush1.bf16.msra.mxu0 %v6383_v15  ;;  %5093 = vmatpush3.bf16.msra.mxu1 %v6488_v45 }
 0x2ad   :  { %5069 = vmatprep.subr.bf16.mxu0 %v6386_v20  ;;  %5094 = vmatprep.subr.bf16.mxu1 %v7437_v59 }
 0x2b0   :  { %5071 = vmatpush1.bf16.msra.mxu0 %v6389_v29  ;;  %5096 = vmatpush3.bf16.msra.mxu1 %v6492_v49 }
 0x2b1   :  { %5073 = vmatprep.subr.bf16.mxu0 %v6392_v34  ;;  %5097 = vmatprep.subr.bf16.mxu1 %v7437_v59 }
 0x2b4   :  { %5075 = vmatpush1.bf16.msra.mxu0 %v6395_v41  ;;  %5099 = vmatpush3.bf16.msra.mxu1 %v6496_v53 }
 0x2b5   :  { %5101 = vmatprep.subr.bf16.mxu0 %v6351_v9  ;;  %5132 = vmatprep.subr.bf16.mxu1 %v7437_v59 }
 0x36a   :  { %v882_v16 = vpop.f32.mrb[4].mxu0  ;;  %v953_v47 = vpop.f32.mrb[28].mxu1 }
 0x36b   :  { %v957_v37 = vadd.f32 %v882_v16, %v6535_v17  ;;  %v884_v60 = vpop.f32.mrb[5].mxu0  ;;  %v4268_v50 = vpop.f32.mrb[29].mxu1  ;;  %v971_v0 = vadd.f32 %v6579_v24, %v953_v47 }
 0x36c   :  { %v958_v58 = vadd.f32 %v884_v60, %v6537_v19 }
 0x36d   :  { %v3744_v8 = vmul.f32 -1.442695, %v957_v37 }
 0x36e   :  { %v3745_v2 = vmul.f32 -1.442695, %v958_v58 }
 0x36f   :  { %5961 = vpow2.f32 %v3744_v8 }
 0x370   :  { %5963 = vpow2.f32 %v3745_v2 }
 0x379   :  { %v5962_v4 = vpop.eup %5961 }
 0x37a   :  { %v965_v7 = vadd.f32 1.0, %v5962_v4  ;;  %v5964_v28 = vpop.eup %5963 }
 0x37b   :  { %v966_v11 = vadd.f32 1.0, %v5964_v28 }
 0x37c   :  { %5965 = vrcp.f32 %v965_v7 }
 0x37d   :  { %5967 = vrcp.f32 %v966_v11 }
 0x386   :  { %v5966_v5 = vpop.eup %5965 }
 0x387   :  { %v972_v14 = vmul.f32 %v5966_v5, %v971_v0  ;;  %v5968_v23 = vpop.eup %5967 }
 0x388   :  { %v975_v62 = vsub.f32 1.0, %v5968_v23  ;;  %v977_v37 = vmul.f32 %v5968_v23, %v6627_v18 }
 0x389   :  { %v973_v17 = vadd.f32 %v972_v14, %v6566_v42 }
 0x38b   :  { %5969 = vtanh.f32 %v973_v17 }
 0x395   :  { %v5970_v19 = vpop.eup %5969 }
 0x396   :  { %v976_v16 = vmul.f32 %v5970_v19, %v975_v62 }
 0x398   :  { %v6671_v60 = vadd.f32 %v977_v37, %v976_v16 }
 0x39a   :  { %1052 = vmatmul.mubr.f32.vlgmr.msra.gmra.mrb[6].mxu0 %v6671_v60  ;;  %4302 = vmatmul.mubr.f32.vlgmr.msra.gmra.mrb[30].mxu1 %v6671_v60 }
 0x39b   :  { %5103 = vmatpush1.bf16.msra.mxu0 %v6353_v13  ;;  %5134 = vmatpush3.bf16.msra.mxu1 %v6462_v21 }
 0x39c   :  { %5105 = vmatprep.subr.bf16.mxu0 %v6357_v22  ;;  %5135 = vmatprep.subr.bf16.mxu1 %v7437_v59 }
 0x39d   :  { %1222 = vmatprep.mubr.f32.mxu0 %v7438_v56  ;;  %4336 = vmatprep.mubr.msk.f32.mxu1 %vm6204_vm0, %v7438_v56 }
 0x39f   :  { %5107 = vmatpush1.bf16.msra.mxu0 %v6359_v26  ;;  %5137 = vmatpush3.bf16.msra.mxu1 %v6469_v27 }
 0x3a0   :  { %5109 = vmatprep.subr.bf16.mxu0 %v6362_v35  ;;  %5138 = vmatprep.subr.bf16.mxu1 %v7437_v59 }
 0x3a3   :  { %5111 = vmatpush1.bf16.msra.mxu0 %v6365_v39  ;;  %5140 = vmatpush3.bf16.msra.mxu1 %v6474_v31 }
 0x3a4   :  { %5113 = vmatprep.subr.bf16.mxu0 %v6368_v44  ;;  %5141 = vmatprep.subr.bf16.mxu1 %v7437_v59 }
 0x3a7   :  { %5115 = vmatpush1.bf16.msra.mxu0 %v6371_v52  ;;  %5143 = vmatpush3.bf16.msra.mxu1 %v6478_v36 }
 0x3a8   :  { %5117 = vmatprep.subr.bf16.mxu0 %v6374_v57  ;;  %5144 = vmatprep.subr.bf16.mxu1 %v7437_v59 }
 0x3ab   :  { %5119 = vmatpush1.bf16.msra.mxu0 %v6377_v1  ;;  %5146 = vmatpush3.bf16.msra.mxu1 %v6482_v40 }
 0x3ac   :  { %5121 = vmatprep.subr.bf16.mxu0 %v6380_v6  ;;  %5147 = vmatprep.subr.bf16.mxu1 %v7437_v59 }
 0x3af   :  { %5123 = vmatpush1.bf16.msra.mxu0 %v6383_v15  ;;  %5149 = vmatpush3.bf16.msra.mxu1 %v6488_v45 }
 0x3b0   :  { %5125 = vmatprep.subr.bf16.mxu0 %v6386_v20  ;;  %5150 = vmatprep.subr.bf16.mxu1 %v7437_v59 }
 0x3b3   :  { %5127 = vmatpush1.bf16.msra.mxu0 %v6389_v29  ;;  %5152 = vmatpush3.bf16.msra.mxu1 %v6492_v49 }
 0x3b4   :  { %5129 = vmatprep.subr.bf16.mxu0 %v6392_v34  ;;  %5153 = vmatprep.subr.bf16.mxu1 %v7437_v59 }
 0x3b7   :  { %5131 = vmatpush1.bf16.msra.mxu0 %v6395_v41  ;;  %5155 = vmatpush3.bf16.msra.mxu1 %v6496_v53 }
 0x3b8   :  { %5157 = vmatprep.subr.bf16.mxu0 %v6351_v9  ;;  %5188 = vmatprep.subr.bf16.mxu1 %v7437_v59 }
 0x46d   :  { %v1053_v42 = vpop.f32.mrb[6].mxu0  ;;  %v1124_v47 = vpop.f32.mrb[30].mxu1 }
 0x46e   :  { %v1128_v50 = vadd.f32 %v1053_v42, %v6539_v25  ;;  %v1055_v58 = vpop.f32.mrb[7].mxu0  ;;  %v4303_v8 = vpop.f32.mrb[31].mxu1  ;;  %v1142_v14 = vadd.f32 %v6579_v24, %v1124_v47 }
 0x46f   :  { %v1129_v2 = vadd.f32 %v1055_v58, %v6541_v30 }
 0x470   :  { %v3746_v4 = vmul.f32 -1.442695, %v1128_v50 }
 0x471   :  { %v3747_v7 = vmul.f32 -1.442695, %v1129_v2 }
 0x472   :  { %5971 = vpow2.f32 %v3746_v4 }
 0x473   :  { %5973 = vpow2.f32 %v3747_v7 }
 0x47c   :  { %v5972_v28 = vpop.eup %5971 }
 0x47d   :  { %v1136_v11 = vadd.f32 1.0, %v5972_v28  ;;  %v5974_v0 = vpop.eup %5973 }
 0x47e   :  { %v1137_v5 = vadd.f32 1.0, %v5974_v0 }
 0x47f   :  { %5975 = vrcp.f32 %v1136_v11 }
 0x480   :  { %5977 = vrcp.f32 %v1137_v5 }
 0x489   :  { %v5976_v17 = vpop.eup %5975 }
 0x48a   :  { %v1143_v23 = vmul.f32 %v5976_v17, %v1142_v14  ;;  %v5978_v62 = vpop.eup %5977 }
 0x48b   :  { %v1146_v19 = vsub.f32 1.0, %v5978_v62  ;;  %v1148_v37 = vmul.f32 %v5978_v62, %v6671_v60 }
 0x48c   :  { %v1144_v25 = vadd.f32 %v1143_v23, %v6564_v32 }
 0x48e   :  { %5979 = vtanh.f32 %v1144_v25 }
 0x498   :  { %v5980_v30 = vpop.eup %5979 }
 0x499   :  { %v1147_v16 = vmul.f32 %v5980_v30, %v1146_v19 }
 0x49b   :  { %v6715_v42 = vadd.f32 %v1148_v37, %v1147_v16 }
 0x49d   :  { %1223 = vmatmul.mubr.f32.vlgmr.msra.gmra.mrb[8].mxu0 %v6715_v42  ;;  %4337 = vmatmul.mubr.f32.vlgmr.msra.gmra.mrb[32].mxu1 %v6715_v42 }
 0x49e   :  { %5159 = vmatpush1.bf16.msra.mxu0 %v6353_v13  ;;  %5190 = vmatpush3.bf16.msra.mxu1 %v6462_v21 }
 0x49f   :  { %5161 = vmatprep.subr.bf16.mxu0 %v6357_v22  ;;  %5191 = vmatprep.subr.bf16.mxu1 %v7437_v59 }
 0x4a0   :  { %1393 = vmatprep.mubr.f32.mxu0 %v7438_v56  ;;  %4371 = vmatprep.mubr.msk.f32.mxu1 %vm6204_vm0, %v7438_v56 }
 0x4a2   :  { %5163 = vmatpush1.bf16.msra.mxu0 %v6359_v26  ;;  %5193 = vmatpush3.bf16.msra.mxu1 %v6469_v27 }
 0x4a3   :  { %5165 = vmatprep.subr.bf16.mxu0 %v6362_v35  ;;  %5194 = vmatprep.subr.bf16.mxu1 %v7437_v59 }
 0x4a6   :  { %5167 = vmatpush1.bf16.msra.mxu0 %v6365_v39  ;;  %5196 = vmatpush3.bf16.msra.mxu1 %v6474_v31 }
 0x4a7   :  { %5169 = vmatprep.subr.bf16.mxu0 %v6368_v44  ;;  %5197 = vmatprep.subr.bf16.mxu1 %v7437_v59 }
 0x4aa   :  { %5171 = vmatpush1.bf16.msra.mxu0 %v6371_v52  ;;  %5199 = vmatpush3.bf16.msra.mxu1 %v6478_v36 }
 0x4ab   :  { %5173 = vmatprep.subr.bf16.mxu0 %v6374_v57  ;;  %5200 = vmatprep.subr.bf16.mxu1 %v7437_v59 }
 0x4ae   :  { %5175 = vmatpush1.bf16.msra.mxu0 %v6377_v1  ;;  %5202 = vmatpush3.bf16.msra.mxu1 %v6482_v40 }
 0x4af   :  { %5177 = vmatprep.subr.bf16.mxu0 %v6380_v6  ;;  %5203 = vmatprep.subr.bf16.mxu1 %v7437_v59 }
 0x4b2   :  { %5179 = vmatpush1.bf16.msra.mxu0 %v6383_v15  ;;  %5205 = vmatpush3.bf16.msra.mxu1 %v6488_v45 }
 0x4b3   :  { %5181 = vmatprep.subr.bf16.mxu0 %v6386_v20  ;;  %5206 = vmatprep.subr.bf16.mxu1 %v7437_v59 }
 0x4b6   :  { %5183 = vmatpush1.bf16.msra.mxu0 %v6389_v29  ;;  %5208 = vmatpush3.bf16.msra.mxu1 %v6492_v49 }
 0x4b7   :  { %5185 = vmatprep.subr.bf16.mxu0 %v6392_v34  ;;  %5209 = vmatprep.subr.bf16.mxu1 %v7437_v59 }
 0x4ba   :  { %5187 = vmatpush1.bf16.msra.mxu0 %v6395_v41  ;;  %5211 = vmatpush3.bf16.msra.mxu1 %v6496_v53 }
 0x4bb   :  { %5213 = vmatprep.subr.bf16.mxu0 %v6351_v9  ;;  %5244 = vmatprep.subr.bf16.mxu1 %v7437_v59 }
 0x570   :  { %v1224_v32 = vpop.f32.mrb[8].mxu0  ;;  %v1295_v47 = vpop.f32.mrb[32].mxu1 }
 0x571   :  { %v1299_v50 = vadd.f32 %v1224_v32, %v6543_v33  ;;  %v1226_v58 = vpop.f32.mrb[9].mxu0  ;;  %v4338_v8 = vpop.f32.mrb[33].mxu1  ;;  %v1313_v14 = vadd.f32 %v6579_v24, %v1295_v47 }
 0x572   :  { %v1300_v2 = vadd.f32 %v1226_v58, %v6545_v38 }
 0x573   :  { %v3748_v4 = vmul.f32 -1.442695, %v1299_v50 }
 0x574   :  { %v3749_v7 = vmul.f32 -1.442695, %v1300_v2 }
 0x575   :  { %5981 = vpow2.f32 %v3748_v4 }
 0x576   :  { %5983 = vpow2.f32 %v3749_v7 }
 0x57f   :  { %v5982_v28 = vpop.eup %5981 }
 0x580   :  { %v1307_v11 = vadd.f32 1.0, %v5982_v28  ;;  %v5984_v0 = vpop.eup %5983 }
 0x581   :  { %v1308_v5 = vadd.f32 1.0, %v5984_v0 }
 0x582   :  { %5985 = vrcp.f32 %v1307_v11 }
 0x583   :  { %5987 = vrcp.f32 %v1308_v5 }
 0x58c   :  { %v5986_v17 = vpop.eup %5985 }
 0x58d   :  { %v1314_v23 = vmul.f32 %v5986_v17, %v1313_v14  ;;  %v5988_v25 = vpop.eup %5987 }
 0x58e   :  { %v1317_v62 = vsub.f32 1.0, %v5988_v25  ;;  %v1319_v30 = vmul.f32 %v5988_v25, %v6715_v42 }
 0x58f   :  { %v1315_v33 = vadd.f32 %v1314_v23, %v6570_v54 }
 0x591   :  { %5989 = vtanh.f32 %v1315_v33 }
 0x59b   :  { %v5990_v38 = vpop.eup %5989 }
 0x59c   :  { %v1318_v19 = vmul.f32 %v5990_v38, %v1317_v62  ;;  %v1852_v38 = vld [vmem:[#allocation10 + $0x38] sm:$0xff] }
 0x59e   :  { %v6759_v16 = vadd.f32 %v1319_v30, %v1318_v19  ;;  %v1855_v19 = vld [vmem:[#allocation10 + $0x50] sm:$0xff] }
 0x5a0   :  { %1394 = vmatmul.mubr.f32.vlgmr.msra.gmra.mrb[10].mxu0 %v6759_v16  ;;  %4372 = vmatmul.mubr.f32.vlgmr.msra.gmra.mrb[34].mxu1 %v6759_v16 }
 0x5a1   :  { %5215 = vmatpush1.bf16.msra.mxu0 %v6353_v13  ;;  %5246 = vmatpush3.bf16.msra.mxu1 %v6462_v21 }
 0x5a2   :  { %5217 = vmatprep.subr.bf16.mxu0 %v6357_v22  ;;  %5247 = vmatprep.subr.bf16.mxu1 %v7437_v59 }
 0x5a3   :  { %1564 = vmatprep.mubr.f32.mxu0 %v7438_v56  ;;  %4406 = vmatprep.mubr.msk.f32.mxu1 %vm6204_vm0, %v7438_v56 }
 0x5a5   :  { %5219 = vmatpush1.bf16.msra.mxu0 %v6359_v26  ;;  %5249 = vmatpush3.bf16.msra.mxu1 %v6469_v27 }
 0x5a6   :  { %5221 = vmatprep.subr.bf16.mxu0 %v6362_v35  ;;  %5250 = vmatprep.subr.bf16.mxu1 %v7437_v59 }
 0x5a9   :  { %5223 = vmatpush1.bf16.msra.mxu0 %v6365_v39  ;;  %5252 = vmatpush3.bf16.msra.mxu1 %v6474_v31 }
 0x5aa   :  { %5225 = vmatprep.subr.bf16.mxu0 %v6368_v44  ;;  %5253 = vmatprep.subr.bf16.mxu1 %v7437_v59 }
 0x5ad   :  { %5227 = vmatpush1.bf16.msra.mxu0 %v6371_v52  ;;  %5255 = vmatpush3.bf16.msra.mxu1 %v6478_v36 }
 0x5ae   :  { %5229 = vmatprep.subr.bf16.mxu0 %v6374_v57  ;;  %5256 = vmatprep.subr.bf16.mxu1 %v7437_v59 }
 0x5b1   :  { %5231 = vmatpush1.bf16.msra.mxu0 %v6377_v1  ;;  %5258 = vmatpush3.bf16.msra.mxu1 %v6482_v40 }
 0x5b2   :  { %5233 = vmatprep.subr.bf16.mxu0 %v6380_v6  ;;  %5259 = vmatprep.subr.bf16.mxu1 %v7437_v59 }
 0x5b5   :  { %5235 = vmatpush1.bf16.msra.mxu0 %v6383_v15  ;;  %5261 = vmatpush3.bf16.msra.mxu1 %v6488_v45 }
 0x5b6   :  { %5237 = vmatprep.subr.bf16.mxu0 %v6386_v20  ;;  %5262 = vmatprep.subr.bf16.mxu1 %v7437_v59 }
 0x5b9   :  { %5239 = vmatpush1.bf16.msra.mxu0 %v6389_v29  ;;  %5264 = vmatpush3.bf16.msra.mxu1 %v6492_v49 }
 0x5ba   :  { %5241 = vmatprep.subr.bf16.mxu0 %v6392_v34  ;;  %5265 = vmatprep.subr.bf16.mxu1 %v7437_v59 }
 0x5bd   :  { %5243 = vmatpush1.bf16.msra.mxu0 %v6395_v41  ;;  %5267 = vmatpush3.bf16.msra.mxu1 %v6496_v53 }
 0x5be   :  { %5269 = vmatprep.subr.bf16.mxu0 %v6351_v9  ;;  %5300 = vmatprep.subr.bf16.mxu1 %v7437_v59 }
 0x673   :  { %v1395_v54 = vpop.f32.mrb[10].mxu0  ;;  %v1466_v37 = vpop.f32.mrb[34].mxu1 }
 0x674   :  { %v1470_v32 = vadd.f32 %v1395_v54, %v6547_v43  ;;  %v1397_v47 = vpop.f32.mrb[11].mxu0  ;;  %v4373_v50 = vpop.f32.mrb[35].mxu1  ;;  %v1484_v9 = vadd.f32 %v6579_v24, %v1466_v37  ;;  %v1853_v37 = vld [vmem:[#allocation10 + $0x40] sm:$0xff] }
 0x675   :  { %v1471_v58 = vadd.f32 %v1397_v47, %v6549_v48  ;;  %v5328_v50 = vpack.c.bf16 %v1855_v19, %v1852_v38 }
 0x676   :  { %v3750_v8 = vmul.f32 -1.442695, %v1470_v32  ;;  %v1856_v32 = vld [vmem:[#allocation10 + $0x58] sm:$0xff] }
 0x677   :  { %v3751_v2 = vmul.f32 -1.442695, %v1471_v58  ;;  %v1851_v58 = vld [vmem:[#allocation10 + $0x30] sm:$0xff] }
 0x678   :  { %5991 = vpow2.f32 %v3750_v8  ;;  %v1854_v8 = vld [vmem:[#allocation10 + $0x48] sm:$0xff] }
 0x679   :  { %5993 = vpow2.f32 %v3751_v2  ;;  %v5360_v2 = vpack.c.bf16 %v1856_v32, %v1853_v37  ;;  %v1888_v37 = vld [vmem:[#allocation10 + $0x158] sm:$0xff]  ;;  %v1891_v32 = vld [vmem:[#allocation10 + $0x170] sm:$0xff] }
 0x682   :  { %v5992_v4 = vpop.eup %5991 }
 0x683   :  { %v1478_v7 = vadd.f32 1.0, %v5992_v4  ;;  %v5994_v28 = vpop.eup %5993  ;;  %v1861_v4 = vld [vmem:[#allocation10 + $0x80] sm:$0xff] }
 0x684   :  { %v1479_v11 = vadd.f32 1.0, %v5994_v28  ;;  %v1862_v28 = vld [vmem:[#allocation10 + $0x88] sm:$0xff] }
 0x685   :  { %5995 = vrcp.f32 %v1478_v7  ;;  %v1859_v7 = vld [vmem:[#allocation10 + $0x70] sm:$0xff] }
 0x686   :  { %5997 = vrcp.f32 %v1479_v11  ;;  %v5330_v11 = vpack.c.bf16 %v1854_v8, %v1851_v58  ;;  %v5352_v8 = vpack.c.bf16 %v1891_v32, %v1888_v37  ;;  %v2196_v37 = vld [vmem:[#allocation11 + $0x150] sm:$0xff]  ;;  %v2199_v32 = vld [vmem:[#allocation11 + $0x168] sm:$0xff] }
 0x68f   :  { %v5996_v0 = vpop.eup %5995 }
 0x690   :  { %v1485_v5 = vmul.f32 %v5996_v0, %v1484_v9  ;;  %v5998_v14 = vpop.eup %5997  ;;  %v5364_v0 = vpack.c.bf16 %v1862_v28, %v1859_v7  ;;  %v2154_v28 = vld [vmem:[#allocation11] sm:$0xff] }
 0x691   :  { %v1488_v17 = vsub.f32 1.0, %v5998_v14  ;;  %v1490_v33 = vmul.f32 %v5998_v14, %v6759_v16  ;;  %v1864_v14 = vld [vmem:[#allocation10 + $0x98] sm:$0xff] }
 0x692   :  { %v1486_v43 = vadd.f32 %v1485_v5, %v6568_v46  ;;  %v1848_v46 = vld [vmem:[#allocation10 + $0x18] sm:$0xff]  ;;  %v1857_v5 = vld [vmem:[#allocation10 + $0x60] sm:$0xff] }
 0x694   :  { %5999 = vtanh.f32 %v1486_v43  ;;  %v1860_v43 = vld [vmem:[#allocation10 + $0x78] sm:$0xff] }
 0x69e   :  { %v6000_v48 = vpop.eup %5999 }
 0x69f   :  { %v1489_v23 = vmul.f32 %v6000_v48, %v1488_v17  ;;  %v1867_v17 = vld [vmem:[#allocation10 + $0xb0] sm:$0xff]  ;;  %v1865_v48 = vld [vmem:[#allocation10 + $0xa0] sm:$0xff] }
 0x6a1   :  { %v6803_v25 = vadd.f32 %v1490_v33, %v1489_v23  ;;  %v1868_v23 = vld [vmem:[#allocation10 + $0xb8] sm:$0xff]  ;;  %v5334_v33 = vpack.c.bf16 %v1860_v43, %v1857_v5  ;;  %v2163_v5 = vld [vmem:[#allocation11 + $0x48] sm:$0xff] }
 0x6a3   :  { %1565 = vmatmul.mubr.f32.vlgmr.msra.gmra.mrb[12].mxu0 %v6803_v25  ;;  %4407 = vmatmul.mubr.f32.vlgmr.msra.gmra.mrb[36].mxu1 %v6803_v25 }
 0x6a4   :  { %5271 = vmatpush1.bf16.msra.mxu0 %v6353_v13  ;;  %5302 = vmatpush3.bf16.msra.mxu1 %v6462_v21  ;;  %v1846_v13 = vld [vmem:[#allocation10 + $0x8] sm:$0xff] }
 0x6a5   :  { %5273 = vmatprep.subr.bf16.mxu0 %v6357_v22  ;;  %5303 = vmatprep.subr.bf16.mxu1 %v7437_v59  ;;  %v1849_v22 = vld [vmem:[#allocation10 + $0x20] sm:$0xff] }
 0x6a6   :  { %1735 = vmatprep.mubr.f32.mxu0 %v7438_v56  ;;  %4441 = vmatprep.mubr.msk.f32.mxu1 %vm6204_vm0, %v7438_v56 }
 0x6a8   :  { %5275 = vmatpush1.bf16.msra.mxu0 %v6359_v26  ;;  %5305 = vmatpush3.bf16.msra.mxu1 %v6469_v27  ;;  %v1847_v26 = vld [vmem:[#allocation10 + $0x10] sm:$0xff] }
 0x6a9   :  { %5277 = vmatprep.subr.bf16.mxu0 %v6362_v35  ;;  %5306 = vmatprep.subr.bf16.mxu1 %v7437_v59  ;;  %v5324_v35 = vpack.c.bf16 %v1849_v22, %v1846_v13  ;;  %v5336_v13 = vpack.c.bf16 %v1867_v17, %v1864_v14  ;;  %v5368_v22 = vpack.c.bf16 %v1868_v23, %v1865_v48  ;;  %v2167_v14 = vld [vmem:[#allocation11 + $0x68] sm:$0xff]  ;;  %v2170_v17 = vld [vmem:[#allocation11 + $0x80] sm:$0xff] }
 0x6aa   :  { %v6884_v48 = vpack.c.bf16 %v2170_v17, %v2167_v14  ;;  %v2166_v23 = vld [vmem:[#allocation11 + $0x60] sm:$0xff]  ;;  %v2192_v14 = vld [vmem:[#allocation11 + $0x130] sm:$0xff]  ;;  %v2195_v17 = vld [vmem:[#allocation11 + $0x148] sm:$0xff] }
 0x6ac   :  { %5279 = vmatpush1.bf16.msra.mxu0 %v6365_v39  ;;  %5308 = vmatpush3.bf16.msra.mxu1 %v6474_v31  ;;  %v1850_v39 = vld [vmem:[#allocation10 + $0x28] sm:$0xff] }
 0x6ad   :  { %5281 = vmatprep.subr.bf16.mxu0 %v6368_v44  ;;  %5309 = vmatprep.subr.bf16.mxu1 %v7437_v59  ;;  %v5356_v44 = vpack.c.bf16 %v1850_v39, %v1847_v26  ;;  %v1863_v26 = vld [vmem:[#allocation10 + $0x90] sm:$0xff]  ;;  %v1870_v39 = vld [vmem:[#allocation10 + $0xc8] sm:$0xff] }
 0x6b0   :  { %5283 = vmatpush1.bf16.msra.mxu0 %v6371_v52  ;;  %5311 = vmatpush3.bf16.msra.mxu1 %v6478_v36 }
 0x6b1   :  { %5285 = vmatprep.subr.bf16.mxu0 %v6374_v57  ;;  %5312 = vmatprep.subr.bf16.mxu1 %v7437_v59 }
 0x6b4   :  { %5287 = vmatpush1.bf16.msra.mxu0 %v6377_v1  ;;  %5314 = vmatpush3.bf16.msra.mxu1 %v6482_v40 }
 0x6b5   :  { %5289 = vmatprep.subr.bf16.mxu0 %v6380_v6  ;;  %5315 = vmatprep.subr.bf16.mxu1 %v7437_v59 }
 0x6b8   :  { %5291 = vmatpush1.bf16.msra.mxu0 %v6383_v15  ;;  %5317 = vmatpush3.bf16.msra.mxu1 %v6488_v45 }
 0x6b9   :  { %5293 = vmatprep.subr.bf16.mxu0 %v6386_v20  ;;  %5318 = vmatprep.subr.bf16.mxu1 %v7437_v59 }
 0x6bc   :  { %5295 = vmatpush1.bf16.msra.mxu0 %v6389_v29  ;;  %5320 = vmatpush3.bf16.msra.mxu1 %v6492_v49 }
 0x6bd   :  { %5297 = vmatprep.subr.bf16.mxu0 %v6392_v34  ;;  %5321 = vmatprep.subr.bf16.mxu1 %v7437_v59 }
 0x6c0   :  { %5299 = vmatpush1.bf16.msra.mxu0 %v6395_v41  ;;  %5323 = vmatpush3.bf16.msra.mxu1 %v6496_v53 }
 0x6c1   :  { %5325 = vmatprep.subr.bf16.mxu0 %v5324_v35  ;;  %5357 = vmatprep.subr.bf16.mxu1 %v5356_v44  ;;  %v1866_v35 = vld [vmem:[#allocation10 + $0xa8] sm:$0xff] }
 0x776   :  { %v1566_v52 = vpop.f32.mrb[12].mxu0  ;;  %v1637_v57 = vpop.f32.mrb[36].mxu1 }
 0x777   :  { %v1641_v1 = vadd.f32 %v1566_v52, %v6551_v51  ;;  %v1568_v6 = vpop.f32.mrb[13].mxu0  ;;  %v4408_v15 = vpop.f32.mrb[37].mxu1  ;;  %v1655_v36 = vadd.f32 %v6579_v24, %v1637_v57  ;;  %v1871_v52 = vld [vmem:[#allocation10 + $0xd0] sm:$0xff]  ;;  %v1874_v57 = vld [vmem:[#allocation10 + $0xe8] sm:$0xff] }
 0x778   :  { %v1642_v20 = vadd.f32 %v1568_v6, %v6554_v63  ;;  %v1845_v63 = vld [vmem:[#allocation10] sm:$0xff]  ;;  %v5372_v15 = vpack.c.bf16 %v1874_v57, %v1871_v52  ;;  %v2179_v57 = vld [vmem:[#allocation11 + $0xc8] sm:$0xff] }
 0x779   :  { %v3752_v29 = vmul.f32 -1.442695, %v1641_v1  ;;  %v5326_v47 = vpack.c.bf16 %v1848_v46, %v1845_v63  ;;  %v5338_v1 = vpack.c.bf16 %v1866_v35, %v1863_v26  ;;  %v1883_v63 = vld [vmem:[#allocation10 + $0x130] sm:$0xff]  ;;  %v1886_v46 = vld [vmem:[#allocation10 + $0x148] sm:$0xff] }
 0x77a   :  { %v3753_v34 = vmul.f32 -1.442695, %v1642_v20  ;;  %v1869_v20 = vld [vmem:[#allocation10 + $0xc0] sm:$0xff]  ;;  %v5380_v19 = vpack.c.bf16 %v1886_v46, %v1883_v63  ;;  %v2176_v26 = vld [vmem:[#allocation11 + $0xb0] sm:$0xff]  ;;  %v2159_v46 = vld [vmem:[#allocation11 + $0x28] sm:$0xff] }
 0x77b   :  { %6001 = vpow2.f32 %v3752_v29  ;;  %v1872_v29 = vld [vmem:[#allocation10 + $0xd8] sm:$0xff]  ;;  %v2156_v63 = vld [vmem:[#allocation11 + $0x10] sm:$0xff] }
 0x77c   :  { %6003 = vpow2.f32 %v3753_v34  ;;  %v1876_v34 = vld [vmem:[#allocation10 + $0xf8] sm:$0xff] }
 0x785   :  { %v6002_v41 = vpop.eup %6001 }
 0x786   :  { %v1649_v21 = vadd.f32 1.0, %v6002_v41  ;;  %v6004_v27 = vpop.eup %6003  ;;  %v1879_v41 = vld [vmem:[#allocation10 + $0x110] sm:$0xff] }
 0x787   :  { %v1650_v31 = vadd.f32 1.0, %v6004_v27  ;;  %v1880_v27 = vld [vmem:[#allocation10 + $0x118] sm:$0xff] }
 0x788   :  { %6005 = vrcp.f32 %v1649_v21  ;;  %v1877_v21 = vld [vmem:[#allocation10 + $0x100] sm:$0xff] }
 0x789   :  { %6007 = vrcp.f32 %v1650_v31  ;;  %v5342_v31 = vpack.c.bf16 %v1872_v29, %v1869_v20  ;;  %v2181_v20 = vld [vmem:[#allocation11 + $0xd8] sm:$0xff] }
 0x792   :  { %v6006_v40 = vpop.eup %6005 }
 0x793   :  { %v1656_v45 = vmul.f32 %v6006_v40, %v1655_v36  ;;  %v6008_v53 = vpop.eup %6007  ;;  %v5344_v36 = vpack.c.bf16 %v1879_v41, %v1876_v34  ;;  %v5376_v40 = vpack.c.bf16 %v1880_v27, %v1877_v21  ;;  %v2185_v34 = vld [vmem:[#allocation11 + $0xf8] sm:$0xff]  ;;  %v2188_v41 = vld [vmem:[#allocation11 + $0x110] sm:$0xff] }
 0x794   :  { %v1659_v51 = vsub.f32 1.0, %v6008_v53  ;;  %v1661_v54 = vmul.f32 %v6008_v53, %v6803_v25  ;;  %v1882_v53 = vld [vmem:[#allocation10 + $0x128] sm:$0xff]  ;;  %v6902_v21 = vpack.c.bf16 %v2188_v41, %v2185_v34  ;;  %v2184_v27 = vld [vmem:[#allocation11 + $0xf0] sm:$0xff] }
 0x795   :  { %v1657_v49 = vadd.f32 %v1656_v45, %v6574_v12  ;;  %v1858_v12 = vld [vmem:[#allocation10 + $0x68] sm:$0xff]  ;;  %v1875_v45 = vld [vmem:[#allocation10 + $0xf0] sm:$0xff] }
 0x796   :  { %v5332_v9 = vpack.c.bf16 %v1861_v4, %v1858_v12  ;;  %v1890_v4 = vld [vmem:[#allocation10 + $0x168] sm:$0xff] }
 0x797   :  { %6009 = vtanh.f32 %v1657_v49  ;;  %v1878_v49 = vld [vmem:[#allocation10 + $0x108] sm:$0xff] }
 0x7a1   :  { %v6010_v62 = vpop.eup %6009 }
 0x7a2   :  { %v1660_v30 = vmul.f32 %v6010_v62, %v1659_v51  ;;  %v1885_v51 = vld [vmem:[#allocation10 + $0x140] sm:$0xff]  ;;  %v5346_v62 = vpack.c.bf16 %v1878_v49, %v1875_v45 }
 0x7a3   :  { %v5348_v38 = vpack.c.bf16 %v1885_v51, %v1882_v53  ;;  %v2194_v45 = vld [vmem:[#allocation11 + $0x140] sm:$0xff]  ;;  %v2193_v51 = vld [vmem:[#allocation11 + $0x138] sm:$0xff] }
 0x7a4   :  { %v6845_v24 = vadd.f32 %v1661_v54, %v1660_v30  ;;  %v1881_v30 = vld [vmem:[#allocation10 + $0x120] sm:$0xff]  ;;  %v1884_v54 = vld [vmem:[#allocation10 + $0x138] sm:$0xff] }
 0x7a5   :  { %v5350_v58 = vpack.c.bf16 %v1884_v54, %v1881_v30  ;;  %v2190_v49 = vld [vmem:[#allocation11 + $0x120] sm:$0xff]  ;;  %v2200_v30 = vld [vmem:[#allocation11 + $0x170] sm:$0xff] }
 0x7a6   :  { %1736 = vmatmul.mubr.f32.vlgmr.msra.gmra.mrb[14].mxu0 %v6845_v24  ;;  %4442 = vmatmul.mubr.f32.vlgmr.msra.gmra.mrb[38].mxu1 %v6845_v24 }
 0x7a7   :  { %5327 = vmatpush1.bf16.msra.mxu0 %v5326_v47  ;;  %5359 = vmatpush3.bf16.msra.mxu1 %v5356_v44  ;;  %v1873_v44 = vld [vmem:[#allocation10 + $0xe0] sm:$0xff] }
 0x7a8   :  { %4476 = vmatprep.mubr.f32.mxu1 %v6583_v55  ;;  %5329 = vmatprep.subr.bf16.mxu0 %v5328_v50  ;;  %v5340_v6 = vpack.c.bf16 %v1873_v44, %v1870_v39  ;;  %v1889_v47 = vld [vmem:[#allocation10 + $0x160] sm:$0xff]  ;;  %v1892_v50 = vld [vmem:[#allocation10 + $0x178] sm:$0xff]  ;;  %v2172_v39 = vld [vmem:[#allocation11 + $0x90] sm:$0xff] }
 0x7a9   :  { %5361 = vmatprep.subr.bf16.mxu1 %v5360_v2  ;;  %1974 = vmatprep.mubr.f32.mxu0 %v7438_v56  ;;  %v5384_v12 = vpack.c.bf16 %v1892_v50, %v1889_v47  ;;  %v2175_v44 = vld [vmem:[#allocation11 + $0xa8] sm:$0xff]  ;;  %v6921_v47 = vpack.c.bf16 %v2199_v32, %v2196_v37  ;;  %v2162_v50 = vld [vmem:[#allocation11 + $0x40] sm:$0xff] }
 0x7aa   :  { %v6892_v52 = vpack.c.bf16 %v2175_v44, %v2172_v39 }
 0x7ab   :  { %5331 = vmatpush1.bf16.msra.mxu0 %v5330_v11  ;;  %5363 = vmatpush3.bf16.msra.mxu1 %v5360_v2  ;;  %v1887_v2 = vld [vmem:[#allocation10 + $0x150] sm:$0xff] }
 0x7ac   :  { %5333 = vmatprep.subr.bf16.mxu0 %v5332_v9  ;;  %5365 = vmatprep.subr.bf16.mxu1 %v5364_v0  ;;  %v5354_v7 = vpack.c.bf16 %v1890_v4, %v1887_v2  ;;  %v2171_v2 = vld [vmem:[#allocation11 + $0x88] sm:$0xff]  ;;  %v2174_v4 = vld [vmem:[#allocation11 + $0xa0] sm:$0xff] }
 0x7af   :  { %5335 = vmatpush1.bf16.msra.mxu0 %v5334_v33  ;;  %5367 = vmatpush3.bf16.msra.mxu1 %v5364_v0  ;;  %v2160_v0 = vld [vmem:[#allocation11 + $0x30] sm:$0xff]  ;;  %v2169_v33 = vld [vmem:[#allocation11 + $0x78] sm:$0xff] }
 0x7b0   :  { %5337 = vmatprep.subr.bf16.mxu0 %v5336_v13  ;;  %5369 = vmatprep.subr.bf16.mxu1 %v5368_v22  ;;  %v6880_v43 = vpack.c.bf16 %v2163_v5, %v2160_v0  ;;  %v6886_v13 = vpack.c.bf16 %v2169_v33, %v2166_v23  ;;  %v2189_v0 = vld [vmem:[#allocation11 + $0x118] sm:$0xff]  ;;  %v6944_v23 = vpack.c.bf16 %v2195_v17, %v2192_v14  ;;  %v2198_v33 = vld [vmem:[#allocation11 + $0x160] sm:$0xff] }
 0x7b3   :  { %5339 = vmatpush1.bf16.msra.mxu0 %v5338_v1  ;;  %5371 = vmatpush3.bf16.msra.mxu1 %v5368_v22  ;;  %v2173_v22 = vld [vmem:[#allocation11 + $0x98] sm:$0xff]  ;;  %v2182_v1 = vld [vmem:[#allocation11 + $0xe0] sm:$0xff] }
 0x7b4   :  { %5341 = vmatprep.subr.bf16.mxu0 %v5340_v6  ;;  %5373 = vmatprep.subr.bf16.mxu1 %v5372_v15  ;;  %v6890_v35 = vpack.c.bf16 %v2176_v26, %v2173_v22  ;;  %v6896_v6 = vpack.c.bf16 %v2182_v1, %v2179_v57  ;;  %v2201_v22 = vld [vmem:[#allocation11 + $0x178] sm:$0xff] }
 0x7b5   :  { %v6948_v26 = vpack.c.bf16 %v2201_v22, %v2198_v33 }
 0x7b7   :  { %5343 = vmatpush1.bf16.msra.mxu0 %v5342_v31  ;;  %5375 = vmatpush3.bf16.msra.mxu1 %v5372_v15  ;;  %v2178_v15 = vld [vmem:[#allocation11 + $0xc0] sm:$0xff]  ;;  %v2187_v31 = vld [vmem:[#allocation11 + $0x108] sm:$0xff] }
 0x7b8   :  { %5345 = vmatprep.subr.bf16.mxu0 %v5344_v36  ;;  %5377 = vmatprep.subr.bf16.mxu1 %v5376_v40  ;;  %v6898_v29 = vpack.c.bf16 %v2181_v20, %v2178_v15  ;;  %v6904_v36 = vpack.c.bf16 %v2187_v31, %v2184_v27 }
 0x7bb   :  { %5347 = vmatpush1.bf16.msra.mxu0 %v5346_v62  ;;  %5379 = vmatpush3.bf16.msra.mxu1 %v5376_v40  ;;  %v2191_v40 = vld [vmem:[#allocation11 + $0x128] sm:$0xff]  ;;  %v6910_v62 = vpack.c.bf16 %v2193_v51, %v2190_v49  ;;  %v6101_v49 = vld [vmem:[%s7418_s5] ss:$0 sm:$0xff] }
 0x7bc   :  { %5349 = vmatprep.subr.bf16.mxu0 %v5348_v38  ;;  %5381 = vmatprep.subr.bf16.mxu1 %v5380_v19  ;;  %v6908_v53 = vpack.c.bf16 %v2194_v45, %v2191_v40  ;;  %v6912_v38 = vpack.c.bf16 %v2159_v46, %v2156_v63 }
 0x7bf   :  { %5351 = vmatpush1.bf16.msra.mxu0 %v5350_v58  ;;  %5383 = vmatpush3.bf16.msra.mxu1 %v5380_v19  ;;  %v2197_v19 = vld [vmem:[#allocation11 + $0x158] sm:$0xff] }
 0x7c0   :  { %5353 = vmatprep.subr.bf16.mxu0 %v5352_v8  ;;  %5385 = vmatprep.subr.bf16.mxu1 %v5384_v12  ;;  %v6915_v54 = vpack.c.bf16 %v2200_v30, %v2197_v19  ;;  %v2165_v58 = vld [vmem:[#allocation11 + $0x58] sm:$0xff] }
 0x7c1   :  { %v6923_v8 = vpack.c.bf16 %v2165_v58, %v2162_v50 }
 0x7c3   :  { %5355 = vmatpush1.bf16.msra.mxu0 %v5354_v7  ;;  %5387 = vmatpush3.bf16.msra.mxu1 %v5384_v12  ;;  %v2168_v12 = vld [vmem:[#allocation11 + $0x70] sm:$0xff] }
 0x7c4   :  { %5420 = vmatprep.subr.bf16.mxu1 %v7437_v59  ;;  %v6929_v7 = vpack.c.bf16 %v2171_v2, %v2168_v12 }
 0x7c6   :  { %1975 = vmatmul.mubr.f32.vlgmr.msra.gmra.mrb[16].mxu0 %v6583_v55  ;;  %4477 = vmatmul.mubr.f32.vlgmr.msra.gmra.mrb[40].mxu1 %v6627_v18  ;;  %v2155_v55 = vld [vmem:[#allocation11 + $0x8] sm:$0xff] }
 0x7c7   :  { %4479 = vmatprep.mubr.f32.mxu1 %v6671_v60  ;;  %1980 = vmatprep.mubr.f32.mxu0 %v7438_v56 }
 0x7c8   :  { %5422 = vmatpush3.bf16.msra.mxu1 %v6912_v38 }
 0x7c9   :  { %5423 = vmatprep.subr.bf16.mxu1 %v7437_v59 }
 0x7ca   :  { %1981 = vmatmul.mubr.f32.gmra.mrb[18].mxu0 %v6627_v18  ;;  %4480 = vmatmul.mubr.f32.gmra.mrb[42].mxu1 %v6715_v42  ;;  %v2158_v18 = vld [vmem:[#allocation11 + $0x20] sm:$0xff] }
 0x7cb   :  { %4482 = vmatprep.mubr.f32.mxu1 %v6759_v16  ;;  %1986 = vmatprep.mubr.f32.mxu0 %v7438_v56 }
 0x7cc   :  { %5425 = vmatpush3.bf16.msra.mxu1 %v6923_v8 }
 0x7cd   :  { %5426 = vmatprep.subr.bf16.mxu1 %v7437_v59 }
 0x7ce   :  { %1987 = vmatmul.mubr.f32.gmra.mrb[20].mxu0 %v6671_v60  ;;  %4483 = vmatmul.mubr.f32.gmra.mrb[44].mxu1 %v6803_v25  ;;  %v6872_v60 = vpack.c.bf16 %v2158_v18, %v2155_v55  ;;  %v2177_v55 = vld [vmem:[#allocation11 + $0xb8] sm:$0xff] }
 0x7cf   :  { %4485 = vmatprep.mubr.f32.mxu1 %v6845_v24  ;;  %1992 = vmatprep.mubr.f32.mxu0 %v7438_v56  ;;  %v6932_v18 = vpack.c.bf16 %v2177_v55, %v2174_v4 }
 0x7d0   :  { %5389 = vmatprep.subr.bf16.mxu0 %v6872_v60  ;;  %5428 = vmatpush3.bf16.msra.mxu1 %v6929_v7 }
 0x7d1   :  { %5429 = vmatprep.subr.bf16.mxu1 %v7437_v59 }
 0x7d2   :  { %1993 = vmatmul.mubr.f32.gmra.mrb[22].mxu0 %v6715_v42  ;;  %v2157_v42 = vld [vmem:[#allocation11 + $0x18] sm:$0xff] }
 0x7d3   :  { %1998 = vmatprep.mubr.f32.mxu0 %v7438_v56  ;;  %v6874_v11 = vpack.c.bf16 %v2157_v42, %v2154_v28  ;;  %v2180_v28 = vld [vmem:[#allocation11 + $0xd0] sm:$0xff]  ;;  %v2183_v42 = vld [vmem:[#allocation11 + $0xe8] sm:$0xff] }
 0x7d4   :  { %5431 = vmatpush3.bf16.msra.mxu1 %v6932_v18 }
 0x7d5   :  { %5391 = vmatpush1.bf16.msra.mxu0 %v6874_v11  ;;  %5432 = vmatprep.subr.bf16.mxu1 %v7437_v59 }
 0x7d6   :  { %1999 = vmatmul.mubr.f32.gmra.mrb[24].mxu0 %v6759_v16  ;;  %v2161_v16 = vld [vmem:[#allocation11 + $0x38] sm:$0xff] }
 0x7d7   :  { %2004 = vmatprep.mubr.f32.mxu0 %v7438_v56 }
 0x7da   :  { %2005 = vmatmul.mubr.f32.gmra.mrb[26].mxu0 %v6803_v25  ;;  %v2164_v25 = vld [vmem:[#allocation11 + $0x50] sm:$0xff] }
 0x7db   :  { %2010 = vmatprep.mubr.f32.mxu0 %v7438_v56  ;;  %v6878_v9 = vpack.c.bf16 %v2164_v25, %v2161_v16  ;;  %v6936_v16 = vpack.c.bf16 %v2183_v42, %v2180_v28  ;;  %v2186_v25 = vld [vmem:[#allocation11 + $0x100] sm:$0xff]  ;;  %v6979_v28 = vld [vmem:[%s7414_s1 + $0x8] sm:$0xff] }
 0x7dc   :  { %v6940_v5 = vpack.c.bf16 %v2189_v0, %v2186_v25  ;;  %v7439_v0 = vld [vmem:[#allocation16_spill] sm:$0xff] }
 0x7dd   :  { %5393 = vmatprep.subr.bf16.mxu0 %v6878_v9  ;;  %5434 = vmatpush3.bf16.msra.mxu1 %v6936_v16  ;;  %v7440_v14 = vsub.s32 0, %v7439_v0  ;;  %v7441_v22 = vsub.s32 1, %v7439_v0 }
 0x7de   :  { %2011 = vmatmul.mubr.f32.gmra.mrb[28].mxu0 %v6845_v24  ;;  %5435 = vmatprep.subr.bf16.mxu1 %v7437_v59 }
 0x7df   :  { %2016 = vmatprep.mubr.f32.mxu0 %v7438_v56  ;;  %5395 = vmatpush1.bf16.msra.mxu0 %v6880_v43 }
 0x7e0   :  { %5397 = vmatprep.subr.bf16.mxu0 %v6884_v48 }
 0x7e1   :  { %5437 = vmatpush3.bf16.msra.mxu1 %v6940_v5 }
 0x7e2   :  { %5438 = vmatprep.subr.bf16.mxu1 %v7437_v59 }
 0x7e3   :  { %5399 = vmatpush1.bf16.msra.mxu0 %v6886_v13 }
 0x7e4   :  { %5401 = vmatprep.subr.bf16.mxu0 %v6890_v35 }
 0x7e5   :  { %5440 = vmatpush3.bf16.msra.mxu1 %v6944_v23 }
 0x7e6   :  { %5441 = vmatprep.subr.bf16.mxu1 %v7437_v59 }
 0x7e7   :  { %5403 = vmatpush1.bf16.msra.mxu0 %v6892_v52 }
 0x7e8   :  { %5405 = vmatprep.subr.bf16.mxu0 %v6896_v6 }
 0x7e9   :  { %5443 = vmatpush3.bf16.msra.mxu1 %v6948_v26 }
 0x7ea   :  { %5476 = vmatprep.subr.bf16.mxu1 %v7437_v59 }
 0x7eb   :  { %5407 = vmatpush1.bf16.msra.mxu0 %v6898_v29 }
 0x7ec   :  { %5409 = vmatprep.subr.bf16.mxu0 %v6902_v21 }
 0x7ef   :  { %5411 = vmatpush1.bf16.msra.mxu0 %v6904_v36 }
 0x7f0   :  { %5413 = vmatprep.subr.bf16.mxu0 %v6908_v53 }
 0x7f3   :  { %5415 = vmatpush1.bf16.msra.mxu0 %v6910_v62 }
 0x7f4   :  { %5417 = vmatprep.subr.bf16.mxu0 %v6915_v54 }
 0x7f7   :  { %5419 = vmatpush1.bf16.msra.mxu0 %v6921_v47 }
 0x7f8   :  { %5445 = vmatprep.subr.bf16.mxu0 %v6872_v60 }
 0x879   :  { %v1737_v39 = vpop.f32.mrb[14].mxu0  ;;  %v1808_v44 = vpop.f32.mrb[38].mxu1 }
 0x87a   :  { %v1812_v57 = vadd.f32 %v1737_v39, %v6556_v3  ;;  %v1739_v1 = vpop.f32.mrb[15].mxu0  ;;  %v4443_v15 = vpop.f32.mrb[39].mxu1  ;;  %v1826_v51 = vadd.f32 %v6101_v49, %v1808_v44  ;;  %v7442_v49 = vsub.s32 2, %v7439_v0 }
 0x87b   :  { %v1813_v20 = vadd.f32 %v1739_v1, %v6560_v10 }
 0x87c   :  { %v3754_v34 = vmul.f32 -1.442695, %v1812_v57 }
 0x87d   :  { %v3755_v41 = vmul.f32 -1.442695, %v1813_v20 }
 0x87e   :  { %6011 = vpow2.f32 %v3754_v34 }
 0x87f   :  { %6013 = vpow2.f32 %v3755_v41 }
 0x888   :  { %v6012_v27 = vpop.eup %6011 }
 0x889   :  { %v1820_v31 = vadd.f32 1.0, %v6012_v27  ;;  %v6014_v40 = vpop.eup %6013 }
 0x88a   :  { %v1821_v45 = vadd.f32 1.0, %v6014_v40 }
 0x88b   :  { %6015 = vrcp.f32 %v1820_v31 }
 0x88c   :  { %6017 = vrcp.f32 %v1821_v45  ;;  %v7040_v45 = vld [vmem:[%s7422_s9] ss:$0 sm:$0xff] }
 0x895   :  { %v6016_v63 = vpop.eup %6015 }
 0x896   :  { %v1827_v3 = vmul.f32 %v6016_v63, %v1826_v51  ;;  %v6018_v32 = vpop.eup %6017 }
 0x897   :  { %v1830_v12 = vsub.f32 1.0, %v6018_v32  ;;  %v1832_v55 = vmul.f32 %v6018_v32, %v6845_v24  ;;  %v1893_v24 = vld [vmem:[%s7421_s8] sm:$0x7] }
 0x898   :  { %v1828_v46 = vadd.f32 %v1827_v3, %v6572_v61  ;;  %v7029_v17 = vrot.slane %v1893_v24, %v7440_v14  ;;  %v7033_v39 = vrot.slane %v1893_v24, %v7441_v22  ;;  %v7044_v51 = vrot.slane %v1893_v24, %v7442_v49 }
 0x899   :  { %v6959_v10 = vpop.f32.mrb[40].mxu1 }
 0x89a   :  { %6019 = vtanh.f32 %v1828_v46  ;;  %v6961_v19 = vpop.f32.mrb[41].mxu1  ;;  %v2095_v49 = vadd.f32 %v6959_v10, %v7044_v51 }
 0x89b   :  { %v2090_v32 = vadd.f32 %v6961_v19, %v7044_v51 }
 0x89d   :  { %v6963_v30 = vpop.f32.mrb[42].mxu1 }
 0x89e   :  { %v6965_v37 = vpop.f32.mrb[43].mxu1 }
 0x8a1   :  { %v6967_v50 = vpop.f32.mrb[44].mxu1 }
 0x8a2   :  { %v6969_v58 = vpop.f32.mrb[45].mxu1 }
 0x8a4   :  { %v6020_v2 = vpop.eup %6019 }
 0x8a5   :  { %v1831_v4 = vmul.f32 %v6020_v2, %v1830_v12 }
 0x8a7   :  { %v1833_v61 = vadd.f32 %v1832_v55, %v1831_v4 }
 0x8a9   :  { %1836 = vst [vmem:[%s7426_s13] sm:$0xff] %v1833_v61  ;;  %2017 = vmatmul.mubr.f32.gmra.mrb[30].mxu0 %v1833_v61  ;;  %4486 = vmatmul.mubr.f32.gmra.mrb[46].mxu1 %v1833_v61 }
 0x8aa   :  { %2278 = vmatprep.mubr.f32.mxu0 %v7438_v56  ;;  %4520 = vmatprep.mubr.msk.f32.mxu1 %vm6204_vm0, %v7438_v56 }
 0x8ad   :  { %2279 = vmatmul.mubr.f32.vlgmr.msra.gmra.mrb[16].mxu0 %v6979_v28  ;;  %4521 = vmatmul.mubr.f32.vlgmr.msra.gmra.mrb[48].mxu1 %v6979_v28 }
 0x8ae   :  { %5447 = vmatpush1.bf16.msra.mxu0 %v6874_v11  ;;  %5478 = vmatpush3.bf16.msra.mxu1 %v6912_v38 }
 0x8af   :  { %5449 = vmatprep.subr.bf16.mxu0 %v6878_v9  ;;  %5479 = vmatprep.subr.bf16.mxu1 %v7437_v59 }
 0x8b0   :  { %2447 = vmatprep.mubr.f32.mxu0 %v7438_v56  ;;  %4555 = vmatprep.mubr.msk.f32.mxu1 %vm6204_vm0, %v7438_v56 }
 0x8b2   :  { %5451 = vmatpush1.bf16.msra.mxu0 %v6880_v43  ;;  %5481 = vmatpush3.bf16.msra.mxu1 %v6923_v8 }
 0x8b3   :  { %5453 = vmatprep.subr.bf16.mxu0 %v6884_v48  ;;  %5482 = vmatprep.subr.bf16.mxu1 %v7437_v59 }
 0x8b6   :  { %5455 = vmatpush1.bf16.msra.mxu0 %v6886_v13  ;;  %5484 = vmatpush3.bf16.msra.mxu1 %v6929_v7 }
 0x8b7   :  { %5457 = vmatprep.subr.bf16.mxu0 %v6890_v35  ;;  %5485 = vmatprep.subr.bf16.mxu1 %v7437_v59 }
 0x8ba   :  { %5459 = vmatpush1.bf16.msra.mxu0 %v6892_v52  ;;  %5487 = vmatpush3.bf16.msra.mxu1 %v6932_v18 }
 0x8bb   :  { %5461 = vmatprep.subr.bf16.mxu0 %v6896_v6  ;;  %5488 = vmatprep.subr.bf16.mxu1 %v7437_v59 }
 0x8be   :  { %5463 = vmatpush1.bf16.msra.mxu0 %v6898_v29  ;;  %5490 = vmatpush3.bf16.msra.mxu1 %v6936_v16 }
 0x8bf   :  { %5465 = vmatprep.subr.bf16.mxu0 %v6902_v21  ;;  %5491 = vmatprep.subr.bf16.mxu1 %v7437_v59 }
 0x8c2   :  { %5467 = vmatpush1.bf16.msra.mxu0 %v6904_v36  ;;  %5493 = vmatpush3.bf16.msra.mxu1 %v6940_v5 }
 0x8c3   :  { %5469 = vmatprep.subr.bf16.mxu0 %v6908_v53  ;;  %5494 = vmatprep.subr.bf16.mxu1 %v7437_v59 }
 0x8c6   :  { %5471 = vmatpush1.bf16.msra.mxu0 %v6910_v62  ;;  %5496 = vmatpush3.bf16.msra.mxu1 %v6944_v23 }
 0x8c7   :  { %5473 = vmatprep.subr.bf16.mxu0 %v6915_v54  ;;  %5497 = vmatprep.subr.bf16.mxu1 %v7437_v59 }
 0x8ca   :  { %5475 = vmatpush1.bf16.msra.mxu0 %v6921_v47  ;;  %5499 = vmatpush3.bf16.msra.mxu1 %v6948_v26 }
 0x8cb   :  { %5501 = vmatprep.subr.bf16.mxu0 %v6872_v60  ;;  %5532 = vmatprep.subr.bf16.mxu1 %v7437_v59 }
 0x97c   :  { %v7023_v42 = vpop.f32.mrb[46].mxu1 }
 0x97d   :  { %v7025_v25 = vpop.f32.mrb[47].mxu1 }
 0x980   :  { %v2280_v33 = vpop.f32.mrb[16].mxu0  ;;  %v2351_v44 = vpop.f32.mrb[48].mxu1 }
 0x981   :  { %v5900_v57 = vadd.f32 %v2280_v33, %v7029_v17  ;;  %v2282_v1 = vpop.f32.mrb[17].mxu0  ;;  %v4522_v15 = vpop.f32.mrb[49].mxu1  ;;  %v2369_v3 = vadd.f32 %v7040_v45, %v2351_v44 }
 0x982   :  { %v5901_v34 = vadd.f32 %v2282_v1, %v7033_v39 }
 0x983   :  { %v3758_v20 = vmul.f32 -1.442695, %v5900_v57 }
 0x984   :  { %v3759_v41 = vmul.f32 -1.442695, %v5901_v34 }
 0x985   :  { %6021 = vpow2.f32 %v3758_v20 }
 0x986   :  { %6023 = vpow2.f32 %v3759_v41 }
 0x98f   :  { %v6022_v27 = vpop.eup %6021 }
 0x990   :  { %v2363_v31 = vadd.f32 1.0, %v6022_v27  ;;  %v6024_v40 = vpop.eup %6023 }
 0x991   :  { %v2364_v63 = vadd.f32 1.0, %v6024_v40 }
 0x992   :  { %6025 = vrcp.f32 %v2363_v31 }
 0x993   :  { %6027 = vrcp.f32 %v2364_v63 }
 0x99c   :  { %v6026_v46 = vpop.eup %6025 }
 0x99d   :  { %v2370_v12 = vmul.f32 %v6026_v46, %v2369_v3  ;;  %v6028_v4 = vpop.eup %6027 }
 0x99e   :  { %v2373_v55 = vsub.f32 1.0, %v6028_v4  ;;  %v2375_v33 = vmul.f32 %v6028_v4, %v6979_v28 }
 0x99f   :  { %v2371_v2 = vadd.f32 %v2370_v12, %v2090_v32 }
 0x9a1   :  { %6029 = vtanh.f32 %v2371_v2 }
 0x9ab   :  { %v6030_v61 = vpop.eup %6029 }
 0x9ac   :  { %v2374_v14 = vmul.f32 %v6030_v61, %v2373_v55 }
 0x9ae   :  { %v7050_v0 = vadd.f32 %v2375_v33, %v2374_v14 }
 0x9b0   :  { %2448 = vmatmul.mubr.f32.vlgmr.msra.gmra.mrb[18].mxu0 %v7050_v0  ;;  %4556 = vmatmul.mubr.f32.vlgmr.msra.gmra.mrb[50].mxu1 %v7050_v0 }
 0x9b1   :  { %5503 = vmatpush1.bf16.msra.mxu0 %v6874_v11  ;;  %5534 = vmatpush3.bf16.msra.mxu1 %v6912_v38 }
 0x9b2   :  { %5505 = vmatprep.subr.bf16.mxu0 %v6878_v9  ;;  %5535 = vmatprep.subr.bf16.mxu1 %v7437_v59 }
 0x9b3   :  { %2617 = vmatprep.mubr.f32.mxu0 %v7438_v56  ;;  %4590 = vmatprep.mubr.msk.f32.mxu1 %vm6204_vm0, %v7438_v56 }
 0x9b5   :  { %5507 = vmatpush1.bf16.msra.mxu0 %v6880_v43  ;;  %5537 = vmatpush3.bf16.msra.mxu1 %v6923_v8 }
 0x9b6   :  { %5509 = vmatprep.subr.bf16.mxu0 %v6884_v48  ;;  %5538 = vmatprep.subr.bf16.mxu1 %v7437_v59 }
 0x9b9   :  { %5511 = vmatpush1.bf16.msra.mxu0 %v6886_v13  ;;  %5540 = vmatpush3.bf16.msra.mxu1 %v6929_v7 }
 0x9ba   :  { %5513 = vmatprep.subr.bf16.mxu0 %v6890_v35  ;;  %5541 = vmatprep.subr.bf16.mxu1 %v7437_v59 }
 0x9bd   :  { %5515 = vmatpush1.bf16.msra.mxu0 %v6892_v52  ;;  %5543 = vmatpush3.bf16.msra.mxu1 %v6932_v18 }
 0x9be   :  { %5517 = vmatprep.subr.bf16.mxu0 %v6896_v6  ;;  %5544 = vmatprep.subr.bf16.mxu1 %v7437_v59 }
 0x9c1   :  { %5519 = vmatpush1.bf16.msra.mxu0 %v6898_v29  ;;  %5546 = vmatpush3.bf16.msra.mxu1 %v6936_v16 }
 0x9c2   :  { %5521 = vmatprep.subr.bf16.mxu0 %v6902_v21  ;;  %5547 = vmatprep.subr.bf16.mxu1 %v7437_v59 }
 0x9c5   :  { %5523 = vmatpush1.bf16.msra.mxu0 %v6904_v36  ;;  %5549 = vmatpush3.bf16.msra.mxu1 %v6940_v5 }
 0x9c6   :  { %5525 = vmatprep.subr.bf16.mxu0 %v6908_v53  ;;  %5550 = vmatprep.subr.bf16.mxu1 %v7437_v59 }
 0x9c9   :  { %5527 = vmatpush1.bf16.msra.mxu0 %v6910_v62  ;;  %5552 = vmatpush3.bf16.msra.mxu1 %v6944_v23 }
 0x9ca   :  { %5529 = vmatprep.subr.bf16.mxu0 %v6915_v54  ;;  %5553 = vmatprep.subr.bf16.mxu1 %v7437_v59 }
 0x9cd   :  { %5531 = vmatpush1.bf16.msra.mxu0 %v6921_v47  ;;  %5555 = vmatpush3.bf16.msra.mxu1 %v6948_v26 }
 0x9ce   :  { %5557 = vmatprep.subr.bf16.mxu0 %v6872_v60  ;;  %5588 = vmatprep.subr.bf16.mxu1 %v7437_v59 }
 0xa83   :  { %v2449_v19 = vpop.f32.mrb[18].mxu0  ;;  %v2520_v28 = vpop.f32.mrb[50].mxu1 }
 0xa84   :  { %v5902_v24 = vadd.f32 %v2449_v19, %v7029_v17  ;;  %v2451_v22 = vpop.f32.mrb[19].mxu0  ;;  %v4557_v44 = vpop.f32.mrb[51].mxu1  ;;  %v2538_v31 = vadd.f32 %v7040_v45, %v2520_v28 }
 0xa85   :  { %v5903_v1 = vadd.f32 %v2451_v22, %v7033_v39 }
 0xa86   :  { %v3760_v57 = vmul.f32 -1.442695, %v5902_v24 }
 0xa87   :  { %v3761_v15 = vmul.f32 -1.442695, %v5903_v1 }
 0xa88   :  { %6031 = vpow2.f32 %v3760_v57 }
 0xa89   :  { %6033 = vpow2.f32 %v3761_v15 }
 0xa92   :  { %v6032_v20 = vpop.eup %6031 }
 0xa93   :  { %v2532_v34 = vadd.f32 1.0, %v6032_v20  ;;  %v6034_v41 = vpop.eup %6033 }
 0xa94   :  { %v2533_v27 = vadd.f32 1.0, %v6034_v41  ;;  %v2100_v41 = vadd.f32 %v6965_v37, %v7044_v51 }
 0xa95   :  { %6035 = vrcp.f32 %v2532_v34 }
 0xa96   :  { %6037 = vrcp.f32 %v2533_v27 }
 0xa9f   :  { %v6036_v40 = vpop.eup %6035 }
 0xaa0   :  { %v2539_v63 = vmul.f32 %v6036_v40, %v2538_v31  ;;  %v6038_v46 = vpop.eup %6037 }
 0xaa1   :  { %v2542_v32 = vsub.f32 1.0, %v6038_v46  ;;  %v2544_v4 = vmul.f32 %v6038_v46, %v7050_v0 }
 0xaa2   :  { %v2540_v3 = vadd.f32 %v2539_v63, %v2095_v49 }
 0xaa4   :  { %6039 = vtanh.f32 %v2540_v3 }
 0xaae   :  { %v6040_v12 = vpop.eup %6039 }
 0xaaf   :  { %v2543_v2 = vmul.f32 %v6040_v12, %v2542_v32 }
 0xab1   :  { %v7095_v55 = vadd.f32 %v2544_v4, %v2543_v2 }
 0xab3   :  { %2618 = vmatmul.mubr.f32.vlgmr.msra.gmra.mrb[20].mxu0 %v7095_v55  ;;  %4591 = vmatmul.mubr.f32.vlgmr.msra.gmra.mrb[52].mxu1 %v7095_v55 }
 0xab4   :  { %5559 = vmatpush1.bf16.msra.mxu0 %v6874_v11  ;;  %5590 = vmatpush3.bf16.msra.mxu1 %v6912_v38 }
 0xab5   :  { %5561 = vmatprep.subr.bf16.mxu0 %v6878_v9  ;;  %5591 = vmatprep.subr.bf16.mxu1 %v7437_v59 }
 0xab6   :  { %2787 = vmatprep.mubr.f32.mxu0 %v7438_v56  ;;  %4625 = vmatprep.mubr.msk.f32.mxu1 %vm6204_vm0, %v7438_v56 }
 0xab8   :  { %5563 = vmatpush1.bf16.msra.mxu0 %v6880_v43  ;;  %5593 = vmatpush3.bf16.msra.mxu1 %v6923_v8 }
 0xab9   :  { %5565 = vmatprep.subr.bf16.mxu0 %v6884_v48  ;;  %5594 = vmatprep.subr.bf16.mxu1 %v7437_v59 }
 0xabc   :  { %5567 = vmatpush1.bf16.msra.mxu0 %v6886_v13  ;;  %5596 = vmatpush3.bf16.msra.mxu1 %v6929_v7 }
 0xabd   :  { %5569 = vmatprep.subr.bf16.mxu0 %v6890_v35  ;;  %5597 = vmatprep.subr.bf16.mxu1 %v7437_v59 }
 0xac0   :  { %5571 = vmatpush1.bf16.msra.mxu0 %v6892_v52  ;;  %5599 = vmatpush3.bf16.msra.mxu1 %v6932_v18 }
 0xac1   :  { %5573 = vmatprep.subr.bf16.mxu0 %v6896_v6  ;;  %5600 = vmatprep.subr.bf16.mxu1 %v7437_v59 }
 0xac4   :  { %5575 = vmatpush1.bf16.msra.mxu0 %v6898_v29  ;;  %5602 = vmatpush3.bf16.msra.mxu1 %v6936_v16 }
 0xac5   :  { %5577 = vmatprep.subr.bf16.mxu0 %v6902_v21  ;;  %5603 = vmatprep.subr.bf16.mxu1 %v7437_v59 }
 0xac8   :  { %5579 = vmatpush1.bf16.msra.mxu0 %v6904_v36  ;;  %5605 = vmatpush3.bf16.msra.mxu1 %v6940_v5 }
 0xac9   :  { %5581 = vmatprep.subr.bf16.mxu0 %v6908_v53  ;;  %5606 = vmatprep.subr.bf16.mxu1 %v7437_v59 }
 0xacc   :  { %5583 = vmatpush1.bf16.msra.mxu0 %v6910_v62  ;;  %5608 = vmatpush3.bf16.msra.mxu1 %v6944_v23 }
 0xacd   :  { %5585 = vmatprep.subr.bf16.mxu0 %v6915_v54  ;;  %5609 = vmatprep.subr.bf16.mxu1 %v7437_v59 }
 0xad0   :  { %5587 = vmatpush1.bf16.msra.mxu0 %v6921_v47  ;;  %5611 = vmatpush3.bf16.msra.mxu1 %v6948_v26 }
 0xad1   :  { %5613 = vmatprep.subr.bf16.mxu0 %v6872_v60  ;;  %5644 = vmatprep.subr.bf16.mxu1 %v7437_v59 }
 0xb86   :  { %v2619_v10 = vpop.f32.mrb[20].mxu0  ;;  %v2690_v61 = vpop.f32.mrb[52].mxu1 }
 0xb87   :  { %v5904_v14 = vadd.f32 %v2619_v10, %v7029_v17  ;;  %v2621_v33 = vpop.f32.mrb[21].mxu0  ;;  %v4592_v19 = vpop.f32.mrb[53].mxu1  ;;  %v2708_v20 = vadd.f32 %v7040_v45, %v2690_v61 }
 0xb88   :  { %v5905_v24 = vadd.f32 %v2621_v33, %v7033_v39 }
 0xb89   :  { %v3762_v28 = vmul.f32 -1.442695, %v5904_v14 }
 0xb8a   :  { %v3763_v22 = vmul.f32 -1.442695, %v5905_v24 }
 0xb8b   :  { %6041 = vpow2.f32 %v3762_v28 }
 0xb8c   :  { %6043 = vpow2.f32 %v3763_v22 }
 0xb95   :  { %v6042_v44 = vpop.eup %6041 }
 0xb96   :  { %v2702_v57 = vadd.f32 1.0, %v6042_v44  ;;  %v6044_v1 = vpop.eup %6043 }
 0xb97   :  { %v2703_v15 = vadd.f32 1.0, %v6044_v1  ;;  %v2105_v1 = vadd.f32 %v6963_v30, %v7044_v51 }
 0xb98   :  { %6045 = vrcp.f32 %v2702_v57 }
 0xb99   :  { %6047 = vrcp.f32 %v2703_v15 }
 0xba2   :  { %v6046_v34 = vpop.eup %6045 }
 0xba3   :  { %v2709_v27 = vmul.f32 %v6046_v34, %v2708_v20  ;;  %v6048_v40 = vpop.eup %6047 }
 0xba4   :  { %v2712_v49 = vsub.f32 1.0, %v6048_v40  ;;  %v2714_v46 = vmul.f32 %v6048_v40, %v7095_v55 }
 0xba5   :  { %v2710_v31 = vadd.f32 %v2709_v27, %v2100_v41 }
 0xba7   :  { %6049 = vtanh.f32 %v2710_v31 }
 0xbb1   :  { %v6050_v63 = vpop.eup %6049 }
 0xbb2   :  { %v2713_v3 = vmul.f32 %v6050_v63, %v2712_v49 }
 0xbb4   :  { %v7140_v32 = vadd.f32 %v2714_v46, %v2713_v3 }
 0xbb6   :  { %2788 = vmatmul.mubr.f32.vlgmr.msra.gmra.mrb[22].mxu0 %v7140_v32  ;;  %4626 = vmatmul.mubr.f32.vlgmr.msra.gmra.mrb[54].mxu1 %v7140_v32 }
 0xbb7   :  { %5615 = vmatpush1.bf16.msra.mxu0 %v6874_v11  ;;  %5646 = vmatpush3.bf16.msra.mxu1 %v6912_v38 }
 0xbb8   :  { %5617 = vmatprep.subr.bf16.mxu0 %v6878_v9  ;;  %5647 = vmatprep.subr.bf16.mxu1 %v7437_v59 }
 0xbb9   :  { %2957 = vmatprep.mubr.f32.mxu0 %v7438_v56  ;;  %4660 = vmatprep.mubr.msk.f32.mxu1 %vm6204_vm0, %v7438_v56 }
 0xbbb   :  { %5619 = vmatpush1.bf16.msra.mxu0 %v6880_v43  ;;  %5649 = vmatpush3.bf16.msra.mxu1 %v6923_v8 }
 0xbbc   :  { %5621 = vmatprep.subr.bf16.mxu0 %v6884_v48  ;;  %5650 = vmatprep.subr.bf16.mxu1 %v7437_v59 }
 0xbbf   :  { %5623 = vmatpush1.bf16.msra.mxu0 %v6886_v13  ;;  %5652 = vmatpush3.bf16.msra.mxu1 %v6929_v7 }
 0xbc0   :  { %5625 = vmatprep.subr.bf16.mxu0 %v6890_v35  ;;  %5653 = vmatprep.subr.bf16.mxu1 %v7437_v59 }
 0xbc3   :  { %5627 = vmatpush1.bf16.msra.mxu0 %v6892_v52  ;;  %5655 = vmatpush3.bf16.msra.mxu1 %v6932_v18 }
 0xbc4   :  { %5629 = vmatprep.subr.bf16.mxu0 %v6896_v6  ;;  %5656 = vmatprep.subr.bf16.mxu1 %v7437_v59 }
 0xbc7   :  { %5631 = vmatpush1.bf16.msra.mxu0 %v6898_v29  ;;  %5658 = vmatpush3.bf16.msra.mxu1 %v6936_v16 }
 0xbc8   :  { %5633 = vmatprep.subr.bf16.mxu0 %v6902_v21  ;;  %5659 = vmatprep.subr.bf16.mxu1 %v7437_v59 }
 0xbcb   :  { %5635 = vmatpush1.bf16.msra.mxu0 %v6904_v36  ;;  %5661 = vmatpush3.bf16.msra.mxu1 %v6940_v5 }
 0xbcc   :  { %5637 = vmatprep.subr.bf16.mxu0 %v6908_v53  ;;  %5662 = vmatprep.subr.bf16.mxu1 %v7437_v59 }
 0xbcf   :  { %5639 = vmatpush1.bf16.msra.mxu0 %v6910_v62  ;;  %5664 = vmatpush3.bf16.msra.mxu1 %v6944_v23 }
 0xbd0   :  { %5641 = vmatprep.subr.bf16.mxu0 %v6915_v54  ;;  %5665 = vmatprep.subr.bf16.mxu1 %v7437_v59 }
 0xbd3   :  { %5643 = vmatpush1.bf16.msra.mxu0 %v6921_v47  ;;  %5667 = vmatpush3.bf16.msra.mxu1 %v6948_v26 }
 0xbd4   :  { %5669 = vmatprep.subr.bf16.mxu0 %v6872_v60  ;;  %5700 = vmatprep.subr.bf16.mxu1 %v7437_v59 }
 0xc89   :  { %v2789_v37 = vpop.f32.mrb[22].mxu0  ;;  %v2860_v12 = vpop.f32.mrb[54].mxu1 }
 0xc8a   :  { %v5906_v2 = vadd.f32 %v2789_v37, %v7029_v17  ;;  %v2791_v4 = vpop.f32.mrb[23].mxu0  ;;  %v4627_v10 = vpop.f32.mrb[55].mxu1  ;;  %v2878_v44 = vadd.f32 %v7040_v45, %v2860_v12 }
 0xc8b   :  { %v5907_v14 = vadd.f32 %v2791_v4, %v7033_v39 }
 0xc8c   :  { %v3764_v61 = vmul.f32 -1.442695, %v5906_v2 }
 0xc8d   :  { %v3765_v33 = vmul.f32 -1.442695, %v5907_v14 }
 0xc8e   :  { %6051 = vpow2.f32 %v3764_v61 }
 0xc8f   :  { %6053 = vpow2.f32 %v3765_v33 }
 0xc98   :  { %v6052_v19 = vpop.eup %6051 }
 0xc99   :  { %v2872_v28 = vadd.f32 1.0, %v6052_v19  ;;  %v6054_v24 = vpop.eup %6053 }
 0xc9a   :  { %v2873_v22 = vadd.f32 1.0, %v6054_v24  ;;  %v2110_v24 = vadd.f32 %v6969_v58, %v7044_v51 }
 0xc9b   :  { %6055 = vrcp.f32 %v2872_v28 }
 0xc9c   :  { %6057 = vrcp.f32 %v2873_v22 }
 0xca5   :  { %v6056_v57 = vpop.eup %6055 }
 0xca6   :  { %v2879_v15 = vmul.f32 %v6056_v57, %v2878_v44  ;;  %v6058_v34 = vpop.eup %6057 }
 0xca7   :  { %v2882_v41 = vsub.f32 1.0, %v6058_v34  ;;  %v2884_v40 = vmul.f32 %v6058_v34, %v7140_v32 }
 0xca8   :  { %v2880_v20 = vadd.f32 %v2879_v15, %v2105_v1 }
 0xcaa   :  { %6059 = vtanh.f32 %v2880_v20 }
 0xcb4   :  { %v6060_v27 = vpop.eup %6059 }
 0xcb5   :  { %v2883_v31 = vmul.f32 %v6060_v27, %v2882_v41 }
 0xcb7   :  { %v7185_v49 = vadd.f32 %v2884_v40, %v2883_v31 }
 0xcb9   :  { %2958 = vmatmul.mubr.f32.vlgmr.msra.gmra.mrb[24].mxu0 %v7185_v49  ;;  %4661 = vmatmul.mubr.f32.vlgmr.msra.gmra.mrb[56].mxu1 %v7185_v49 }
 0xcba   :  { %5671 = vmatpush1.bf16.msra.mxu0 %v6874_v11  ;;  %5702 = vmatpush3.bf16.msra.mxu1 %v6912_v38 }
 0xcbb   :  { %5673 = vmatprep.subr.bf16.mxu0 %v6878_v9  ;;  %5703 = vmatprep.subr.bf16.mxu1 %v7437_v59 }
 0xcbc   :  { %3127 = vmatprep.mubr.f32.mxu0 %v7438_v56  ;;  %4695 = vmatprep.mubr.msk.f32.mxu1 %vm6204_vm0, %v7438_v56 }
 0xcbe   :  { %5675 = vmatpush1.bf16.msra.mxu0 %v6880_v43  ;;  %5705 = vmatpush3.bf16.msra.mxu1 %v6923_v8 }
 0xcbf   :  { %5677 = vmatprep.subr.bf16.mxu0 %v6884_v48  ;;  %5706 = vmatprep.subr.bf16.mxu1 %v7437_v59 }
 0xcc2   :  { %5679 = vmatpush1.bf16.msra.mxu0 %v6886_v13  ;;  %5708 = vmatpush3.bf16.msra.mxu1 %v6929_v7 }
 0xcc3   :  { %5681 = vmatprep.subr.bf16.mxu0 %v6890_v35  ;;  %5709 = vmatprep.subr.bf16.mxu1 %v7437_v59 }
 0xcc6   :  { %5683 = vmatpush1.bf16.msra.mxu0 %v6892_v52  ;;  %5711 = vmatpush3.bf16.msra.mxu1 %v6932_v18 }
 0xcc7   :  { %5685 = vmatprep.subr.bf16.mxu0 %v6896_v6  ;;  %5712 = vmatprep.subr.bf16.mxu1 %v7437_v59 }
 0xcca   :  { %5687 = vmatpush1.bf16.msra.mxu0 %v6898_v29  ;;  %5714 = vmatpush3.bf16.msra.mxu1 %v6936_v16 }
 0xccb   :  { %5689 = vmatprep.subr.bf16.mxu0 %v6902_v21  ;;  %5715 = vmatprep.subr.bf16.mxu1 %v7437_v59 }
 0xcce   :  { %5691 = vmatpush1.bf16.msra.mxu0 %v6904_v36  ;;  %5717 = vmatpush3.bf16.msra.mxu1 %v6940_v5 }
 0xccf   :  { %5693 = vmatprep.subr.bf16.mxu0 %v6908_v53  ;;  %5718 = vmatprep.subr.bf16.mxu1 %v7437_v59 }
 0xcd2   :  { %5695 = vmatpush1.bf16.msra.mxu0 %v6910_v62  ;;  %5720 = vmatpush3.bf16.msra.mxu1 %v6944_v23 }
 0xcd3   :  { %5697 = vmatprep.subr.bf16.mxu0 %v6915_v54  ;;  %5721 = vmatprep.subr.bf16.mxu1 %v7437_v59 }
 0xcd6   :  { %5699 = vmatpush1.bf16.msra.mxu0 %v6921_v47  ;;  %5723 = vmatpush3.bf16.msra.mxu1 %v6948_v26 }
 0xcd7   :  { %5725 = vmatprep.subr.bf16.mxu0 %v6872_v60  ;;  %5756 = vmatprep.subr.bf16.mxu1 %v7437_v59 }
 0xd8c   :  { %v2959_v30 = vpop.f32.mrb[24].mxu0  ;;  %v3030_v63 = vpop.f32.mrb[56].mxu1 }
 0xd8d   :  { %v5908_v3 = vadd.f32 %v2959_v30, %v7029_v17  ;;  %v2961_v46 = vpop.f32.mrb[25].mxu0  ;;  %v4662_v37 = vpop.f32.mrb[57].mxu1  ;;  %v3048_v19 = vadd.f32 %v7040_v45, %v3030_v63 }
 0xd8e   :  { %v5909_v2 = vadd.f32 %v2961_v46, %v7033_v39 }
 0xd8f   :  { %v3766_v12 = vmul.f32 -1.442695, %v5908_v3 }
 0xd90   :  { %v3767_v4 = vmul.f32 -1.442695, %v5909_v2 }
 0xd91   :  { %6061 = vpow2.f32 %v3766_v12 }
 0xd92   :  { %6063 = vpow2.f32 %v3767_v4 }
 0xd9b   :  { %v6062_v10 = vpop.eup %6061 }
 0xd9c   :  { %v3042_v61 = vadd.f32 1.0, %v6062_v10  ;;  %v6064_v14 = vpop.eup %6063 }
 0xd9d   :  { %v3043_v33 = vadd.f32 1.0, %v6064_v14 }
 0xd9e   :  { %6065 = vrcp.f32 %v3042_v61  ;;  %v2115_v61 = vadd.f32 %v6967_v50, %v7044_v51 }
 0xd9f   :  { %6067 = vrcp.f32 %v3043_v33 }
 0xda8   :  { %v6066_v28 = vpop.eup %6065 }
 0xda9   :  { %v3049_v22 = vmul.f32 %v6066_v28, %v3048_v19  ;;  %v6068_v57 = vpop.eup %6067 }
 0xdaa   :  { %v3052_v1 = vsub.f32 1.0, %v6068_v57  ;;  %v3054_v34 = vmul.f32 %v6068_v57, %v7185_v49 }
 0xdab   :  { %v3050_v44 = vadd.f32 %v3049_v22, %v2110_v24 }
 0xdad   :  { %6069 = vtanh.f32 %v3050_v44 }
 0xdb7   :  { %v6070_v15 = vpop.eup %6069 }
 0xdb8   :  { %v3053_v20 = vmul.f32 %v6070_v15, %v3052_v1 }
 0xdba   :  { %v7230_v41 = vadd.f32 %v3054_v34, %v3053_v20  ;;  %v3582_v20 = vld [vmem:[%s7423_s10 + $0x20] sm:$0xff]  ;;  %v3583_v34 = vld [vmem:[%s7423_s10 + $0x28] sm:$0xff] }
 0xdbc   :  { %3128 = vmatmul.mubr.f32.vlgmr.msra.gmra.mrb[26].mxu0 %v7230_v41  ;;  %4696 = vmatmul.mubr.f32.vlgmr.msra.gmra.mrb[58].mxu1 %v7230_v41 }
 0xdbd   :  { %5727 = vmatpush1.bf16.msra.mxu0 %v6874_v11  ;;  %5758 = vmatpush3.bf16.msra.mxu1 %v6912_v38 }
 0xdbe   :  { %5729 = vmatprep.subr.bf16.mxu0 %v6878_v9  ;;  %5759 = vmatprep.subr.bf16.mxu1 %v7437_v59 }
 0xdbf   :  { %3297 = vmatprep.mubr.f32.mxu0 %v7438_v56  ;;  %4730 = vmatprep.mubr.msk.f32.mxu1 %vm6204_vm0, %v7438_v56 }
 0xdc1   :  { %5731 = vmatpush1.bf16.msra.mxu0 %v6880_v43  ;;  %5761 = vmatpush3.bf16.msra.mxu1 %v6923_v8 }
 0xdc2   :  { %5733 = vmatprep.subr.bf16.mxu0 %v6884_v48  ;;  %5762 = vmatprep.subr.bf16.mxu1 %v7437_v59 }
 0xdc5   :  { %5735 = vmatpush1.bf16.msra.mxu0 %v6886_v13  ;;  %5764 = vmatpush3.bf16.msra.mxu1 %v6929_v7 }
 0xdc6   :  { %5737 = vmatprep.subr.bf16.mxu0 %v6890_v35  ;;  %5765 = vmatprep.subr.bf16.mxu1 %v7437_v59 }
 0xdc9   :  { %5739 = vmatpush1.bf16.msra.mxu0 %v6892_v52  ;;  %5767 = vmatpush3.bf16.msra.mxu1 %v6932_v18 }
 0xdca   :  { %5741 = vmatprep.subr.bf16.mxu0 %v6896_v6  ;;  %5768 = vmatprep.subr.bf16.mxu1 %v7437_v59 }
 0xdcd   :  { %5743 = vmatpush1.bf16.msra.mxu0 %v6898_v29  ;;  %5770 = vmatpush3.bf16.msra.mxu1 %v6936_v16 }
 0xdce   :  { %5745 = vmatprep.subr.bf16.mxu0 %v6902_v21  ;;  %5771 = vmatprep.subr.bf16.mxu1 %v7437_v59 }
 0xdd1   :  { %5747 = vmatpush1.bf16.msra.mxu0 %v6904_v36  ;;  %5773 = vmatpush3.bf16.msra.mxu1 %v6940_v5 }
 0xdd2   :  { %5749 = vmatprep.subr.bf16.mxu0 %v6908_v53  ;;  %5774 = vmatprep.subr.bf16.mxu1 %v7437_v59 }
 0xdd5   :  { %5751 = vmatpush1.bf16.msra.mxu0 %v6910_v62  ;;  %5776 = vmatpush3.bf16.msra.mxu1 %v6944_v23 }
 0xdd6   :  { %5753 = vmatprep.subr.bf16.mxu0 %v6915_v54  ;;  %5777 = vmatprep.subr.bf16.mxu1 %v7437_v59 }
 0xdd9   :  { %5755 = vmatpush1.bf16.msra.mxu0 %v6921_v47  ;;  %5779 = vmatpush3.bf16.msra.mxu1 %v6948_v26 }
 0xdda   :  { %5781 = vmatprep.subr.bf16.mxu0 %v6872_v60  ;;  %5812 = vmatprep.subr.bf16.mxu1 %v7437_v59 }
 0xe8f   :  { %v3129_v58 = vpop.f32.mrb[26].mxu0  ;;  %v3200_v27 = vpop.f32.mrb[58].mxu1 }
 0xe90   :  { %v5910_v31 = vadd.f32 %v3129_v58, %v7029_v17  ;;  %v3131_v40 = vpop.f32.mrb[27].mxu0  ;;  %v4697_v30 = vpop.f32.mrb[59].mxu1  ;;  %v3218_v60 = vadd.f32 %v7040_v45, %v3200_v27  ;;  %v5844_v58 = vpack.c.bf16 %v3583_v34, %v3582_v20  ;;  %v3584_v27 = vld [vmem:[%s7423_s10 + $0x30] sm:$0xff] }
 0xe91   :  { %v5911_v3 = vadd.f32 %v3131_v40, %v7033_v39  ;;  %v3586_v30 = vld [vmem:[%s7423_s10 + $0x40] sm:$0xff] }
 0xe92   :  { %v3768_v63 = vmul.f32 -1.442695, %v5910_v31  ;;  %v3585_v31 = vld [vmem:[%s7423_s10 + $0x38] sm:$0xff] }
 0xe93   :  { %v3769_v46 = vmul.f32 -1.442695, %v5911_v3  ;;  %v5848_v40 = vpack.c.bf16 %v3585_v31, %v3584_v27  ;;  %v3588_v3 = vld [vmem:[%s7423_s10 + $0x50] sm:$0xff] }
 0xe94   :  { %6071 = vpow2.f32 %v3768_v63 }
 0xe95   :  { %6073 = vpow2.f32 %v3769_v46  ;;  %v3589_v46 = vld [vmem:[%s7423_s10 + $0x58] sm:$0xff] }
 0xe9e   :  { %v6072_v37 = vpop.eup %6071 }
 0xe9f   :  { %v3212_v12 = vadd.f32 1.0, %v6072_v37  ;;  %v6074_v2 = vpop.eup %6073  ;;  %v5856_v37 = vpack.c.bf16 %v3589_v46, %v3588_v3 }
 0xea0   :  { %v3213_v4 = vadd.f32 1.0, %v6074_v2  ;;  %v3591_v2 = vld [vmem:[%s7423_s10 + $0x68] sm:$0xff] }
 0xea1   :  { %6075 = vrcp.f32 %v3212_v12  ;;  %v3590_v12 = vld [vmem:[%s7423_s10 + $0x60] sm:$0xff] }
 0xea2   :  { %6077 = vrcp.f32 %v3213_v4  ;;  %v5860_v4 = vpack.c.bf16 %v3591_v2, %v3590_v12 }
 0xeab   :  { %v6076_v10 = vpop.eup %6075 }
 0xeac   :  { %v3219_v14 = vmul.f32 %v6076_v10, %v3218_v60  ;;  %v6078_v19 = vpop.eup %6077  ;;  %v3592_v60 = vld [vmem:[%s7423_s10 + $0x70] sm:$0xff]  ;;  %v3593_v10 = vld [vmem:[%s7423_s10 + $0x78] sm:$0xff] }
 0xead   :  { %v3222_v28 = vsub.f32 1.0, %v6078_v19  ;;  %v3224_v44 = vmul.f32 %v6078_v19, %v7230_v41 }
 0xeae   :  { %v3220_v33 = vadd.f32 %v3219_v14, %v2115_v61  ;;  %v5864_v61 = vpack.c.bf16 %v3593_v10, %v3592_v60 }
 0xeb0   :  { %6079 = vtanh.f32 %v3220_v33 }
 0xeba   :  { %v6080_v24 = vpop.eup %6079 }
 0xebb   :  { %v3223_v22 = vmul.f32 %v6080_v24, %v3222_v28 }
 0xebd   :  { %v7275_v57 = vadd.f32 %v3224_v44, %v3223_v22 }
 0xebf   :  { %3298 = vmatmul.mubr.f32.vlgmr.msra.gmra.mrb[28].mxu0 %v7275_v57  ;;  %4731 = vmatmul.mubr.f32.vlgmr.msra.gmra.mrb[60].mxu1 %v7275_v57 }
 0xec0   :  { %5783 = vmatpush1.bf16.msra.mxu0 %v6874_v11  ;;  %5814 = vmatpush3.bf16.msra.mxu1 %v6912_v38  ;;  %v3579_v11 = vld [vmem:[%s7423_s10 + $0x8] sm:$0xff] }
 0xec1   :  { %5785 = vmatprep.subr.bf16.mxu0 %v6878_v9  ;;  %5815 = vmatprep.subr.bf16.mxu1 %v7437_v59 }
 0xec2   :  { %3467 = vmatprep.mubr.f32.mxu0 %v7438_v56  ;;  %4765 = vmatprep.mubr.msk.f32.mxu1 %vm6204_vm0, %v7438_v56  ;;  %v3578_v56 = vld [vmem:[%s7423_s10] sm:$0xff] }
 0xec3   :  { %v5836_v9 = vpack.c.bf16 %v3579_v11, %v3578_v56 }
 0xec4   :  { %5787 = vmatpush1.bf16.msra.mxu0 %v6880_v43  ;;  %5817 = vmatpush3.bf16.msra.mxu1 %v6923_v8 }
 0xec5   :  { %5789 = vmatprep.subr.bf16.mxu0 %v6884_v48  ;;  %5818 = vmatprep.subr.bf16.mxu1 %v7437_v59 }
 0xec8   :  { %5791 = vmatpush1.bf16.msra.mxu0 %v6886_v13  ;;  %5820 = vmatpush3.bf16.msra.mxu1 %v6929_v7 }
 0xec9   :  { %5793 = vmatprep.subr.bf16.mxu0 %v6890_v35  ;;  %5821 = vmatprep.subr.bf16.mxu1 %v7437_v59 }
 0xecc   :  { %5795 = vmatpush1.bf16.msra.mxu0 %v6892_v52  ;;  %5823 = vmatpush3.bf16.msra.mxu1 %v6932_v18 }
 0xecd   :  { %5797 = vmatprep.subr.bf16.mxu0 %v6896_v6  ;;  %5824 = vmatprep.subr.bf16.mxu1 %v7437_v59 }
 0xed0   :  { %5799 = vmatpush1.bf16.msra.mxu0 %v6898_v29  ;;  %5826 = vmatpush3.bf16.msra.mxu1 %v6936_v16 }
 0xed1   :  { %5801 = vmatprep.subr.bf16.mxu0 %v6902_v21  ;;  %5827 = vmatprep.subr.bf16.mxu1 %v7437_v59 }
 0xed4   :  { %5803 = vmatpush1.bf16.msra.mxu0 %v6904_v36  ;;  %5829 = vmatpush3.bf16.msra.mxu1 %v6940_v5 }
 0xed5   :  { %5805 = vmatprep.subr.bf16.mxu0 %v6908_v53  ;;  %5830 = vmatprep.subr.bf16.mxu1 %v7437_v59 }
 0xed8   :  { %5807 = vmatpush1.bf16.msra.mxu0 %v6910_v62  ;;  %5832 = vmatpush3.bf16.msra.mxu1 %v6944_v23  ;;  %v3580_v23 = vld [vmem:[%s7423_s10 + $0x10] sm:$0xff] }
 0xed9   :  { %5809 = vmatprep.subr.bf16.mxu0 %v6915_v54  ;;  %5833 = vmatprep.subr.bf16.mxu1 %v7437_v59 }
 0xedc   :  { %5811 = vmatpush1.bf16.msra.mxu0 %v6921_v47  ;;  %5835 = vmatpush3.bf16.msra.mxu1 %v6948_v26  ;;  %v2120_v47 = vadd.f32 %v7025_v25, %v7044_v51  ;;  %v3581_v26 = vld [vmem:[%s7423_s10 + $0x18] sm:$0xff] }
 0xedd   :  { %5837 = vmatprep.subr.bf16.mxu0 %v5836_v9  ;;  %v5840_v25 = vpack.c.bf16 %v3581_v26, %v3580_v23 }
 0xf92   :  { %v3299_v43 = vpop.f32.mrb[28].mxu0  ;;  %v3370_v48 = vpop.f32.mrb[60].mxu1 }
 0xf93   :  { %v5912_v13 = vadd.f32 %v3299_v43, %v7029_v17  ;;  %v3301_v35 = vpop.f32.mrb[29].mxu0  ;;  %v4732_v59 = vpop.f32.mrb[61].mxu1  ;;  %v3388_v38 = vadd.f32 %v7040_v45, %v3370_v48 }
 0xf94   :  { %v5913_v6 = vadd.f32 %v3301_v35, %v7033_v39 }
 0xf95   :  { %v3770_v52 = vmul.f32 -1.442695, %v5912_v13 }
 0xf96   :  { %v3771_v29 = vmul.f32 -1.442695, %v5913_v6 }
 0xf97   :  { %6081 = vpow2.f32 %v3770_v52 }
 0xf98   :  { %6083 = vpow2.f32 %v3771_v29 }
 0xfa1   :  { %v6082_v21 = vpop.eup %6081 }
 0xfa2   :  { %v3382_v36 = vadd.f32 1.0, %v6082_v21  ;;  %v6084_v53 = vpop.eup %6083 }
 0xfa3   :  { %v3383_v62 = vadd.f32 1.0, %v6084_v53 }
 0xfa4   :  { %6085 = vrcp.f32 %v3382_v36 }
 0xfa5   :  { %6087 = vrcp.f32 %v3383_v62 }
 0xfae   :  { %v6086_v54 = vpop.eup %6085 }
 0xfaf   :  { %v3389_v8 = vmul.f32 %v6086_v54, %v3388_v38  ;;  %v6088_v18 = vpop.eup %6087 }
 0xfb0   :  { %v3392_v16 = vsub.f32 1.0, %v6088_v18  ;;  %v3394_v1 = vmul.f32 %v6088_v18, %v7275_v57 }
 0xfb1   :  { %v3390_v7 = vadd.f32 %v3389_v8, %v2120_v47 }
 0xfb3   :  { %6089 = vtanh.f32 %v3390_v7 }
 0xfbd   :  { %v6090_v5 = vpop.eup %6089 }
 0xfbe   :  { %v3393_v50 = vmul.f32 %v6090_v5, %v3392_v16 }
 0xfc0   :  { %v7330_v15 = vadd.f32 %v3394_v1, %v3393_v50 }
 0xfc2   :  { %3468 = vmatmul.mubr.f32.vlgmr.msra.gmra.mrb[30].mxu0 %v7330_v15  ;;  %4766 = vmatmul.mubr.f32.vlgmr.msra.gmra.mrb[62].mxu1 %v7330_v15 }
 0xfc3   :  { %5839 = vmatpush3.bf16.msra.mxu0 %v5836_v9  ;;  %4800 = vmatprep.mubr.f32.mxu0 %v7050_v0  ;;  %v3587_v0 = vld [vmem:[%s7423_s10 + $0x48] sm:$0xff]  ;;  %v2125_v9 = vadd.f32 %v7023_v42, %v7044_v51 }
 0xfc4   :  { %5841 = vmatprep.subr.bf16.mxu0 %v5840_v25  ;;  %v5852_v63 = vpack.c.bf16 %v3587_v0, %v3586_v30 }
 0xfc7   :  { %5843 = vmatpush3.bf16.msra.mxu0 %v5840_v25 }
 0xfc8   :  { %5845 = vmatprep.subr.bf16.mxu0 %v5844_v58 }
 0xfcb   :  { %5847 = vmatpush3.bf16.msra.mxu0 %v5844_v58 }
 0xfcc   :  { %5849 = vmatprep.subr.bf16.mxu0 %v5848_v40 }
 0xfcf   :  { %5851 = vmatpush3.bf16.msra.mxu0 %v5848_v40 }
 0xfd0   :  { %5853 = vmatprep.subr.bf16.mxu0 %v5852_v63 }
 0xfd3   :  { %5855 = vmatpush3.bf16.msra.mxu0 %v5852_v63 }
 0xfd4   :  { %5857 = vmatprep.subr.bf16.mxu0 %v5856_v37 }
 0xfd7   :  { %5859 = vmatpush3.bf16.msra.mxu0 %v5856_v37 }
 0xfd8   :  { %5861 = vmatprep.subr.bf16.mxu0 %v5860_v4 }
 0xfdb   :  { %5863 = vmatpush3.bf16.msra.mxu0 %v5860_v4 }
 0xfdc   :  { %5865 = vmatprep.subr.bf16.mxu0 %v5864_v61 }
 0xfdf   :  { %5867 = vmatpush3.bf16.msra.mxu0 %v5864_v61 }
 0xfe2   :  { %4801 = vmatmul.mubr.f32.vlgmr.msra.gmra.mrb[32].mxu0 %v7095_v55 }
 0xfe3   :  { %4803 = vmatprep.mubr.f32.mxu0 %v7140_v32 }
 0xfe6   :  { %4804 = vmatmul.mubr.f32.gmra.mrb[34].mxu0 %v7185_v49 }
 0xfe7   :  { %4806 = vmatprep.mubr.f32.mxu0 %v7230_v41 }
 0xfea   :  { %4807 = vmatmul.mubr.f32.gmra.mrb[36].mxu0 %v7275_v57 }
 0xfeb   :  { %4809 = vmatprep.mubr.f32.mxu0 %v7330_v15 }
0x1095   :  { %v3469_v14 = vpop.f32.mrb[30].mxu0  ;;  %v3540_v33 = vpop.f32.mrb[62].mxu1 }
0x1096   :  { %v5914_v19 = vadd.f32 %v3469_v14, %v7029_v17  ;;  %v3471_v28 = vpop.f32.mrb[31].mxu0  ;;  %v4767_v24 = vpop.f32.mrb[63].mxu1  ;;  %v3558_v57 = vadd.f32 %v7040_v45, %v3540_v33 }
0x1097   :  { %v5915_v44 = vadd.f32 %v3471_v28, %v7033_v39  ;;  %v3775_v39 = vld [vmem:[%s7424_s11] ss:$0 sm:$0xff] }
0x1098   :  { %v3772_v22 = vmul.f32 -1.442695, %v5914_v19 }
0x1099   :  { %v3773_v55 = vmul.f32 -1.442695, %v5915_v44 }
0x109a   :  { %6091 = vpow2.f32 %v3772_v22 }
0x109b   :  { %6093 = vpow2.f32 %v3773_v55 }
0x10a4   :  { %v6092_v32 = vpop.eup %6091 }
0x10a5   :  { %v3552_v49 = vadd.f32 1.0, %v6092_v32  ;;  %v6094_v41 = vpop.eup %6093 }
0x10a6   :  { %v3553_v56 = vadd.f32 1.0, %v6094_v41 }
0x10a7   :  { %6095 = vrcp.f32 %v3552_v49 }
0x10a8   :  { %6097 = vrcp.f32 %v3553_v56 }
0x10b1   :  { %v6096_v11 = vpop.eup %6095 }
0x10b2   :  { %v3559_v17 = vmul.f32 %v6096_v11, %v3558_v57  ;;  %v6098_v6 = vpop.eup %6097 }
0x10b3   :  { %v3562_v62 = vsub.f32 1.0, %v6098_v6  ;;  %v3564_v47 = vmul.f32 %v6098_v6, %v7330_v15 }
0x10b4   :  { %v3560_v43 = vadd.f32 %v3559_v17, %v2125_v9 }
0x10b5   :  { %v4802_v48 = vpop.f32.mrb[32].mxu0 }
0x10b6   :  { %6099 = vtanh.f32 %v3560_v43  ;;  %v3673_v13 = vadd.f32 %v4802_v48, %v3775_v39  ;;  %v3667_v35 = vpop.f32.mrb[33].mxu0 }
0x10b7   :  { %v3668_v59 = vadd.f32 %v3775_v39, %v3667_v35 }
0x10b8   :  { %3707 = vst [vmem:[%s7425_s12 + $0x8] sm:$0xff] %v3673_v13 }
0x10b9   :  { %3706 = vst [vmem:[%s7425_s12] sm:$0xff] %v3668_v59  ;;  %v4805_v42 = vpop.f32.mrb[34].mxu0 }
0x10ba   :  { %v3683_v45 = vadd.f32 %v4805_v42, %v3775_v39  ;;  %v3677_v51 = vpop.f32.mrb[35].mxu0 }
0x10bb   :  { %v3678_v52 = vadd.f32 %v3775_v39, %v3677_v51 }
0x10bc   :  { %3709 = vst [vmem:[%s7425_s12 + $0x18] sm:$0xff] %v3683_v45 }
0x10bd   :  { %3708 = vst [vmem:[%s7425_s12 + $0x10] sm:$0xff] %v3678_v52  ;;  %v4808_v29 = vpop.f32.mrb[36].mxu0 }
0x10be   :  { %v3693_v21 = vadd.f32 %v4808_v29, %v3775_v39  ;;  %v3687_v36 = vpop.f32.mrb[37].mxu0 }
0x10bf   :  { %v3688_v53 = vadd.f32 %v3775_v39, %v3687_v36 }
0x10c0   :  { %v6100_v38 = vpop.eup %6099  ;;  %3711 = vst [vmem:[%s7425_s12 + $0x28] sm:$0xff] %v3693_v21 }
0x10c1   :  { %3710 = vst [vmem:[%s7425_s12 + $0x20] sm:$0xff] %v3688_v53  ;;  %v3563_v54 = vmul.f32 %v6100_v38, %v3562_v62 }
0x10c3   :  { %v3565_v8 = vadd.f32 %v3564_v47, %v3563_v54 }
0x10c5   :  { %3774 = vst [vmem:[%s7426_s13 + $0x8] sm:$0xff] %v3565_v8  ;;  %4810 = vmatmul.mubr.f32.gmra.mrb[38].mxu0 %v3565_v8 }
0x1198   :  { %v4811_v7 = vpop.f32.mrb[38].mxu0 }
0x1199   :  { %v3703_v18 = vadd.f32 %v4811_v7, %v3775_v39  ;;  %v3697_v16 = vpop.f32.mrb[39].mxu0 }
0x119a   :  { %v3698_v5 = vadd.f32 %v3775_v39, %v3697_v16 }
0x119b   :  { %3713 = vst [vmem:[%s7425_s12 + $0x38] sm:$0xff] %v3703_v18 }
0x119c   :  { %3712 = vst [vmem:[%s7425_s12 + $0x30] sm:$0xff] %v3698_v5 }
0x119d   :  { %3722 = vsyncpa [#allocation7], 1 }
0x119e   :  { %3723 = vsyncpa [#allocation9], 1 }
0x119f   :  { %3724 = vsyncpa [#allocation12], 1 }

</bundles_post_ra>
